<compile_context>
chip_gen: v7x
topology: tpu7x:2x2x1
jax: 0.10.0
libtpu: 0.0.40
codegen_flags: <defaults>
</compile_context>

<pallas_src>
import jax
import jax.numpy as jnp
from jax import lax
from jax.experimental import pallas as pl
from jax.experimental.pallas import tpu as pltpu

C = 64            # channel / embedding width fixed by the module (Linear(64, 64))
C2 = 2 * C        # conv input channels (concat of two 64-channel maps)
NEG_SLOPE = 0.01  # nn.LeakyReLU default negative_slope
BN_EPS = 1e-5
PAD_L = 8         # left halo offset: conv-input interior starts on an 8-sublane tile boundary


def fusion_kernel(ir_ref, vis_ref, emb_ir_ref, emb_vis_ref,
                  w_att_ref, b_att_ref, w_f_ref,
                  bn_scale_ref, bn_shift_ref,
                  f_out_ref, embf_out_ref,
                  pad_ref):
    Bb, H, W, _ = ir_ref.shape
    WP = pad_ref.shape[2]
    conv_dtype = pad_ref.dtype
    HW = H * W

    # ---------- CA_attention + Conv_embf centre tap: ONE fused matmul -------
    emb_ir = emb_ir_ref[...].reshape(Bb, C)
    emb_vis = emb_vis_ref[...].reshape(Bb, C)
    emb_cat = jnp.concatenate([emb_ir, emb_vis], axis=-1)            # (Bb, 128)
    att = (jnp.dot(emb_cat, w_att_ref[...],
                   preferred_element_type=jnp.float32)
           + b_att_ref[...])                                          # (Bb, 192)
    ir_att = jax.nn.sigmoid(att[:, 0:C])
    vis_att = jax.nn.sigmoid(att[:, C:2 * C])
    emb_f = att[:, 2 * C:3 * C]                                       # (Bb, 64) pre-sigmoid
    sa_emb = jax.nn.sigmoid(emb_f).reshape(Bb, 1, 1, C)

    # ---------- SA fusion (elementwise, channels-last) ----------------------
    ir1 = ir_ref[...] * ir_att.reshape(Bb, 1, 1, C)
    vis1 = vis_ref[...] * vis_att.reshape(Bb, 1, 1, C)
    sa_ir = vis1 * sa_emb + ir1
    sa_vis = vis1 + ir1 * sa_emb
    # Lane-concat to 128 channels so the big interior store is one full-lane
    # (unmasked) store instead of two 64-lane half stores.
    fused = jnp.concatenate([sa_ir, sa_vis], axis=-1).astype(conv_dtype)

    # ---------- padded conv input -------------------------------------------
    # Zero only the halo the 3x3 taps actually read; redone every step so the
    # kernel stays correct when the "parallel" batch axis is sharded across
    # TensorCores (each core keeps its own scratch copy).
    pad_ref[:, 0:1, :, :] = jnp.zeros((Bb, 1, WP, C2), conv_dtype)
    pad_ref[:, H + 1:H + 2, :, :] = jnp.zeros((Bb, 1, WP, C2), conv_dtype)
    pad_ref[:, 1:H + 1, PAD_L - 1:PAD_L, :] = jnp.zeros((Bb, H, 1, C2), conv_dtype)
    pad_ref[:, 1:H + 1, PAD_L + W:PAD_L + W + 1, :] = jnp.zeros((Bb, H, 1, C2), conv_dtype)
    # 128-lane, (8,128)-tile-aligned interior store (starts at sublane 8).
    pad_ref[:, 1:H + 1, PAD_L:PAD_L + W, :] = fused

    # ---------- Conv_f + BN + LeakyReLU + avg pool ---------------------------
    # Accumulating tap matmuls straight off the padded scratch (no im2col),
    # chunked per batch element so live ranges stay bounded.
    embf_out_ref[...] = emb_f.reshape(Bb, 1, C)       # pooled term added below
    bn_scale = bn_scale_ref[...]                      # (1, C)
    bn_shift = bn_shift_ref[...]                      # (1, C)
    inv_hw = 1.0 / float(HW)

    def conv_one(b, carry):
        acc = jnp.zeros((HW, C), jnp.float32)
        for t in range(9):
            dy, dx = t // 3, t % 3
            x0 = PAD_L - 1 + dx
            win = pad_ref[b, dy:dy + H, x0:x0 + W, :]                 # (H, W, 128)
            acc = acc + jnp.dot(win.reshape(HW, C2),
                                w_f_ref[t * C2:(t + 1) * C2, :],
                                preferred_element_type=jnp.float32)
        y = acc * bn_scale + bn_shift                                 # folded eval BN
        y = jnp.where(y > 0, y, NEG_SLOPE * y)                        # LeakyReLU

        # Lane-dense output: pack two adjacent pixels into 128 lanes so the
        # store is full-lane and tile-aligned (wrapper unfolds it back).
        yp = y.reshape(HW // 2, 2, C)
        pair = jnp.concatenate([yp[:, 0, :], yp[:, 1, :]], axis=-1)   # (HW/2, 128)
        f_out_ref[b] = pair

        # AdaptiveAvgPool2d(1) contribution + Conv_embf residual.
        embf_out_ref[b] = (embf_out_ref[b]
                           + jnp.sum(y, axis=0, keepdims=True) * inv_hw)
        return carry

    lax.fori_loop(0, Bb, conv_one, 0)


# --------------------------------------------------------------------------
# Wrapper helpers (VMEM-aware tiling)
# --------------------------------------------------------------------------
def _vmem_capacity_bytes():
    try:
        info = pltpu.get_tpu_info()
        cap = getattr(info, "vmem_capacity_bytes", None)
        if cap:
            return int(cap)
    except Exception:
        pass
    return 64 * 1024 * 1024          # conservative default (v7x per-core VMEM)


def _padded_width(W):
    # interior at [PAD_L, PAD_L + W), one read halo column on each side.
    return ((PAD_L + W + 1) + 7) // 8 * 8


def _step_vmem_bytes(bb, H, W, conv_bytes):
    """Rough per-grid-step VMEM footprint (double-buffered I/O + scratch)."""
    WP = _padded_width(W)
    io = 2 * (2 * bb * H * W * C * 4          # ir + vis input blocks
              + bb * H * W * C * 4            # f output block
              + 3 * bb * C * 4)               # emb_ir / emb_vis / emb_ff blocks
    weights = 2 * (9 * C2 * C * conv_bytes    # Conv_f weight
                   + C2 * 3 * C * 4           # fused attention weight
                   + 4 * C * 4)               # biases / BN vectors
    pad = bb * (H + 2) * WP * C2 * conv_bytes
    return io + weights + pad


def _pick_block_b(B, H, W, conv_bytes, max_bb=8):
    """Largest divisor of B <= max_bb that fits the VMEM budget, keeping >= 2
    grid steps whenever possible so both v7x TensorCores get work."""
    budget = min(_vmem_capacity_bytes() // 2, 32 * 1024 * 1024)
    limit = min(max_bb, max(B // 2, 1))
    for bb in range(limit, 0, -1):
        if B % bb == 0 and _step_vmem_bytes(bb, H, W, conv_bytes) <= budget:
            return bb
    return 1


def fusion_net_forward(ir, vis, emb_ir, emb_vis, params, block_b=None,
                       conv_dtype=jnp.float32):
    """PyTorch-compatible entry point: NCHW inputs, NCHW outputs (eval-mode BN).

    conv_dtype=jnp.bfloat16 halves the VMEM traffic of the Conv_f operand
    stream (f32 accumulation is kept via preferred_element_type); default is
    f32 to preserve the reference tolerance.
    """
    (w_ir, b_ir, w_vis, b_vis, w_embf, b_embf, w_f, b_f,
     bn_gamma, bn_beta, bn_rm, bn_rv) = params

    B, Cc, H, W = ir.shape
    assert Cc == C
    assert (H * W) % 2 == 0, "pair-packed output store requires H*W even"
    conv_bytes = jnp.dtype(conv_dtype).itemsize
    Bb = _pick_block_b(B, H, W, conv_bytes) if block_b is None else block_b
    assert B % Bb == 0
    # TODO(synk): for B < 2 on v7x, split H into a second parallel grid axis so
    # both TensorCores get work even for a single-image batch.

    # NCHW -> NHWC (channels on the lane dim) for the kernel.
    ir_h = jnp.transpose(ir, (0, 2, 3, 1))
    vis_h = jnp.transpose(vis, (0, 2, 3, 1))
    e_ir = emb_ir.reshape(B, 1, C)
    e_vis = emb_vis.reshape(B, 1, C)

    # Fused attention weight (128, 192):
    #   [ blockdiag(w_ir^T, w_vis^T) | centre tap of Conv_embf ].
    # (Conv_embf is 3x3/pad-1 on a 1x1 map, so only its centre tap matters.)
    zeros = jnp.zeros((C, C), jnp.float32)
    w_embf_c = jnp.transpose(w_embf[:, :, 1, 1], (1, 0))              # (128, 64)
    w_att = jnp.concatenate([
        jnp.concatenate([jnp.transpose(w_ir), zeros], axis=0),        # -> ir_att
        jnp.concatenate([zeros, jnp.transpose(w_vis)], axis=0),       # -> vis_att
        w_embf_c,                                                     # -> emb_f
    ], axis=1)                                                        # (128, 192)
    b_att = jnp.concatenate([b_ir, b_vis, b_embf]).reshape(1, 3 * C)

    # Conv_f weights OIHW -> (ky, kx, cin, cout) -> (9*128, 64); row order
    # matches the kernel's tap order t = ky*3 + kx, cin order [SA_ir | SA_vis].
    w_f_mat = jnp.transpose(w_f, (2, 3, 1, 0)).reshape(9 * C2, C).astype(conv_dtype)

    # Eval-mode BN folded; conv bias folded into the shift.
    inv_std = 1.0 / jnp.sqrt(bn_rv + BN_EPS)
    bn_scale = (bn_gamma * inv_std).reshape(1, C)
    bn_shift = (bn_beta + (b_f - bn_rm) * bn_gamma * inv_std).reshape(1, C)

    WP = _padded_width(W)
    cap = _vmem_capacity_bytes()
    need = _step_vmem_bytes(Bb, H, W, conv_bytes)
    vmem_limit = int(min(int(cap * 0.8), max(2 * need + (4 << 20), 32 << 20)))

    img_spec = pl.BlockSpec((Bb, H, W, C), lambda b: (b, 0, 0, 0))
    emb_spec = pl.BlockSpec((Bb, 1, C), lambda b: (b, 0, 0))
    vec_spec = pl.BlockSpec((1, C), lambda b: (0, 0))

    f_pairs, emb_ff = pl.pallas_call(
        fusion_kernel,
        grid=(B // Bb,),
        in_specs=[img_spec, img_spec, emb_spec, emb_spec,
                  pl.BlockSpec((C2, 3 * C), lambda b: (0, 0)),
                  pl.BlockSpec((1, 3 * C), lambda b: (0, 0)),
                  pl.BlockSpec((9 * C2, C), lambda b: (0, 0)),
                  vec_spec, vec_spec],
        out_specs=(pl.BlockSpec((Bb, H * W // 2, 2 * C), lambda b: (b, 0, 0)),
                   pl.BlockSpec((Bb, 1, C), lambda b: (b, 0, 0))),
        out_shape=(jax.ShapeDtypeStruct((B, H * W // 2, 2 * C), jnp.float32),
                   jax.ShapeDtypeStruct((B, 1, C), jnp.float32)),
        scratch_shapes=[pltpu.VMEM((Bb, H + 2, WP, C2), conv_dtype)],
        compiler_params=pltpu.CompilerParams(
            dimension_semantics=("parallel",),
            vmem_limit_bytes=vmem_limit,
        ),
    )(ir_h, vis_h, e_ir, e_vis, w_att, b_att, w_f_mat, bn_scale, bn_shift)

    # Unfold the lane-dense (B, H*W/2, 128) output back to NCHW.
    f_nhwc = f_pairs.reshape(B, H * W, C).reshape(B, H, W, C)
    f = jnp.transpose(f_nhwc, (0, 3, 1, 2))                           # (B, 64, H, W)
    emb_ff_nchw = emb_ff.reshape(B, C, 1, 1)                          # (B, 64, 1, 1)
    return f, emb_ff_nchw


# --------------------------------------------------------------------------
# Pure-JAX reference mirroring the PyTorch forward (eval-mode BN)
# --------------------------------------------------------------------------
def fusion_net_ref(ir, vis, emb_ir, emb_vis, params):
    (w_ir, b_ir, w_vis, b_vis, w_embf, b_embf, w_f, b_f,
     bn_gamma, bn_beta, bn_rm, bn_rv) = params
    B = ir.shape[0]
    e_ir = emb_ir.reshape(B, -1)
    e_vis = emb_vis.reshape(B, -1)
    ir_att = jax.nn.sigmoid(e_ir @ w_ir.T + b_ir)
    vis_att = jax.nn.sigmoid(e_vis @ w_vis.T + b_vis)
    ir1 = ir * ir_att[:, :, None, None]
    vis1 = vis * vis_att[:, :, None, None]

    def conv3x3(x, w, b):
        y = jax.lax.conv_general_dilated(
            x, w, window_strides=(1, 1), padding=((1, 1), (1, 1)),
            dimension_numbers=('NCHW', 'OIHW', 'NCHW'))
        return y + b[None, :, None, None]

    emb_cat = jnp.concatenate([emb_ir, emb_vis], axis=1)
    emb_f = conv3x3(emb_cat, w_embf, b_embf)
    sa_emb = jax.nn.sigmoid(emb_f)
    sa_ir = vis1 * sa_emb + ir1
    sa_vis = vis1 + ir1 * sa_emb
    x = jnp.concatenate([sa_ir, sa_vis], axis=1)
    f = conv3x3(x, w_f, b_f)
    f = ((f - bn_rm[None, :, None, None])
         / jnp.sqrt(bn_rv[None, :, None, None] + BN_EPS)
         * bn_gamma[None, :, None, None] + bn_beta[None, :, None, None])
    f = jnp.where(f > 0, f, NEG_SLOPE * f)
    avg = jnp.mean(f, axis=(2, 3), keepdims=True)
    return f, avg + emb_f


if __name__ == "__main__":
    B, H, W = 4, 16, 16
    key = jax.random.PRNGKey(0)
    ks = jax.random.split(key, 16)

    def init(k, shape, scale=0.1):
        return scale * jax.random.normal(k, shape, dtype=jnp.float32)

    params = (
        init(ks[0], (C, C)),            # fc_ir.weight
        init(ks[1], (C,)),              # fc_ir.bias
        init(ks[2], (C, C)),            # fc_vis.weight
        init(ks[3], (C,)),              # fc_vis.bias
        init(ks[4], (C, 2 * C, 3, 3)),  # Conv_embf weight (OIHW)
        init(ks[5], (C,)),              # Conv_embf bias
        init(ks[6], (C, 2 * C, 3, 3)),  # Conv_f weight (OIHW)
        init(ks[7], (C,)),              # Conv_f bias
        1.0 + 0.1 * jax.random.normal(ks[8], (C,), dtype=jnp.float32),   # BN gamma
        init(ks[9], (C,)),                                               # BN beta
        init(ks[10], (C,)),                                              # BN running_mean
        0.5 + jax.random.uniform(ks[11], (C,), dtype=jnp.float32),       # BN running_var
    )

    ir = init(ks[12], (B, C, H, W), scale=1.0)
    vis = init(ks[13], (B, C, H, W), scale=1.0)
    emb_ir = init(ks[14], (B, C, 1, 1), scale=1.0)
    emb_vis = init(ks[15], (B, C, 1, 1), scale=1.0)

    f, emb_ff = jax.block_until_ready(
        fusion_net_forward(ir, vis, emb_ir, emb_vis, params))

    f_ref, emb_ff_ref = fusion_net_ref(ir, vis, emb_ir, emb_vis, params)
    assert f.shape == (B, C, H, W) and emb_ff.shape == (B, C, 1, 1)
    assert jnp.allclose(f, f_ref, atol=2e-3, rtol=2e-3)
    assert jnp.allclose(emb_ff, emb_ff_ref, atol=2e-3, rtol=2e-3)

    print("KERNEL_OK")
</pallas_src>

<mosaic_0001>
module attributes {stable_mosaic.version = 11 : i64} {
  func.func @fusion_kernel(%arg0: i32, %arg1: memref<2x16x16x64xf32, #tpu.memory_space<vmem>>, %arg2: memref<2x16x16x64xf32, #tpu.memory_space<vmem>>, %arg3: memref<2x1x64xf32, #tpu.memory_space<vmem>>, %arg4: memref<2x1x64xf32, #tpu.memory_space<vmem>>, %arg5: memref<128x192xf32, #tpu.memory_space<vmem>>, %arg6: memref<1x192xf32, #tpu.memory_space<vmem>>, %arg7: memref<1152x64xf32, #tpu.memory_space<vmem>>, %arg8: memref<1x64xf32, #tpu.memory_space<vmem>>, %arg9: memref<1x64xf32, #tpu.memory_space<vmem>>, %arg10: memref<2x128x128xf32, #tpu.memory_space<vmem>>, %arg11: memref<2x1x64xf32, #tpu.memory_space<vmem>>, %arg12: memref<2x18x32x128xf32, #tpu.memory_space<vmem>>) attributes {dimension_semantics = [#tpu.dimension_semantics<parallel>], iteration_bounds = array<i64: 2>, scalar_prefetch = 0 : i64, scratch_operands = 1 : i64, tpu.core_type = #tpu.core_type<tc>, window_params = [{transform_indices = @transform_0, window_bounds = array<i64: 2, 16, 16, 64>}, {transform_indices = @transform_1, window_bounds = array<i64: 2, 16, 16, 64>}, {transform_indices = @transform_2, window_bounds = array<i64: 2, 1, 64>}, {transform_indices = @transform_3, window_bounds = array<i64: 2, 1, 64>}, {pipeline_mode = #tpu.pipeline_mode<synchronous>, transform_indices = @transform_4, window_bounds = array<i64: 128, 192>}, {pipeline_mode = #tpu.pipeline_mode<synchronous>, transform_indices = @transform_5, window_bounds = array<i64: 1, 192>}, {pipeline_mode = #tpu.pipeline_mode<synchronous>, transform_indices = @transform_6, window_bounds = array<i64: 1152, 64>}, {pipeline_mode = #tpu.pipeline_mode<synchronous>, transform_indices = @transform_7, window_bounds = array<i64: 1, 64>}, {pipeline_mode = #tpu.pipeline_mode<synchronous>, transform_indices = @transform_8, window_bounds = array<i64: 1, 64>}, {transform_indices = @transform_9, window_bounds = array<i64: 2, 128, 128>}, {transform_indices = @transform_10, window_bounds = array<i64: 2, 1, 64>}]} {
    %c0 = arith.constant 0 : index
    %c0_0 = arith.constant 0 : index
    %c0_1 = arith.constant 0 : index
    %0 = vector.load %arg3[%c0, %c0_0, %c0_1] : memref<2x1x64xf32, #tpu.memory_space<vmem>>, vector<2x1x64xf32>
    %1 = vector.shape_cast %0 : vector<2x1x64xf32> to vector<2x64xf32>
    %c0_2 = arith.constant 0 : index
    %c0_3 = arith.constant 0 : index
    %c0_4 = arith.constant 0 : index
    %2 = vector.load %arg4[%c0_2, %c0_3, %c0_4] : memref<2x1x64xf32, #tpu.memory_space<vmem>>, vector<2x1x64xf32>
    %3 = vector.shape_cast %2 : vector<2x1x64xf32> to vector<2x64xf32>
    %4 = tpu.concatenate %1, %3 in 1 : vector<2x64xf32>, vector<2x64xf32> -> vector<2x128xf32>
    %c0_5 = arith.constant 0 : index
    %c0_6 = arith.constant 0 : index
    %5 = vector.load %arg5[%c0_5, %c0_6] : memref<128x192xf32, #tpu.memory_space<vmem>>, vector<128x192xf32>
    %cst = arith.constant dense<0.000000e+00> : vector<2x192xf32>
    %6 = tpu.matmul %4, %5, %cst {dimension_numbers = #tpu.dot_dimension_numbers<[1], [0], [0], [1], [0, 0, 1, 1], [], []>} : vector<2x128xf32>, vector<128x192xf32>, vector<2x192xf32> -> vector<2x192xf32>
    %c0_7 = arith.constant 0 : index
    %c0_8 = arith.constant 0 : index
    %7 = vector.load %arg6[%c0_7, %c0_8] : memref<1x192xf32, #tpu.memory_space<vmem>>, vector<1x192xf32>
    %8 = vector.broadcast %7 : vector<1x192xf32> to vector<2x192xf32>
    %9 = arith.addf %6, %8 : vector<2x192xf32>
    %10 = vector.extract_strided_slice %9 {offsets = [0, 0], sizes = [2, 64], strides = [1, 1]} : vector<2x192xf32> to vector<2x64xf32>
    %11 = arith.negf %10 : vector<2x64xf32>
    %12 = math.exp %11 : vector<2x64xf32>
    %cst_9 = arith.constant 1.000000e+00 : f32
    %13 = vector.broadcast %cst_9 : f32 to vector<2x64xf32>
    %14 = arith.addf %13, %12 : vector<2x64xf32>
    %15 = arith.divf %13, %14 : vector<2x64xf32>
    %16 = vector.extract_strided_slice %9 {offsets = [0, 64], sizes = [2, 64], strides = [1, 1]} : vector<2x192xf32> to vector<2x64xf32>
    %17 = arith.negf %16 : vector<2x64xf32>
    %18 = math.exp %17 : vector<2x64xf32>
    %cst_10 = arith.constant 1.000000e+00 : f32
    %19 = vector.broadcast %cst_10 : f32 to vector<2x64xf32>
    %20 = arith.addf %19, %18 : vector<2x64xf32>
    %21 = arith.divf %19, %20 : vector<2x64xf32>
    %22 = vector.extract_strided_slice %9 {offsets = [0, 128], sizes = [2, 64], strides = [1, 1]} : vector<2x192xf32> to vector<2x64xf32>
    %23 = arith.negf %22 : vector<2x64xf32>
    %24 = math.exp %23 : vector<2x64xf32>
    %cst_11 = arith.constant 1.000000e+00 : f32
    %25 = vector.broadcast %cst_11 : f32 to vector<2x64xf32>
    %26 = arith.addf %25, %24 : vector<2x64xf32>
    %27 = arith.divf %25, %26 : vector<2x64xf32>
    %28 = vector.shape_cast %27 : vector<2x64xf32> to vector<2x1x1x64xf32>
    %c0_12 = arith.constant 0 : index
    %c0_13 = arith.constant 0 : index
    %c0_14 = arith.constant 0 : index
    %c0_15 = arith.constant 0 : index
    %29 = vector.load %arg1[%c0_12, %c0_13, %c0_14, %c0_15] : memref<2x16x16x64xf32, #tpu.memory_space<vmem>>, vector<2x16x16x64xf32>
    %30 = vector.shape_cast %15 : vector<2x64xf32> to vector<2x1x1x64xf32>
    %31 = vector.broadcast %30 : vector<2x1x1x64xf32> to vector<2x16x16x64xf32>
    %32 = arith.mulf %29, %31 : vector<2x16x16x64xf32>
    %c0_16 = arith.constant 0 : index
    %c0_17 = arith.constant 0 : index
    %c0_18 = arith.constant 0 : index
    %c0_19 = arith.constant 0 : index
    %33 = vector.load %arg2[%c0_16, %c0_17, %c0_18, %c0_19] : memref<2x16x16x64xf32, #tpu.memory_space<vmem>>, vector<2x16x16x64xf32>
    %34 = vector.shape_cast %21 : vector<2x64xf32> to vector<2x1x1x64xf32>
    %35 = vector.broadcast %34 : vector<2x1x1x64xf32> to vector<2x16x16x64xf32>
    %36 = arith.mulf %33, %35 : vector<2x16x16x64xf32>
    %37 = vector.broadcast %28 : vector<2x1x1x64xf32> to vector<2x16x16x64xf32>
    %38 = arith.mulf %36, %37 : vector<2x16x16x64xf32>
    %39 = arith.addf %38, %32 : vector<2x16x16x64xf32>
    %40 = vector.broadcast %28 : vector<2x1x1x64xf32> to vector<2x16x16x64xf32>
    %41 = arith.mulf %32, %40 : vector<2x16x16x64xf32>
    %42 = arith.addf %36, %41 : vector<2x16x16x64xf32>
    %43 = tpu.concatenate %39, %42 in 3 : vector<2x16x16x64xf32>, vector<2x16x16x64xf32> -> vector<2x16x16x128xf32>
    %cst_20 = arith.constant 0.000000e+00 : f32
    %44 = vector.broadcast %cst_20 : f32 to vector<2x1x32x128xf32>
    %c0_21 = arith.constant 0 : index
    %c0_22 = arith.constant 0 : index
    %c0_23 = arith.constant 0 : index
    %c0_24 = arith.constant 0 : index
    %45 = vector.load %arg12[%c0_21, %c0_22, %c0_23, %c0_24] : memref<2x18x32x128xf32, #tpu.memory_space<vmem>>, vector<2x1x32x128xf32>
    tpu.vector_store %arg12[%c0_21, %c0_22, %c0_23, %c0_24], %44 {strides = array<i32>} : memref<2x18x32x128xf32, #tpu.memory_space<vmem>>, vector<2x1x32x128xf32>,
    %cst_25 = arith.constant 0.000000e+00 : f32
    %46 = vector.broadcast %cst_25 : f32 to vector<2x1x32x128xf32>
    %c0_26 = arith.constant 0 : index
    %c17 = arith.constant 17 : index
    %c0_27 = arith.constant 0 : index
    %c0_28 = arith.constant 0 : index
    %47 = vector.load %arg12[%c0_26, %c17, %c0_27, %c0_28] : memref<2x18x32x128xf32, #tpu.memory_space<vmem>>, vector<2x1x32x128xf32>
    tpu.vector_store %arg12[%c0_26, %c17, %c0_27, %c0_28], %46 {strides = array<i32>} : memref<2x18x32x128xf32, #tpu.memory_space<vmem>>, vector<2x1x32x128xf32>,
    %cst_29 = arith.constant 0.000000e+00 : f32
    %48 = vector.broadcast %cst_29 : f32 to vector<2x16x1x128xf32>
    %c0_30 = arith.constant 0 : index
    %c1 = arith.constant 1 : index
    %c7 = arith.constant 7 : index
    %c0_31 = arith.constant 0 : index
    %49 = vector.load %arg12[%c0_30, %c1, %c7, %c0_31] : memref<2x18x32x128xf32, #tpu.memory_space<vmem>>, vector<2x16x1x128xf32>
    tpu.vector_store %arg12[%c0_30, %c1, %c7, %c0_31], %48 {strides = array<i32>} : memref<2x18x32x128xf32, #tpu.memory_space<vmem>>, vector<2x16x1x128xf32>,
    %cst_32 = arith.constant 0.000000e+00 : f32
    %50 = vector.broadcast %cst_32 : f32 to vector<2x16x1x128xf32>
    %c0_33 = arith.constant 0 : index
    %c1_34 = arith.constant 1 : index
    %c24 = arith.constant 24 : index
    %c0_35 = arith.constant 0 : index
    %51 = vector.load %arg12[%c0_33, %c1_34, %c24, %c0_35] : memref<2x18x32x128xf32, #tpu.memory_space<vmem>>, vector<2x16x1x128xf32>
    tpu.vector_store %arg12[%c0_33, %c1_34, %c24, %c0_35], %50 {strides = array<i32>} : memref<2x18x32x128xf32, #tpu.memory_space<vmem>>, vector<2x16x1x128xf32>,
    %c0_36 = arith.constant 0 : index
    %c1_37 = arith.constant 1 : index
    %c8 = arith.constant 8 : index
    %c0_38 = arith.constant 0 : index
    %52 = vector.load %arg12[%c0_36, %c1_37, %c8, %c0_38] : memref<2x18x32x128xf32, #tpu.memory_space<vmem>>, vector<2x16x16x128xf32>
    tpu.vector_store %arg12[%c0_36, %c1_37, %c8, %c0_38], %43 {strides = array<i32>} : memref<2x18x32x128xf32, #tpu.memory_space<vmem>>, vector<2x16x16x128xf32>,
    %53 = vector.shape_cast %22 : vector<2x64xf32> to vector<2x1x64xf32>
    %c0_39 = arith.constant 0 : index
    %c0_40 = arith.constant 0 : index
    %c0_41 = arith.constant 0 : index
    %54 = vector.load %arg11[%c0_39, %c0_40, %c0_41] : memref<2x1x64xf32, #tpu.memory_space<vmem>>, vector<2x1x64xf32>
    tpu.vector_store %arg11[%c0_39, %c0_40, %c0_41], %53 {strides = array<i32>} : memref<2x1x64xf32, #tpu.memory_space<vmem>>, vector<2x1x64xf32>,
    %c0_42 = arith.constant 0 : index
    %c0_43 = arith.constant 0 : index
    %55 = vector.load %arg8[%c0_42, %c0_43] : memref<1x64xf32, #tpu.memory_space<vmem>>, vector<1x64xf32>
    %c0_44 = arith.constant 0 : index
    %c0_45 = arith.constant 0 : index
    %56 = vector.load %arg9[%c0_44, %c0_45] : memref<1x64xf32, #tpu.memory_space<vmem>>, vector<1x64xf32>
    %c0_i32 = arith.constant 0 : i32
    %c2_i32 = arith.constant 2 : i32
    %57 = arith.addi %c0_i32, %c2_i32 : i32
    %c1_i32 = arith.constant 1 : i32
    scf.for %arg13 = %c0_i32 to %57 step %c1_i32  : i32 {
      %cst_47 = arith.constant 0.000000e+00 : f32
      %58 = vector.broadcast %cst_47 : f32 to vector<256x64xf32>
      %59 = arith.index_cast %arg13 : i32 to index
      %c0_48 = arith.constant 0 : index
      %c7_49 = arith.constant 7 : index
      %c0_50 = arith.constant 0 : index
      %60 = vector.load %arg12[%59, %c0_48, %c7_49, %c0_50] : memref<2x18x32x128xf32, #tpu.memory_space<vmem>>, vector<1x16x16x128xf32>
      %61 = vector.shape_cast %60 : vector<1x16x16x128xf32> to vector<16x16x128xf32>
      %62 = vector.shape_cast %61 : vector<16x16x128xf32> to vector<256x128xf32>
      %c0_51 = arith.constant 0 : index
      %c0_52 = arith.constant 0 : index
      %63 = vector.load %arg7[%c0_51, %c0_52] : memref<1152x64xf32, #tpu.memory_space<vmem>>, vector<128x64xf32>
      %cst_53 = arith.constant dense<0.000000e+00> : vector<256x64xf32>
      %64 = tpu.matmul %62, %63, %cst_53 {dimension_numbers = #tpu.dot_dimension_numbers<[1], [0], [0], [1], [0, 0, 1, 1], [], []>} : vector<256x128xf32>, vector<128x64xf32>, vector<256x64xf32> -> vector<256x64xf32>
      %65 = arith.addf %58, %64 : vector<256x64xf32>
      %66 = arith.index_cast %arg13 : i32 to index
      %c0_54 = arith.constant 0 : index
      %c8_55 = arith.constant 8 : index
      %c0_56 = arith.constant 0 : index
      %67 = vector.load %arg12[%66, %c0_54, %c8_55, %c0_56] : memref<2x18x32x128xf32, #tpu.memory_space<vmem>>, vector<1x16x16x128xf32>
      %68 = vector.shape_cast %67 : vector<1x16x16x128xf32> to vector<16x16x128xf32>
      %69 = vector.shape_cast %68 : vector<16x16x128xf32> to vector<256x128xf32>
      %c128 = arith.constant 128 : index
      %c0_57 = arith.constant 0 : index
      %70 = vector.load %arg7[%c128, %c0_57] : memref<1152x64xf32, #tpu.memory_space<vmem>>, vector<128x64xf32>
      %cst_58 = arith.constant dense<0.000000e+00> : vector<256x64xf32>
      %71 = tpu.matmul %69, %70, %cst_58 {dimension_numbers = #tpu.dot_dimension_numbers<[1], [0], [0], [1], [0, 0, 1, 1], [], []>} : vector<256x128xf32>, vector<128x64xf32>, vector<256x64xf32> -> vector<256x64xf32>
      %72 = arith.addf %65, %71 : vector<256x64xf32>
      %73 = arith.index_cast %arg13 : i32 to index
      %c0_59 = arith.constant 0 : index
      %c9 = arith.constant 9 : index
      %c0_60 = arith.constant 0 : index
      %74 = vector.load %arg12[%73, %c0_59, %c9, %c0_60] : memref<2x18x32x128xf32, #tpu.memory_space<vmem>>, vector<1x16x16x128xf32>
      %75 = vector.shape_cast %74 : vector<1x16x16x128xf32> to vector<16x16x128xf32>
      %76 = vector.shape_cast %75 : vector<16x16x128xf32> to vector<256x128xf32>
      %c256 = arith.constant 256 : index
      %c0_61 = arith.constant 0 : index
      %77 = vector.load %arg7[%c256, %c0_61] : memref<1152x64xf32, #tpu.memory_space<vmem>>, vector<128x64xf32>
      %cst_62 = arith.constant dense<0.000000e+00> : vector<256x64xf32>
      %78 = tpu.matmul %76, %77, %cst_62 {dimension_numbers = #tpu.dot_dimension_numbers<[1], [0], [0], [1], [0, 0, 1, 1], [], []>} : vector<256x128xf32>, vector<128x64xf32>, vector<256x64xf32> -> vector<256x64xf32>
      %79 = arith.addf %72, %78 : vector<256x64xf32>
      %80 = arith.index_cast %arg13 : i32 to index
      %c1_63 = arith.constant 1 : index
      %c7_64 = arith.constant 7 : index
      %c0_65 = arith.constant 0 : index
      %81 = vector.load %arg12[%80, %c1_63, %c7_64, %c0_65] : memref<2x18x32x128xf32, #tpu.memory_space<vmem>>, vector<1x16x16x128xf32>
      %82 = vector.shape_cast %81 : vector<1x16x16x128xf32> to vector<16x16x128xf32>
      %83 = vector.shape_cast %82 : vector<16x16x128xf32> to vector<256x128xf32>
      %c384 = arith.constant 384 : index
      %c0_66 = arith.constant 0 : index
      %84 = vector.load %arg7[%c384, %c0_66] : memref<1152x64xf32, #tpu.memory_space<vmem>>, vector<128x64xf32>
      %cst_67 = arith.constant dense<0.000000e+00> : vector<256x64xf32>
      %85 = tpu.matmul %83, %84, %cst_67 {dimension_numbers = #tpu.dot_dimension_numbers<[1], [0], [0], [1], [0, 0, 1, 1], [], []>} : vector<256x128xf32>, vector<128x64xf32>, vector<256x64xf32> -> vector<256x64xf32>
      %86 = arith.addf %79, %85 : vector<256x64xf32>
      %87 = arith.index_cast %arg13 : i32 to index
      %c1_68 = arith.constant 1 : index
      %c8_69 = arith.constant 8 : index
      %c0_70 = arith.constant 0 : index
      %88 = vector.load %arg12[%87, %c1_68, %c8_69, %c0_70] : memref<2x18x32x128xf32, #tpu.memory_space<vmem>>, vector<1x16x16x128xf32>
      %89 = vector.shape_cast %88 : vector<1x16x16x128xf32> to vector<16x16x128xf32>
      %90 = vector.shape_cast %89 : vector<16x16x128xf32> to vector<256x128xf32>
      %c512 = arith.constant 512 : index
      %c0_71 = arith.constant 0 : index
      %91 = vector.load %arg7[%c512, %c0_71] : memref<1152x64xf32, #tpu.memory_space<vmem>>, vector<128x64xf32>
      %cst_72 = arith.constant dense<0.000000e+00> : vector<256x64xf32>
      %92 = tpu.matmul %90, %91, %cst_72 {dimension_numbers = #tpu.dot_dimension_numbers<[1], [0], [0], [1], [0, 0, 1, 1], [], []>} : vector<256x128xf32>, vector<128x64xf32>, vector<256x64xf32> -> vector<256x64xf32>
      %93 = arith.addf %86, %92 : vector<256x64xf32>
      %94 = arith.index_cast %arg13 : i32 to index
      %c1_73 = arith.constant 1 : index
      %c9_74 = arith.constant 9 : index
      %c0_75 = arith.constant 0 : index
      %95 = vector.load %arg12[%94, %c1_73, %c9_74, %c0_75] : memref<2x18x32x128xf32, #tpu.memory_space<vmem>>, vector<1x16x16x128xf32>
      %96 = vector.shape_cast %95 : vector<1x16x16x128xf32> to vector<16x16x128xf32>
      %97 = vector.shape_cast %96 : vector<16x16x128xf32> to vector<256x128xf32>
      %c640 = arith.constant 640 : index
      %c0_76 = arith.constant 0 : index
      %98 = vector.load %arg7[%c640, %c0_76] : memref<1152x64xf32, #tpu.memory_space<vmem>>, vector<128x64xf32>
      %cst_77 = arith.constant dense<0.000000e+00> : vector<256x64xf32>
      %99 = tpu.matmul %97, %98, %cst_77 {dimension_numbers = #tpu.dot_dimension_numbers<[1], [0], [0], [1], [0, 0, 1, 1], [], []>} : vector<256x128xf32>, vector<128x64xf32>, vector<256x64xf32> -> vector<256x64xf32>
      %100 = arith.addf %93, %99 : vector<256x64xf32>
      %101 = arith.index_cast %arg13 : i32 to index
      %c2 = arith.constant 2 : index
      %c7_78 = arith.constant 7 : index
      %c0_79 = arith.constant 0 : index
      %102 = vector.load %arg12[%101, %c2, %c7_78, %c0_79] : memref<2x18x32x128xf32, #tpu.memory_space<vmem>>, vector<1x16x16x128xf32>
      %103 = vector.shape_cast %102 : vector<1x16x16x128xf32> to vector<16x16x128xf32>
      %104 = vector.shape_cast %103 : vector<16x16x128xf32> to vector<256x128xf32>
      %c768 = arith.constant 768 : index
      %c0_80 = arith.constant 0 : index
      %105 = vector.load %arg7[%c768, %c0_80] : memref<1152x64xf32, #tpu.memory_space<vmem>>, vector<128x64xf32>
      %cst_81 = arith.constant dense<0.000000e+00> : vector<256x64xf32>
      %106 = tpu.matmul %104, %105, %cst_81 {dimension_numbers = #tpu.dot_dimension_numbers<[1], [0], [0], [1], [0, 0, 1, 1], [], []>} : vector<256x128xf32>, vector<128x64xf32>, vector<256x64xf32> -> vector<256x64xf32>
      %107 = arith.addf %100, %106 : vector<256x64xf32>
      %108 = arith.index_cast %arg13 : i32 to index
      %c2_82 = arith.constant 2 : index
      %c8_83 = arith.constant 8 : index
      %c0_84 = arith.constant 0 : index
      %109 = vector.load %arg12[%108, %c2_82, %c8_83, %c0_84] : memref<2x18x32x128xf32, #tpu.memory_space<vmem>>, vector<1x16x16x128xf32>
      %110 = vector.shape_cast %109 : vector<1x16x16x128xf32> to vector<16x16x128xf32>
      %111 = vector.shape_cast %110 : vector<16x16x128xf32> to vector<256x128xf32>
      %c896 = arith.constant 896 : index
      %c0_85 = arith.constant 0 : index
      %112 = vector.load %arg7[%c896, %c0_85] : memref<1152x64xf32, #tpu.memory_space<vmem>>, vector<128x64xf32>
      %cst_86 = arith.constant dense<0.000000e+00> : vector<256x64xf32>
      %113 = tpu.matmul %111, %112, %cst_86 {dimension_numbers = #tpu.dot_dimension_numbers<[1], [0], [0], [1], [0, 0, 1, 1], [], []>} : vector<256x128xf32>, vector<128x64xf32>, vector<256x64xf32> -> vector<256x64xf32>
      %114 = arith.addf %107, %113 : vector<256x64xf32>
      %115 = arith.index_cast %arg13 : i32 to index
      %c2_87 = arith.constant 2 : index
      %c9_88 = arith.constant 9 : index
      %c0_89 = arith.constant 0 : index
      %116 = vector.load %arg12[%115, %c2_87, %c9_88, %c0_89] : memref<2x18x32x128xf32, #tpu.memory_space<vmem>>, vector<1x16x16x128xf32>
      %117 = vector.shape_cast %116 : vector<1x16x16x128xf32> to vector<16x16x128xf32>
      %118 = vector.shape_cast %117 : vector<16x16x128xf32> to vector<256x128xf32>
      %c1024 = arith.constant 1024 : index
      %c0_90 = arith.constant 0 : index
      %119 = vector.load %arg7[%c1024, %c0_90] : memref<1152x64xf32, #tpu.memory_space<vmem>>, vector<128x64xf32>
      %cst_91 = arith.constant dense<0.000000e+00> : vector<256x64xf32>
      %120 = tpu.matmul %118, %119, %cst_91 {dimension_numbers = #tpu.dot_dimension_numbers<[1], [0], [0], [1], [0, 0, 1, 1], [], []>} : vector<256x128xf32>, vector<128x64xf32>, vector<256x64xf32> -> vector<256x64xf32>
      %121 = arith.addf %114, %120 : vector<256x64xf32>
      %122 = vector.broadcast %55 : vector<1x64xf32> to vector<256x64xf32>
      %123 = arith.mulf %121, %122 : vector<256x64xf32>
      %124 = vector.broadcast %56 : vector<1x64xf32> to vector<256x64xf32>
      %125 = arith.addf %123, %124 : vector<256x64xf32>
      %cst_92 = arith.constant 0.000000e+00 : f32
      %126 = vector.broadcast %cst_92 : f32 to vector<256x64xf32>
      %127 = arith.cmpf ogt, %125, %126 : vector<256x64xf32>
      %cst_93 = arith.constant 0.00999999977 : f32
      %128 = vector.broadcast %cst_93 : f32 to vector<256x64xf32>
      %129 = arith.mulf %128, %125 : vector<256x64xf32>
      %130 = arith.select %127, %125, %129 : vector<256x64xi1>, vector<256x64xf32>
      %131 = vector.shape_cast %130 : vector<256x64xf32> to vector<128x2x64xf32>
      %132 = vector.extract_strided_slice %131 {offsets = [0, 0, 0], sizes = [128, 1, 64], strides = [1, 1, 1]} : vector<128x2x64xf32> to vector<128x1x64xf32>
      %133 = vector.shape_cast %132 : vector<128x1x64xf32> to vector<128x64xf32>
      %134 = vector.extract_strided_slice %131 {offsets = [0, 1, 0], sizes = [128, 1, 64], strides = [1, 1, 1]} : vector<128x2x64xf32> to vector<128x1x64xf32>
      %135 = vector.shape_cast %134 : vector<128x1x64xf32> to vector<128x64xf32>
      %136 = tpu.concatenate %133, %135 in 1 : vector<128x64xf32>, vector<128x64xf32> -> vector<128x128xf32>
      %137 = arith.index_cast %arg13 : i32 to index
      %c0_94 = arith.constant 0 : index
      %c0_95 = arith.constant 0 : index
      %138 = vector.load %arg10[%137, %c0_94, %c0_95] : memref<2x128x128xf32, #tpu.memory_space<vmem>>, vector<1x128x128xf32>
      %139 = vector.shape_cast %138 : vector<1x128x128xf32> to vector<128x128xf32>
      %140 = vector.shape_cast %136 : vector<128x128xf32> to vector<1x128x128xf32>
      tpu.vector_store %arg10[%137, %c0_94, %c0_95], %140 {strides = array<i32>} : memref<2x128x128xf32, #tpu.memory_space<vmem>>, vector<1x128x128xf32>,
      %141 = arith.index_cast %arg13 : i32 to index
      %c0_96 = arith.constant 0 : index
      %c0_97 = arith.constant 0 : index
      %142 = vector.load %arg11[%141, %c0_96, %c0_97] : memref<2x1x64xf32, #tpu.memory_space<vmem>>, vector<1x1x64xf32>
      %143 = vector.shape_cast %142 : vector<1x1x64xf32> to vector<1x64xf32>
      %cst_98 = arith.constant dense<0.000000e+00> : vector<64xf32>
      %144 = vector.multi_reduction <add>, %130, %cst_98 [0] : vector<256x64xf32> to vector<64xf32>
      %145 = vector.shape_cast %144 : vector<64xf32> to vector<1x64xf32>
      %cst_99 = arith.constant 3.906250e-03 : f32
      %146 = vector.broadcast %cst_99 : f32 to vector<1x64xf32>
      %147 = arith.mulf %145, %146 : vector<1x64xf32>
      %148 = arith.addf %143, %147 : vector<1x64xf32>
      %149 = arith.index_cast %arg13 : i32 to index
      %c0_100 = arith.constant 0 : index
      %c0_101 = arith.constant 0 : index
      %150 = vector.load %arg11[%149, %c0_100, %c0_101] : memref<2x1x64xf32, #tpu.memory_space<vmem>>, vector<1x1x64xf32>
      %151 = vector.shape_cast %150 : vector<1x1x64xf32> to vector<1x64xf32>
      %152 = vector.shape_cast %148 : vector<1x64xf32> to vector<1x1x64xf32>
      tpu.vector_store %arg11[%149, %c0_100, %c0_101], %152 {strides = array<i32>} : memref<2x1x64xf32, #tpu.memory_space<vmem>>, vector<1x1x64xf32>,
    }
    %c2_i32_46 = arith.constant 2 : i32
    return
  }
  func.func @transform_0(%arg0: i32) -> (i32, i32, i32, i32) {
    %c0_i32 = arith.constant 0 : i32
    %c0_i32_0 = arith.constant 0 : i32
    %c0_i32_1 = arith.constant 0 : i32
    %c0_i32_2 = arith.constant 0 : i32
    return %arg0, %c0_i32, %c0_i32_0, %c0_i32_1 : i32, i32, i32, i32
  }
  func.func @transform_1(%arg0: i32) -> (i32, i32, i32, i32) {
    %c0_i32 = arith.constant 0 : i32
    %c0_i32_0 = arith.constant 0 : i32
    %c0_i32_1 = arith.constant 0 : i32
    %c0_i32_2 = arith.constant 0 : i32
    return %arg0, %c0_i32, %c0_i32_0, %c0_i32_1 : i32, i32, i32, i32
  }
  func.func @transform_2(%arg0: i32) -> (i32, i32, i32) {
    %c0_i32 = arith.constant 0 : i32
    %c0_i32_0 = arith.constant 0 : i32
    %c0_i32_1 = arith.constant 0 : i32
    return %arg0, %c0_i32, %c0_i32_0 : i32, i32, i32
  }
  func.func @transform_3(%arg0: i32) -> (i32, i32, i32) {
    %c0_i32 = arith.constant 0 : i32
    %c0_i32_0 = arith.constant 0 : i32
    %c0_i32_1 = arith.constant 0 : i32
    return %arg0, %c0_i32, %c0_i32_0 : i32, i32, i32
  }
  func.func @transform_4(%arg0: i32) -> (i32, i32) {
    %c0_i32 = arith.constant 0 : i32
    %c0_i32_0 = arith.constant 0 : i32
    %c0_i32_1 = arith.constant 0 : i32
    return %c0_i32, %c0_i32_0 : i32, i32
  }
  func.func @transform_5(%arg0: i32) -> (i32, i32) {
    %c0_i32 = arith.constant 0 : i32
    %c0_i32_0 = arith.constant 0 : i32
    %c0_i32_1 = arith.constant 0 : i32
    return %c0_i32, %c0_i32_0 : i32, i32
  }
  func.func @transform_6(%arg0: i32) -> (i32, i32) {
    %c0_i32 = arith.constant 0 : i32
    %c0_i32_0 = arith.constant 0 : i32
    %c0_i32_1 = arith.constant 0 : i32
    return %c0_i32, %c0_i32_0 : i32, i32
  }
  func.func @transform_7(%arg0: i32) -> (i32, i32) {
    %c0_i32 = arith.constant 0 : i32
    %c0_i32_0 = arith.constant 0 : i32
    %c0_i32_1 = arith.constant 0 : i32
    return %c0_i32, %c0_i32_0 : i32, i32
  }
  func.func @transform_8(%arg0: i32) -> (i32, i32) {
    %c0_i32 = arith.constant 0 : i32
    %c0_i32_0 = arith.constant 0 : i32
    %c0_i32_1 = arith.constant 0 : i32
    return %c0_i32, %c0_i32_0 : i32, i32
  }
  func.func @transform_9(%arg0: i32) -> (i32, i32, i32) {
    %c0_i32 = arith.constant 0 : i32
    %c0_i32_0 = arith.constant 0 : i32
    %c0_i32_1 = arith.constant 0 : i32
    return %arg0, %c0_i32, %c0_i32_0 : i32, i32, i32
  }
  func.func @transform_10(%arg0: i32) -> (i32, i32, i32) {
    %c0_i32 = arith.constant 0 : i32
    %c0_i32_0 = arith.constant 0 : i32
    %c0_i32_1 = arith.constant 0 : i32
    return %arg0, %c0_i32, %c0_i32_0 : i32, i32, i32
  }
}

</mosaic_0001>

<bundles_post_ra>
// kernel: tpu_custom_call.1
= control target key start
LH: loop header
LB: loop body
LE: loop exit
PB: predicated region body
PF: predicated region fallthrough
CT: control target
= control target key end

     0   :  { %s13348_s0 = inlined_call_operand.vmem [shape: f32[4,16,16,64], index: 0, kind: input, shape index: {}]   ;;  %s13349_s1 = inlined_call_operand.vmem [shape: f32[4,16,16,64], index: 1, kind: input, shape index: {}]   ;;  %s13350_s2 = inlined_call_operand.vmem [shape: f32[4,1,64], index: 2, kind: input, shape index: {}]   ;;  %s13351_s3 = inlined_call_operand.vmem [shape: f32[4,1,64], index: 3, kind: input, shape index: {}]   ;;  %s13352_s4 = inlined_call_operand.vmem [shape: f32[128,192], index: 4, kind: input, shape index: {}]   ;;  %s13353_s5 = inlined_call_operand.vmem [shape: f32[1,192], index: 5, kind: input, shape index: {}]   ;;  %s13354_s6 = inlined_call_operand.vmem [shape: f32[1152,64], index: 6, kind: input, shape index: {}]   ;;  %s13355_s7 = inlined_call_operand.vmem [shape: f32[1,64], index: 7, kind: input, shape index: {}]   ;;  %s13356_s8 = inlined_call_operand.vmem [shape: f32[1,64], index: 8, kind: input, shape index: {}]   ;;  %s13357_s9 = inlined_call_operand.hbm [shape: f32[4,128,128], index: 9, kind: output, shape index: {0}]   ;;  %s13358_s10 = inlined_call_operand.hbm [shape: f32[4,1,64], index: 10, kind: output, shape index: {1}]  }
   0x1   :  { %13579 = sst [smem:[#allocation180_spill]] %s13348_s0 }
   0x2   :  { %13580 = sst [smem:[#allocation181_spill]] %s13349_s1 }
   0x3   :  { %13581 = sst [smem:[#allocation182_spill]] %s13350_s2 }
   0x4   :  { %13582 = sst [smem:[#allocation183_spill]] %s13351_s3 }
   0x5   :  { %16 = vsyncpa [#allocation4], 0 }
   0x6   :  { %18 = vsyncpa [#allocation4 + $0x1], 0 }
   0x7   :  { %19 = vsyncpa [#allocation6], 0 }
   0x8   :  { %21 = vsyncpa [#allocation6 + $0x1], 0  ;;  %s8942_s13 = smov 0   ;;  %s8944_s14 = smov 0  }
   0x9   :  { %s8946_s15 = smov 0   ;;  %s8948_s16 = smov 0  }
   0xa LB: > { %s8963_s17 = sadd.s32 4294967295, %s8870_s16   ;;  %s6734_s18 = sadd.s32 4294967294, %s8870_s16   ;;  %s8870_s16 = sphi %s8948_s16, %s14142_s16   ;;  %s8866_s15 = sphi %s8946_s15, %s14141_s15   ;;  %s8862_s14 = sphi %s8944_s14, %s14140_s14   ;;  %s8858_s13 = sphi %s8942_s13, %s14139_s13  }
   0xb   : > { %s8967_s19 = sadd.s32 1, %s8870_s16   ;;  %s243_s20 = sadd.s32 1, %s8866_s15 }
   0xc   : > { %s240_s21 = ssub.s32 %s8870_s16, %s8967_s19  ;;  %p253_p0 = scmp.ne.s32.totalorder %s8866_s15, %s8862_s14 }
   0xd   : > { %p241_p1 = scmp.eq.s32.totalorder %s240_s21, 0  ;;  %p254_p2 = scmp.eq.s32.totalorder %s8963_s17, 1 }
   0xe   : > { %p259_p3 = scmp.ne.s32.totalorder %s8862_s14, %s8858_s13  ;;  %p260_p4 = scmp.eq.s32.totalorder %s6734_s18, 1 }
   0xf   : > { %s8978_s22 = scalar_select %p241_p1, %s8866_s15, %s243_s20  }
  0x10   : > { %p8980_p5 = por %p254_p2, %p253_p0  ;;  %p8984_p6 = por %p260_p4, %p259_p3 }
  0x11   : > { %p6737_p7 = scmp.ge.s32.totalorder %s8870_s16, 1  ;;  %p355_p8 = scmp.lt.s32.totalorder %s8870_s16, 3 }
  0x13   : > { %p356_p9 = pnand %p6737_p7, %p355_p8 }
  0x15   : > { %359 = sbr.rel (%p356_p9) target bundleno = 1583 (0x62f), region = 56 }
  0x1c   : > { %s6740_s25 = sshll.u32 %s8963_s17, 1  ;;  %v449_v0 = vlaneseq  ;;  %v8994_v1 = vld [vmem:[%s13352_s4 + $0x8] sm:$0xff]  ;;  %v8999_v2 = vld [vmem:[%s13352_s4 + $0x18] sm:$0xff]  ;;  %v8876_v3 = vmov 1966171168   ;;  %v9014_v6 = vld [vmem:[%s13352_s4] sm:$0xff] }
  0x1d   : > { %p9003_p10 = scmp.lt.s32.totalorder %s6740_s25, 3  ;;  %v9007_v4 = vunpack.c.l.s4 %v8876_v3  ;;  %v8111_v5 = vpack.c.bf16 %v8999_v2, %v8994_v1  ;;  %v9019_v7 = vld [vmem:[%s13352_s4 + $0x10] sm:$0xff]  ;;  %v9024_v8 = vld [vmem:[%s13352_s4 + $0x28] sm:$0xff]  ;;  %v9033_v11 = vld [vmem:[%s13352_s4 + $0x38] sm:$0xff]  ;;  %v8877_v14 = vmov 0.0   ;;  %s13587_s3 = sld [smem:[#allocation183_spill]] }
  0x1e   : > { %v9026_v9 = vshrl.u32 %v449_v0, 7  ;;  %v8113_v10 = vpack.c.bf16 %v9019_v7, %v9014_v6  ;;  %v9038_v12 = vld [vmem:[%s13352_s4 + $0x20] sm:$0xff]  ;;  %v9043_v13 = vld [vmem:[%s13352_s4 + $0x30] sm:$0xff]  ;;  %591 = vmatprep.mubr.f32.mxu0 %v8877_v14  ;;  %1514 = vst [vmem:[#allocation2] sm:$0xff] %v8877_v14  ;;  %1515 = vst [vmem:[#allocation2 + $0x8] sm:$0xff] %v8877_v14  ;;  %v8115_v16 = vpack.c.bf16 %v9033_v11, %v9024_v8  ;;  %s13359_s27 = smov 64  }
  0x1f   : > { %1516 = vst [vmem:[#allocation2 + $0x10] sm:$0xff] %v8877_v14  ;;  %1517 = vst [vmem:[#allocation2 + $0x18] sm:$0xff] %v8877_v14  ;;  %s14144_s25 = smov (!%p9003_p10, %s6740_s25), 3  ;;  %v448_v15 = vunpack.c.0.s8 %v9007_v4  ;;  %8112 = vmatprep.subr.bf16.mxu0 %v8111_v5  ;;  %v492_v17 = vld [vmem:[%s13352_s4 + $0x48] sm:$0xff]  ;;  %v494_v18 = vld [vmem:[%s13352_s4 + $0x58] sm:$0xff]  ;;  %v8117_v19 = vpack.c.bf16 %v9043_v13, %v9038_v12  ;;  %s13588_s2 = sld [smem:[#allocation182_spill]] }
  0x20   : > { %13586 = vst [vmem:[#allocation9_spill] sm:$0xff] %v9026_v9  ;;  %1518 = vst [vmem:[#allocation2 + $0x240] sm:$0xff] %v8877_v14  ;;  %8114 = vmatpush1.bf16.msra.mxu0 %v8113_v10  ;;  %v8119_v21 = vpack.c.bf16 %v494_v18, %v492_v17  ;;  %v491_v22 = vld [vmem:[%s13352_s4 + $0x40] sm:$0xff]  ;;  %v493_v23 = vld [vmem:[%s13352_s4 + $0x50] sm:$0xff]  ;;  %vm481_vm0 = vcmask 523264   ;;  %s9233_s28 = sand.u32 1, %s8862_s14  }
  0x21   : > { %1519 = vst [vmem:[#allocation2 + $0x248] sm:$0xff] %v8877_v14  ;;  %1520 = vst [vmem:[#allocation2 + $0x250] sm:$0xff] %v8877_v14  ;;  %v9154_v20 = vsub.s32 %v448_v15, %v9026_v9  ;;  %8116 = vmatprep.subr.bf16.mxu0 %v8115_v16  ;;  %v496_v24 = vld [vmem:[%s13352_s4 + $0x68] sm:$0xff]  ;;  %v498_v27 = vld [vmem:[%s13352_s4 + $0x78] sm:$0xff]  ;;  %v8121_v29 = vpack.c.bf16 %v493_v23, %v491_v22  ;;  %s6738_s11 = sshll.u32 %s9233_s28, 8  ;;  %v9237_v3 = vsub.s32 0, %v9026_v9 }
  0x22   : > { %1521 = vst [vmem:[#allocation2 + $0x258] sm:$0xff] %v8877_v14  ;;  %1523 = vst [vmem:[#allocation2 + $0x220] sm:$0xff] %v8877_v14  ;;  %v8123_v31 = vpack.c.bf16 %v498_v27, %v496_v24  ;;  %v495_v32 = vld [vmem:[%s13352_s4 + $0x60] sm:$0xff]  ;;  %v497_v33 = vld [vmem:[%s13352_s4 + $0x70] sm:$0xff]  ;;  %v9243_v5 = vsub.s32 1, %v9026_v9  ;;  %vm1685_vm1 = vcmask 516096  }
  0x23   : > { %1524 = vst [vmem:[#allocation2 + $0x228] sm:$0xff] %v8877_v14  ;;  %1525 = vst [vmem:[#allocation2 + $0x230] sm:$0xff] %v8877_v14  ;;  %s435_s29 = scalar_lea.vmem %s13587_s3, %s14144_s25  ;;  %v500_v34 = vld [vmem:[%s13352_s4 + $0x88] sm:$0xff]  ;;  %v502_v35 = vld [vmem:[%s13352_s4 + $0x98] sm:$0xff]  ;;  %v8125_v37 = vpack.c.bf16 %v497_v33, %v495_v32  ;;  %s13591_s0 = sld [smem:[#allocation180_spill]] }
  0x24   : > { %1526 = vst [vmem:[#allocation2 + $0x238] sm:$0xff] %v8877_v14  ;;  %1527 = vst [vmem:[#allocation2 + $0x460] sm:$0xff] %v8877_v14  ;;  %v441_v25 = vld [vmem:[%s435_s29] sm:$0x1]  ;;  %v442_v26 = vld [vmem:[%s435_s29 + $0x1] sm:$0x1]  ;;  %8118 = vmatpush1.bf16.msra.mxu0 %v8117_v19  ;;  %v8127_v38 = vpack.c.bf16 %v502_v35, %v500_v34 }
  0x25   : > { %1528 = vst [vmem:[#allocation2 + $0x468] sm:$0xff] %v8877_v14  ;;  %1529 = vst [vmem:[#allocation2 + $0x470] sm:$0xff] %v8877_v14  ;;  %v463_v28 = vcombine.low %v441_v25, %v442_v26  ;;  %8120 = vmatprep.subr.bf16.mxu0 %v8119_v21  ;;  %v499_v39 = vld [vmem:[%s13352_s4 + $0x80] sm:$0xff]  ;;  %v501_v40 = vld [vmem:[%s13352_s4 + $0x90] sm:$0xff]  ;;  %s430_s30 = scalar_lea.vmem %s13588_s2, %s14144_s25  ;;  %s6739_s29 = sshll.u32 %s9233_s28, 1 }
  0x26   : > { %1530 = vst [vmem:[#allocation2 + $0x478] sm:$0xff] %v8877_v14  ;;  %1532 = vst [vmem:[#allocation2 + $0x27] sm:$0x1] %v8877_v14  ;;  %v504_v41 = vld [vmem:[%s13352_s4 + $0xa8] sm:$0xff]  ;;  %v506_v42 = vld [vmem:[%s13352_s4 + $0xb8] sm:$0xff]  ;;  %v8129_v43 = vpack.c.bf16 %v501_v40, %v499_v39  ;;  %s9254_s20 = scalar_lea.vmem [#allocation5], %s6739_s29 }
  0x27   : > { %1533 = vst [vmem:[#allocation2 + $0x47] sm:$0x1] %v8877_v14  ;;  %1534 = vst [vmem:[#allocation2 + $0x67] sm:$0x1] %v8877_v14  ;;  %v470_v30 = vrot.slane %v463_v28, %v9154_v20  ;;  %v8131_v44 = vpack.c.bf16 %v506_v42, %v504_v41  ;;  %v503_v45 = vld [vmem:[%s13352_s4 + $0xa0] sm:$0xff]  ;;  %v505_v46 = vld [vmem:[%s13352_s4 + $0xb0] sm:$0xff] }
  0x28   : > { %1535 = vst [vmem:[#allocation2 + $0x87] sm:$0x1] %v8877_v14  ;;  %1536 = vst [vmem:[#allocation2 + $0xa7] sm:$0x1] %v8877_v14  ;;  %8122 = vmatpush1.bf16.msra.mxu0 %v8121_v29  ;;  %v508_v47 = vld [vmem:[%s13352_s4 + $0xc8] sm:$0xff]  ;;  %v510_v48 = vld [vmem:[%s13352_s4 + $0xd8] sm:$0xff]  ;;  %v8133_v49 = vpack.c.bf16 %v505_v46, %v503_v45 }
  0x29   : > { %1537 = vst [vmem:[#allocation2 + $0xc7] sm:$0x1] %v8877_v14  ;;  %1538 = vst [vmem:[#allocation2 + $0xe7] sm:$0x1] %v8877_v14  ;;  %v477_v36 = vrot.slane %v470_v30, %v9154_v20  ;;  %8124 = vmatprep.subr.bf16.mxu0 %v8123_v31  ;;  %v8135_v50 = vpack.c.bf16 %v510_v48, %v508_v47  ;;  %v507_v51 = vld [vmem:[%s13352_s4 + $0xc0] sm:$0xff]  ;;  %v509_v52 = vld [vmem:[%s13352_s4 + $0xd0] sm:$0xff] }
  0x2a   : > { %1539 = vst [vmem:[#allocation2 + $0x107] sm:$0x1] %v8877_v14  ;;  %1540 = vst [vmem:[#allocation2 + $0x127] sm:$0x1] %v8877_v14  ;;  %v512_v53 = vld [vmem:[%s13352_s4 + $0xe8] sm:$0xff]  ;;  %v514_v54 = vld [vmem:[%s13352_s4 + $0xf8] sm:$0xff]  ;;  %v8137_v55 = vpack.c.bf16 %v509_v52, %v507_v51 }
  0x2b   : > { %1541 = vst [vmem:[#allocation2 + $0x147] sm:$0x1] %v8877_v14  ;;  %1542 = vst [vmem:[#allocation2 + $0x167] sm:$0x1] %v8877_v14  ;;  %478 = vrot.lane.b32.xlu0 %v477_v36, %s13359_s27  ;;  %v8139_v56 = vpack.c.bf16 %v514_v54, %v512_v53  ;;  %v511_v57 = vld [vmem:[%s13352_s4 + $0xe0] sm:$0xff]  ;;  %v513_v58 = vld [vmem:[%s13352_s4 + $0xf0] sm:$0xff] }
  0x2c   : > { %1543 = vst [vmem:[#allocation2 + $0x187] sm:$0x1] %v8877_v14  ;;  %1544 = vst [vmem:[#allocation2 + $0x1a7] sm:$0x1] %v8877_v14  ;;  %8126 = vmatpush1.bf16.msra.mxu0 %v8125_v37  ;;  %v8141_v59 = vpack.c.bf16 %v513_v58, %v511_v57  ;;  %v439_v60 = vld [vmem:[%s430_s30] sm:$0x1] }
  0x2d   : > { %1545 = vst [vmem:[#allocation2 + $0x1c7] sm:$0x1] %v8877_v14  ;;  %1546 = vst [vmem:[#allocation2 + $0x1e7] sm:$0x1] %v8877_v14  ;;  %8128 = vmatprep.subr.bf16.mxu0 %v8127_v38  ;;  %v440_v61 = vld [vmem:[%s430_s30 + $0x1] sm:$0x1] }
  0x2e   : > { %1547 = vst [vmem:[#allocation2 + $0x207] sm:$0x1] %v8877_v14  ;;  %1548 = vst [vmem:[#allocation2 + $0x267] sm:$0x1] %v8877_v14  ;;  %v445_v62 = vcombine.low %v439_v60, %v440_v61  ;;  %v515_v4 = vld [vmem:[%s13353_s5] sm:$0x3] }
  0x2f   : > { %1549 = vst [vmem:[#allocation2 + $0x287] sm:$0x1] %v8877_v14  ;;  %1550 = vst [vmem:[#allocation2 + $0x2a7] sm:$0x1] %v8877_v14  ;;  %v520_v6 = vrot.slane %v515_v4, %v9237_v3  ;;  %v524_v7 = vrot.slane %v515_v4, %v9243_v5  ;;  %s6954_s27 = sshll.u32 %s14144_s25, 8  ;;  %s13592_s12 = smov 64  }
  0x30   : > { %1551 = vst [vmem:[#allocation2 + $0x2c7] sm:$0x1] %v8877_v14  ;;  %1552 = vst [vmem:[#allocation2 + $0x2e7] sm:$0x1] %v8877_v14  ;;  %8130 = vmatpush1.bf16.msra.mxu0 %v8129_v43  ;;  %v452_v63 = vrot.slane %v445_v62, %v9154_v20  ;;  %s9266_s30 = scalar_lea.vmem %s13591_s0, %s6954_s27  ;;  %s13654_s1 = sld [smem:[#allocation181_spill]] }
  0x31   : > { %1553 = vst [vmem:[#allocation2 + $0x307] sm:$0x1] %v8877_v14  ;;  %1554 = vst [vmem:[#allocation2 + $0x327] sm:$0x1] %v8877_v14  ;;  %8132 = vmatprep.subr.bf16.mxu0 %v8131_v44  ;;  %v634_v25 = vld [vmem:[%s9266_s30 + $0x8] sm:$0xff]  ;;  %v633_v26 = vld [vmem:[%s9266_s30] sm:$0xff] }
  0x32   : > { %1555 = vst [vmem:[#allocation2 + $0x347] sm:$0x1] %v8877_v14  ;;  %1556 = vst [vmem:[#allocation2 + $0x367] sm:$0x1] %v8877_v14  ;;  %v459_v0 = vrot.slane %v452_v63, %v9154_v20  ;;  %v636_v27 = vld [vmem:[%s9266_s30 + $0x18] sm:$0xff]  ;;  %v635_v30 = vld [vmem:[%s9266_s30 + $0x10] sm:$0xff] }
  0x33   : > { %1557 = vst [vmem:[#allocation2 + $0x387] sm:$0x1] %v8877_v14  ;;  %1558 = vst [vmem:[#allocation2 + $0x3a7] sm:$0x1] %v8877_v14  ;;  %v638_v31 = vld [vmem:[%s9266_s30 + $0x28] sm:$0xff]  ;;  %v637_v32 = vld [vmem:[%s9266_s30 + $0x20] sm:$0xff] }
  0x34   : > { %1559 = vst [vmem:[#allocation2 + $0x3c7] sm:$0x1] %v8877_v14  ;;  %1560 = vst [vmem:[#allocation2 + $0x3e7] sm:$0x1] %v8877_v14  ;;  %8134 = vmatpush1.bf16.msra.mxu0 %v8133_v49  ;;  %v640_v33 = vld [vmem:[%s9266_s30 + $0x38] sm:$0xff]  ;;  %v639_v38 = vld [vmem:[%s9266_s30 + $0x30] sm:$0xff] }
  0x35   : > { %1561 = vst [vmem:[#allocation2 + $0x407] sm:$0x1] %v8877_v14  ;;  %1562 = vst [vmem:[#allocation2 + $0x427] sm:$0x1] %v8877_v14  ;;  %8136 = vmatprep.subr.bf16.mxu0 %v8135_v50  ;;  %v642_v42 = vld [vmem:[%s9266_s30 + $0x48] sm:$0xff]  ;;  %v641_v43 = vld [vmem:[%s9266_s30 + $0x40] sm:$0xff] }
  0x36   : > { %1563 = vst [vmem:[#allocation2 + $0x447] sm:$0x1] %v8877_v14  ;;  %1564 = vst [vmem:[#allocation2 + $0x38] sm:$0x1] %v8877_v14  ;;  %v644_v44 = vld [vmem:[%s9266_s30 + $0x58] sm:$0xff]  ;;  %v643_v46 = vld [vmem:[%s9266_s30 + $0x50] sm:$0xff]  ;;  %s9548_s21 = scalar_lea.vmem %s13654_s1, %s6954_s27 }
  0x37   : > { %1565 = vst [vmem:[#allocation2 + $0x58] sm:$0x1] %v8877_v14  ;;  %1566 = vst [vmem:[#allocation2 + $0x78] sm:$0x1] %v8877_v14  ;;  %v646_v47 = vld [vmem:[%s9266_s30 + $0x68] sm:$0xff]  ;;  %v645_v48 = vld [vmem:[%s9266_s30 + $0x60] sm:$0xff] }
  0x38   : > { %1567 = vst [vmem:[#allocation2 + $0x98] sm:$0x1] %v8877_v14  ;;  %1568 = vst [vmem:[#allocation2 + $0xb8] sm:$0x1] %v8877_v14  ;;  %8138 = vmatpush1.bf16.msra.mxu0 %v8137_v55  ;;  %v648_v50 = vld [vmem:[%s9266_s30 + $0x78] sm:$0xff]  ;;  %v647_v54 = vld [vmem:[%s9266_s30 + $0x70] sm:$0xff] }
  0x39   : > { %1569 = vst [vmem:[#allocation2 + $0xd8] sm:$0x1] %v8877_v14  ;;  %1570 = vst [vmem:[#allocation2 + $0xf8] sm:$0x1] %v8877_v14  ;;  %8140 = vmatprep.subr.bf16.mxu0 %v8139_v56  ;;  %v650_v58 = vld [vmem:[%s9266_s30 + $0x88] sm:$0xff]  ;;  %v652_v60 = vld [vmem:[%s9266_s30 + $0x98] sm:$0xff] }
  0x3a   : > { %1571 = vst [vmem:[#allocation2 + $0x118] sm:$0x1] %v8877_v14  ;;  %1572 = vst [vmem:[#allocation2 + $0x138] sm:$0x1] %v8877_v14  ;;  %v651_v62 = vld [vmem:[%s9266_s30 + $0x90] sm:$0xff]  ;;  %v654_v63 = vld [vmem:[%s9266_s30 + $0xa8] sm:$0xff] }
  0x3b   : > { %1573 = vst [vmem:[#allocation2 + $0x158] sm:$0x1] %v8877_v14  ;;  %1574 = vst [vmem:[#allocation2 + $0x178] sm:$0x1] %v8877_v14  ;;  %v687_v9 = vld [vmem:[%s9266_s30 + $0x1b0] sm:$0xff]  ;;  %s10345_s18 = smov 0  }
  0x3c   : > { %1575 = vst [vmem:[#allocation2 + $0x198] sm:$0x1] %v8877_v14  ;;  %1576 = vst [vmem:[#allocation2 + $0x1b8] sm:$0x1] %v8877_v14  ;;  %8142 = vmatpush1.bf16.msra.mxu0 %v8141_v59  ;;  %v649_v59 = vld [vmem:[%s9266_s30 + $0x80] sm:$0xff] }
  0x3d   : > { %1577 = vst [vmem:[#allocation2 + $0x1d8] sm:$0x1] %v8877_v14  ;;  %1578 = vst [vmem:[#allocation2 + $0x1f8] sm:$0x1] %v8877_v14 }
  0x3e   : > { %1579 = vst [vmem:[#allocation2 + $0x218] sm:$0x1] %v8877_v14  ;;  %1580 = vst [vmem:[#allocation2 + $0x278] sm:$0x1] %v8877_v14 }
  0x3f   : > { %1581 = vst [vmem:[#allocation2 + $0x298] sm:$0x1] %v8877_v14  ;;  %1582 = vst [vmem:[#allocation2 + $0x2b8] sm:$0x1] %v8877_v14 }
  0x40   : > { %1583 = vst [vmem:[#allocation2 + $0x2d8] sm:$0x1] %v8877_v14  ;;  %1584 = vst [vmem:[#allocation2 + $0x2f8] sm:$0x1] %v8877_v14 }
  0x41   : > { %1585 = vst [vmem:[#allocation2 + $0x318] sm:$0x1] %v8877_v14  ;;  %1586 = vst [vmem:[#allocation2 + $0x338] sm:$0x1] %v8877_v14 }
  0x42   : > { %1587 = vst [vmem:[#allocation2 + $0x358] sm:$0x1] %v8877_v14  ;;  %1588 = vst [vmem:[#allocation2 + $0x378] sm:$0x1] %v8877_v14 }
  0x43   : > { %1589 = vst [vmem:[#allocation2 + $0x398] sm:$0x1] %v8877_v14  ;;  %1590 = vst [vmem:[#allocation2 + $0x3b8] sm:$0x1] %v8877_v14 }
  0x44   : > { %1591 = vst [vmem:[#allocation2 + $0x3d8] sm:$0x1] %v8877_v14  ;;  %1592 = vst [vmem:[#allocation2 + $0x3f8] sm:$0x1] %v8877_v14 }
  0x45   : > { %1593 = vst [vmem:[#allocation2 + $0x418] sm:$0x1] %v8877_v14  ;;  %1594 = vst [vmem:[#allocation2 + $0x438] sm:$0x1] %v8877_v14 }
  0x46   : > { %1595 = vst [vmem:[#allocation2 + $0x458] sm:$0x1] %v8877_v14  ;;  %13589 = vst [vmem:[#allocation10_spill] sm:$0xff] %v9237_v3 }
  0x47   : > { %13590 = vst [vmem:[#allocation11_spill] sm:$0xff] %v9243_v5 }
  0x9d   : > { %v479_v1 = vpop.permute.xlu0 %478 }
  0x9e   : > { %v482_v2 = vsel %vm481_vm0, %v459_v0, %v479_v1  ;;  %v653_v0 = vld [vmem:[%s9266_s30 + $0xa0] sm:$0xff] }
  0x9f   : > { %592 = vmatmul.mubr.f32.vlgmr.msra.gmra.mrb[0].mxu0 %v482_v2  ;;  %v656_v2 = vld [vmem:[%s9266_s30 + $0xb8] sm:$0xff] }
 0x172   : > { %v593_v8 = vpop.f32.mrb[0].mxu0 }
 0x173   : > { %v594_v10 = vadd.f32 %v593_v8, %v520_v6  ;;  %v595_v11 = vpop.f32.mrb[1].mxu0  ;;  %v655_v8 = vld [vmem:[%s9266_s30 + $0xb0] sm:$0xff] }
 0x174   : > { %v9248_v12 = vadd.f32 %v595_v11, %v524_v7 }
 0x175   : > { %v6748_v13 = vmul.f32 -1.442695, %v594_v10 }
 0x176   : > { %v1667_v14 = vrot.slane %v9248_v12, %v9154_v20 }
 0x177   : > { %8764 = vpow2.f32 %v6748_v13 }
 0x178   : > { %v1668_v15 = vcombine.high %v1667_v14, %v1667_v14  ;;  %v1675_v16 = vrot.slane %v1667_v14, %v9154_v20  ;;  %v658_v14 = vld [vmem:[%s9266_s30 + $0xc8] sm:$0xff] }
 0x17a   : > { %v1682_v17 = vrot.slane %v1668_v15, %v9154_v20  ;;  %1686 = vst.msk [vmem:[%s9254_s20] sm:$0x1] %vm1685_vm1, %v1675_v16  ;;  %v657_v15 = vld [vmem:[%s9266_s30 + $0xc0] sm:$0xff]  ;;  %v660_v16 = vld [vmem:[%s9266_s30 + $0xd8] sm:$0xff] }
 0x17c   : > { %1687 = vst.msk [vmem:[%s9254_s20 + $0x1] sm:$0x1] %vm1685_vm1, %v1682_v17 }
 0x181   : > { %v8765_v18 = vpop.eup %8764 }
 0x182   : > { %v601_v19 = vadd.f32 1.0, %v8765_v18  ;;  %v659_v18 = vld [vmem:[%s9266_s30 + $0xd0] sm:$0xff] }
 0x184   : > { %8766 = vrcp.f32 %v601_v19  ;;  %v662_v19 = vld [vmem:[%s9266_s30 + $0xe8] sm:$0xff] }
 0x18e   : > { %v8767_v21 = vpop.eup %8766 }
 0x18f   : > { %v704_v22 = vrot.slane %v8767_v21, %v9154_v20  ;;  %v661_v21 = vld [vmem:[%s9266_s30 + $0xe0] sm:$0xff] }
 0x191   : > { %v705_v23 = vcombine.high %v704_v22, %v704_v22  ;;  %v712_v24 = vrot.slane %v704_v22, %v9154_v20 }
 0x193   : > { %v719_v28 = vrot.slane %v705_v23, %v9154_v20  ;;  %v9275_v29 = vrot.slane %v712_v24, %v9237_v3  ;;  %v664_v23 = vld [vmem:[%s9266_s30 + $0xf8] sm:$0xff] }
 0x195   : > { %v9282_v34 = vrot.slane %v719_v28, %v9237_v3  ;;  %858 = vrot.lane.b32.xlu0 %v9275_v29, %s13592_s12  ;;  %v9287_v35 = vmul.f32 %v9275_v29, %v634_v25  ;;  %v9290_v36 = vmul.f32 %v9275_v29, %v633_v26  ;;  %v9293_v37 = vmul.f32 %v9275_v29, %v636_v27  ;;  %v663_v27 = vld [vmem:[%s9266_s30 + $0xf0] sm:$0xff] }
 0x196   : > { %v9297_v39 = vmul.f32 %v9275_v29, %v635_v30  ;;  %v9300_v40 = vmul.f32 %v9275_v29, %v638_v31  ;;  %v9303_v41 = vmul.f32 %v9275_v29, %v637_v32  ;;  %v9311_v45 = vmul.f32 %v9275_v29, %v640_v33  ;;  %v666_v32 = vld [vmem:[%s9266_s30 + $0x108] sm:$0xff]  ;;  %v665_v33 = vld [vmem:[%s9266_s30 + $0x100] sm:$0xff] }
 0x197   : > { %13593 = vst [vmem:[#allocation12_spill] sm:$0xff] %v9287_v35  ;;  %13594 = vst [vmem:[#allocation13_spill] sm:$0xff] %v9290_v36  ;;  %860 = vrot.lane.b32.xlu1 %v9282_v34, %s13592_s12  ;;  %v9317_v49 = vmul.f32 %v9275_v29, %v639_v38  ;;  %v9321_v51 = vmul.f32 %v9275_v29, %v642_v42  ;;  %v9324_v52 = vmul.f32 %v9275_v29, %v641_v43  ;;  %v668_v38 = vld [vmem:[%s9266_s30 + $0x118] sm:$0xff]  ;;  %v667_v43 = vld [vmem:[%s9266_s30 + $0x110] sm:$0xff] }
 0x198   : > { %13595 = vst [vmem:[#allocation14_spill] sm:$0xff] %v9293_v37  ;;  %13596 = vst [vmem:[#allocation15_spill] sm:$0xff] %v9297_v39  ;;  %v9327_v53 = vmul.f32 %v9275_v29, %v644_v44  ;;  %v9331_v55 = vmul.f32 %v9275_v29, %v643_v46  ;;  %v9334_v56 = vmul.f32 %v9275_v29, %v646_v47  ;;  %v670_v44 = vld [vmem:[%s9266_s30 + $0x128] sm:$0xff]  ;;  %v669_v46 = vld [vmem:[%s9266_s30 + $0x120] sm:$0xff] }
 0x199   : > { %13597 = vst [vmem:[#allocation16_spill] sm:$0xff] %v9300_v40  ;;  %13598 = vst [vmem:[#allocation17_spill] sm:$0xff] %v9303_v41  ;;  %v9337_v57 = vmul.f32 %v9275_v29, %v645_v48  ;;  %v9343_v61 = vmul.f32 %v9275_v29, %v648_v50  ;;  %v9349_v1 = vmul.f32 %v9275_v29, %v647_v54  ;;  %v672_v48 = vld [vmem:[%s9266_s30 + $0x138] sm:$0xff] }
 0x19a   : > { %13599 = vst [vmem:[#allocation18_spill] sm:$0xff] %v9311_v45  ;;  %13600 = vst [vmem:[#allocation19_spill] sm:$0xff] %v9317_v49  ;;  %v9353_v4 = vmul.f32 %v9275_v29, %v650_v58  ;;  %v9356_v6 = vmul.f32 %v9275_v29, %v649_v59  ;;  %v9359_v7 = vmul.f32 %v9275_v29, %v652_v60  ;;  %v671_v59 = vld [vmem:[%s9266_s30 + $0x130] sm:$0xff] }
 0x19b   : > { %13601 = vst [vmem:[#allocation20_spill] sm:$0xff] %v9321_v51  ;;  %13602 = vst [vmem:[#allocation21_spill] sm:$0xff] %v9324_v52  ;;  %v9363_v10 = vmul.f32 %v9275_v29, %v651_v62  ;;  %v9366_v11 = vmul.f32 %v9275_v29, %v654_v63  ;;  %v9369_v13 = vmul.f32 %v9275_v29, %v653_v0  ;;  %v674_v63 = vld [vmem:[%s9266_s30 + $0x148] sm:$0xff]  ;;  %v673_v0 = vld [vmem:[%s9266_s30 + $0x140] sm:$0xff] }
 0x19c   : > { %13603 = vst [vmem:[#allocation22_spill] sm:$0xff] %v9327_v53  ;;  %13604 = vst [vmem:[#allocation23_spill] sm:$0xff] %v9331_v55  ;;  %v9375_v17 = vmul.f32 %v9275_v29, %v656_v2  ;;  %v9381_v22 = vmul.f32 %v9275_v29, %v655_v8  ;;  %v9385_v24 = vmul.f32 %v9275_v29, %v658_v14  ;;  %v676_v2 = vld [vmem:[%s9266_s30 + $0x158] sm:$0xff]  ;;  %v675_v14 = vld [vmem:[%s9266_s30 + $0x150] sm:$0xff] }
 0x19d   : > { %13605 = vst [vmem:[#allocation24_spill] sm:$0xff] %v9334_v56  ;;  %13606 = vst [vmem:[#allocation25_spill] sm:$0xff] %v9337_v57  ;;  %v9388_v25 = vmul.f32 %v9275_v29, %v657_v15  ;;  %v9391_v26 = vmul.f32 %v9275_v29, %v660_v16  ;;  %v9395_v28 = vmul.f32 %v9275_v29, %v659_v18  ;;  %v678_v15 = vld [vmem:[%s9266_s30 + $0x168] sm:$0xff]  ;;  %v677_v16 = vld [vmem:[%s9266_s30 + $0x160] sm:$0xff] }
 0x19e   : > { %13607 = vst [vmem:[#allocation26_spill] sm:$0xff] %v9343_v61  ;;  %13608 = vst [vmem:[#allocation27_spill] sm:$0xff] %v9349_v1  ;;  %v9398_v30 = vmul.f32 %v9275_v29, %v662_v19  ;;  %v9401_v31 = vmul.f32 %v9275_v29, %v661_v21  ;;  %v9407_v42 = vmul.f32 %v9275_v29, %v664_v23  ;;  %v680_v19 = vld [vmem:[%s9266_s30 + $0x178] sm:$0xff] }
 0x19f   : > { %13609 = vst [vmem:[#allocation28_spill] sm:$0xff] %v9353_v4  ;;  %13610 = vst [vmem:[#allocation29_spill] sm:$0xff] %v9356_v6  ;;  %v9413_v47 = vmul.f32 %v9275_v29, %v663_v27  ;;  %v9417_v50 = vmul.f32 %v9282_v34, %v666_v32  ;;  %v9420_v54 = vmul.f32 %v9282_v34, %v665_v33  ;;  %v679_v32 = vld [vmem:[%s9266_s30 + $0x170] sm:$0xff] }
 0x1a0   : > { %13611 = vst [vmem:[#allocation30_spill] sm:$0xff] %v9359_v7  ;;  %13612 = vst [vmem:[#allocation31_spill] sm:$0xff] %v9363_v10  ;;  %v9423_v58 = vmul.f32 %v9282_v34, %v668_v38  ;;  %v9427_v60 = vmul.f32 %v9282_v34, %v667_v43  ;;  %v9430_v62 = vmul.f32 %v9282_v34, %v670_v44  ;;  %v682_v44 = vld [vmem:[%s9266_s30 + $0x188] sm:$0xff] }
 0x1a1   : > { %13613 = vst [vmem:[#allocation32_spill] sm:$0xff] %v9366_v11  ;;  %13614 = vst [vmem:[#allocation33_spill] sm:$0xff] %v9369_v13  ;;  %v9433_v29 = vmul.f32 %v9282_v34, %v669_v46  ;;  %v9439_v8 = vmul.f32 %v9282_v34, %v672_v48  ;;  %v9445_v18 = vmul.f32 %v9282_v34, %v671_v59  ;;  %v681_v46 = vld [vmem:[%s9266_s30 + $0x180] sm:$0xff]  ;;  %v684_v48 = vld [vmem:[%s9266_s30 + $0x198] sm:$0xff] }
 0x1a2   : > { %13615 = vst [vmem:[#allocation34_spill] sm:$0xff] %v9375_v17  ;;  %13616 = vst [vmem:[#allocation35_spill] sm:$0xff] %v9381_v22  ;;  %v9449_v21 = vmul.f32 %v9282_v34, %v674_v63  ;;  %v9452_v23 = vmul.f32 %v9282_v34, %v673_v0  ;;  %v9455_v27 = vmul.f32 %v9282_v34, %v676_v2  ;;  %v683_v63 = vld [vmem:[%s9266_s30 + $0x190] sm:$0xff]  ;;  %v686_v0 = vld [vmem:[%s9266_s30 + $0x1a8] sm:$0xff] }
 0x1a3   : > { %13617 = vst [vmem:[#allocation36_spill] sm:$0xff] %v9385_v24  ;;  %13618 = vst [vmem:[#allocation37_spill] sm:$0xff] %v9388_v25  ;;  %v9459_v33 = vmul.f32 %v9282_v34, %v675_v14  ;;  %v9462_v38 = vmul.f32 %v9282_v34, %v678_v15  ;;  %v9465_v43 = vmul.f32 %v9282_v34, %v677_v16  ;;  %v685_v2 = vld [vmem:[%s9266_s30 + $0x1a0] sm:$0xff]  ;;  %v688_v15 = vld [vmem:[%s9266_s30 + $0x1b8] sm:$0xff] }
 0x1a4   : > { %13619 = vst [vmem:[#allocation38_spill] sm:$0xff] %v9395_v28  ;;  %13620 = vst [vmem:[#allocation39_spill] sm:$0xff] %v9398_v30  ;;  %v9471_v59 = vmul.f32 %v9282_v34, %v680_v19  ;;  %v9477_v14 = vmul.f32 %v9282_v34, %v679_v32  ;;  %v9481_v16 = vmul.f32 %v9282_v34, %v682_v44  ;;  %v689_v44 = vld [vmem:[%s9266_s30 + $0x1c0] sm:$0xff] }
 0x1a5   : > { %13621 = vst [vmem:[#allocation40_spill] sm:$0xff] %v9413_v47  ;;  %13622 = vst [vmem:[#allocation41_spill] sm:$0xff] %v9417_v50  ;;  %v9484_v5 = vmul.f32 %v9282_v34, %v681_v46  ;;  %v9487_v19 = vmul.f32 %v9282_v34, %v684_v48  ;;  %v9497_v32 = vmul.f32 %v9282_v34, %v685_v2  ;;  %v694_v48 = vld [vmem:[%s9266_s30 + $0x1e8] sm:$0xff] }
 0x1a6   : > { %13623 = vst [vmem:[#allocation42_spill] sm:$0xff] %v9420_v54  ;;  %13624 = vst [vmem:[#allocation43_spill] sm:$0xff] %v9423_v58  ;;  %v9503_v46 = vmul.f32 %v9282_v34, %v688_v15 }
 0x1a7   : > { %13625 = vst [vmem:[#allocation44_spill] sm:$0xff] %v9427_v60  ;;  %13626 = vst [vmem:[#allocation45_spill] sm:$0xff] %v9430_v62 }
 0x1a8   : > { %13627 = vst [vmem:[#allocation46_spill] sm:$0xff] %v9433_v29  ;;  %13628 = vst [vmem:[#allocation47_spill] sm:$0xff] %v9439_v8 }
 0x1a9   : > { %13629 = vst [vmem:[#allocation48_spill] sm:$0xff] %v9445_v18  ;;  %13630 = vst [vmem:[#allocation49_spill] sm:$0xff] %v9449_v21 }
 0x1aa   : > { %13631 = vst [vmem:[#allocation50_spill] sm:$0xff] %v9452_v23  ;;  %13632 = vst [vmem:[#allocation51_spill] sm:$0xff] %v9455_v27 }
 0x1ab   : > { %13633 = vst [vmem:[#allocation52_spill] sm:$0xff] %v9459_v33  ;;  %13634 = vst [vmem:[#allocation53_spill] sm:$0xff] %v9462_v38  ;;  %v9509_v38 = vmul.f32 %v9282_v34, %v687_v9 }
 0x1ac   : > { %13635 = vst [vmem:[#allocation54_spill] sm:$0xff] %v9465_v43  ;;  %13636 = vst [vmem:[#allocation55_spill] sm:$0xff] %v9471_v59  ;;  %v9491_v59 = vmul.f32 %v9282_v34, %v683_v63  ;;  %v9494_v43 = vmul.f32 %v9282_v34, %v686_v0  ;;  %v696_v63 = vld [vmem:[%s9266_s30 + $0x1f8] sm:$0xff]  ;;  %v9516_v0 = vmul.f32 %v9282_v34, %v689_v44 }
 0x1ad   : > { %13637 = vst [vmem:[#allocation56_spill] sm:$0xff] %v9477_v14  ;;  %13638 = vst [vmem:[#allocation57_spill] sm:$0xff] %v9481_v16  ;;  %v690_v14 = vld [vmem:[%s9266_s30 + $0x1c8] sm:$0xff]  ;;  %v692_v16 = vld [vmem:[%s9266_s30 + $0x1d8] sm:$0xff] }
 0x1ae   : > { %13639 = vst [vmem:[#allocation58_spill] sm:$0xff] %v9484_v5  ;;  %13640 = vst [vmem:[#allocation59_spill] sm:$0xff] %v9487_v19  ;;  %v691_v5 = vld [vmem:[%s9266_s30 + $0x1d0] sm:$0xff]  ;;  %v693_v19 = vld [vmem:[%s9266_s30 + $0x1e0] sm:$0xff]  ;;  %v9519_v2 = vmul.f32 %v9282_v34, %v692_v16 }
 0x1af   : > { %13641 = vst [vmem:[#allocation60_spill] sm:$0xff] %v9491_v59  ;;  %13642 = vst [vmem:[#allocation61_spill] sm:$0xff] %v9494_v43  ;;  %v9513_v59 = vmul.f32 %v9282_v34, %v690_v14  ;;  %v9523_v15 = vmul.f32 %v9282_v34, %v691_v5  ;;  %v9529_v9 = vmul.f32 %v9282_v34, %v693_v19 }
 0x1b0   : > { %13643 = vst [vmem:[#allocation62_spill] sm:$0xff] %v9497_v32  ;;  %13644 = vst [vmem:[#allocation63_spill] sm:$0xff] %v9503_v46  ;;  %v695_v32 = vld [vmem:[%s9266_s30 + $0x1f0] sm:$0xff]  ;;  %v9526_v46 = vmul.f32 %v9282_v34, %v694_v48  ;;  %v9532_v14 = vmul.f32 %v9282_v34, %v696_v63  ;;  %v797_v63 = vld [vmem:[%s9548_s21 + $0x18] sm:$0xff] }
 0x1b1   : > { %13645 = vst [vmem:[#allocation64_spill] sm:$0xff] %v9509_v38  ;;  %13646 = vst [vmem:[#allocation65_spill] sm:$0xff] %v9513_v59  ;;  %v9535_v44 = vmul.f32 %v9282_v34, %v695_v32  ;;  %v795_v34 = vld [vmem:[%s9548_s21 + $0x8] sm:$0xff]  ;;  %v794_v32 = vld [vmem:[%s9548_s21] sm:$0xff] }
 0x1b2   : > { %13647 = vst [vmem:[#allocation66_spill] sm:$0xff] %v9516_v0  ;;  %13648 = vst [vmem:[#allocation67_spill] sm:$0xff] %v9519_v2  ;;  %v6749_v0 = vmul.f32 -1.442695, %v9248_v12 }
 0x1b3   : > { %13649 = vst [vmem:[#allocation68_spill] sm:$0xff] %v9523_v15  ;;  %13650 = vst [vmem:[#allocation69_spill] sm:$0xff] %v9526_v46  ;;  %v799_v46 = vld [vmem:[%s9548_s21 + $0x28] sm:$0xff] }
 0x1b4   : > { %13651 = vst [vmem:[#allocation70_spill] sm:$0xff] %v9529_v9  ;;  %13652 = vst [vmem:[#allocation71_spill] sm:$0xff] %v9532_v14  ;;  %8768 = vpow2.f32 %v6749_v0  ;;  %v796_v0 = vld [vmem:[%s9548_s21 + $0x10] sm:$0xff] }
 0x1b5   : > { %13653 = vst [vmem:[#allocation72_spill] sm:$0xff] %v9535_v44 }
 0x1be   : > { %v8769_v16 = vpop.eup %8768 }
 0x1bf   : > { %v607_v2 = vadd.f32 1.0, %v8769_v16 }
 0x1c1   : > { %8770 = vrcp.f32 %v607_v2 }
 0x1cb   : > { %v8771_v5 = vpop.eup %8770 }
 0x1cc   : > { %v9539_v15 = vrot.slane %v8771_v5, %v9154_v20 }
 0x1ce   : > { %v625_v19 = vrot.slane %v9539_v15, %v9154_v20 }
 0x1d0   : > { %v9551_v12 = vrot.slane %v625_v19, %v9237_v3 }
 0x1d2   : > { %v1067_v16 = vmul.f32 %v9551_v12, %v9287_v35  ;;  %v1066_v19 = vmul.f32 %v9551_v12, %v9290_v36  ;;  %v798_v35 = vld [vmem:[%s9548_s21 + $0x20] sm:$0xff] }
 0x207   : > { %v9555_v48 = vpop.permute.xlu0 %858 }
 0x208   : > { %v9560_v2 = vmul.f32 %v9555_v48, %v795_v34  ;;  %v9565_v5 = vmul.f32 %v9555_v48, %v794_v32  ;;  %v9572_v9 = vmul.f32 %v9555_v48, %v797_v63  ;;  %v9575_v34 = vmul.f32 %v9555_v48, %v796_v0 }
 0x209   : > { %v1069_v32 = vmul.f32 %v9551_v12, %v9293_v37  ;;  %v9588_v0 = vmul.f32 %v9555_v48, %v799_v46  ;;  %v9591_v36 = vmul.f32 %v9555_v48, %v798_v35 }
 0x20a   : > { %v1131_v44 = vadd.f32 %v1067_v16, %v9560_v2  ;;  %v1130_v14 = vadd.f32 %v1066_v19, %v9565_v5  ;;  %v1068_v16 = vmul.f32 %v9551_v12, %v9297_v39  ;;  %v1071_v39 = vmul.f32 %v9551_v12, %v9300_v40 }
 0x20b   : > { %v1133_v63 = vadd.f32 %v1069_v32, %v9572_v9  ;;  %v1070_v32 = vmul.f32 %v9551_v12, %v9303_v41  ;;  %v1073_v41 = vmul.f32 %v9551_v12, %v9311_v45 }
 0x20c   : > { %1260 = vrot.lane.b32.xlu0 %v1131_v44, %s13592_s12  ;;  %1258 = vrot.lane.b32.xlu1 %v1130_v14, %s13592_s12  ;;  %v1132_v19 = vadd.f32 %v1068_v16, %v9575_v34  ;;  %v801_v44 = vld [vmem:[%s9548_s21 + $0x38] sm:$0xff]  ;;  %v800_v14 = vld [vmem:[%s9548_s21 + $0x30] sm:$0xff]  ;;  %v1135_v46 = vadd.f32 %v1071_v39, %v9588_v0  ;;  %v1072_v39 = vmul.f32 %v9551_v12, %v9317_v49 }
 0x20d   : > { %v1134_v16 = vadd.f32 %v1070_v32, %v9591_v36  ;;  %v9604_v35 = vmul.f32 %v9555_v48, %v801_v44  ;;  %v9607_v37 = vmul.f32 %v9555_v48, %v800_v14  ;;  %v1075_v49 = vmul.f32 %v9551_v12, %v9321_v51 }
 0x20f   : > { %v1137_v44 = vadd.f32 %v1073_v41, %v9604_v35  ;;  %v1136_v32 = vadd.f32 %v1072_v39, %v9607_v37  ;;  %v1074_v41 = vmul.f32 %v9551_v12, %v9324_v52  ;;  %v1077_v52 = vmul.f32 %v9551_v12, %v9327_v53 }
 0x210   : > { %1264 = vrot.lane.b32.xlu0 %v1133_v63, %s13592_s12  ;;  %1262 = vrot.lane.b32.xlu1 %v1132_v19, %s13592_s12  ;;  %v803_v63 = vld [vmem:[%s9548_s21 + $0x48] sm:$0xff]  ;;  %v802_v19 = vld [vmem:[%s9548_s21 + $0x40] sm:$0xff] }
 0x211   : > { %v9620_v14 = vmul.f32 %v9555_v48, %v803_v63  ;;  %v9623_v40 = vmul.f32 %v9555_v48, %v802_v19 }
 0x213   : > { %v1139_v63 = vadd.f32 %v1075_v49, %v9620_v14  ;;  %v1138_v39 = vadd.f32 %v1074_v41, %v9623_v40  ;;  %v1076_v49 = vmul.f32 %v9551_v12, %v9331_v55  ;;  %v1079_v55 = vmul.f32 %v9551_v12, %v9334_v56 }
 0x214   : > { %1268 = vrot.lane.b32.xlu0 %v1135_v46, %s13592_s12  ;;  %1266 = vrot.lane.b32.xlu1 %v1134_v16, %s13592_s12  ;;  %v805_v46 = vld [vmem:[%s9548_s21 + $0x58] sm:$0xff]  ;;  %v804_v16 = vld [vmem:[%s9548_s21 + $0x50] sm:$0xff] }
 0x215   : > { %v9636_v19 = vmul.f32 %v9555_v48, %v805_v46  ;;  %v9639_v45 = vmul.f32 %v9555_v48, %v804_v16 }
 0x217   : > { %v1141_v46 = vadd.f32 %v1077_v52, %v9636_v19  ;;  %v1140_v41 = vadd.f32 %v1076_v49, %v9639_v45  ;;  %v1078_v52 = vmul.f32 %v9551_v12, %v9337_v57  ;;  %v1081_v57 = vmul.f32 %v9551_v12, %v9343_v61 }
 0x218   : > { %1272 = vrot.lane.b32.xlu0 %v1137_v44, %s13592_s12  ;;  %1270 = vrot.lane.b32.xlu1 %v1136_v32, %s13592_s12  ;;  %v807_v44 = vld [vmem:[%s9548_s21 + $0x68] sm:$0xff]  ;;  %v806_v32 = vld [vmem:[%s9548_s21 + $0x60] sm:$0xff] }
 0x219   : > { %v9652_v16 = vmul.f32 %v9555_v48, %v807_v44  ;;  %v9655_v51 = vmul.f32 %v9555_v48, %v806_v32 }
 0x21b   : > { %v1143_v44 = vadd.f32 %v1079_v55, %v9652_v16  ;;  %v1142_v49 = vadd.f32 %v1078_v52, %v9655_v51  ;;  %v1080_v55 = vmul.f32 %v9551_v12, %v9349_v1  ;;  %v1083_v1 = vmul.f32 %v9551_v12, %v9353_v4 }
 0x21c   : > { %1276 = vrot.lane.b32.xlu0 %v1139_v63, %s13592_s12  ;;  %1274 = vrot.lane.b32.xlu1 %v1138_v39, %s13592_s12  ;;  %v809_v63 = vld [vmem:[%s9548_s21 + $0x78] sm:$0xff]  ;;  %v808_v39 = vld [vmem:[%s9548_s21 + $0x70] sm:$0xff] }
 0x21d   : > { %v9668_v32 = vmul.f32 %v9555_v48, %v809_v63  ;;  %v9671_v53 = vmul.f32 %v9555_v48, %v808_v39 }
 0x21f   : > { %v1145_v63 = vadd.f32 %v1081_v57, %v9668_v32  ;;  %v1144_v52 = vadd.f32 %v1080_v55, %v9671_v53  ;;  %v1082_v57 = vmul.f32 %v9551_v12, %v9356_v6  ;;  %v1085_v6 = vmul.f32 %v9551_v12, %v9359_v7 }
 0x220   : > { %1280 = vrot.lane.b32.xlu0 %v1141_v46, %s13592_s12  ;;  %1278 = vrot.lane.b32.xlu1 %v1140_v41, %s13592_s12  ;;  %v811_v46 = vld [vmem:[%s9548_s21 + $0x88] sm:$0xff]  ;;  %v810_v41 = vld [vmem:[%s9548_s21 + $0x80] sm:$0xff] }
 0x221   : > { %v9684_v39 = vmul.f32 %v9555_v48, %v811_v46  ;;  %v9687_v56 = vmul.f32 %v9555_v48, %v810_v41 }
 0x223   : > { %v1147_v46 = vadd.f32 %v1083_v1, %v9684_v39  ;;  %v1146_v55 = vadd.f32 %v1082_v57, %v9687_v56  ;;  %v1084_v1 = vmul.f32 %v9551_v12, %v9363_v10  ;;  %v1087_v10 = vmul.f32 %v9551_v12, %v9366_v11 }
 0x224   : > { %1284 = vrot.lane.b32.xlu0 %v1143_v44, %s13592_s12  ;;  %1282 = vrot.lane.b32.xlu1 %v1142_v49, %s13592_s12  ;;  %v813_v44 = vld [vmem:[%s9548_s21 + $0x98] sm:$0xff]  ;;  %v812_v49 = vld [vmem:[%s9548_s21 + $0x90] sm:$0xff] }
 0x225   : > { %v9700_v41 = vmul.f32 %v9555_v48, %v813_v44  ;;  %v9703_v61 = vmul.f32 %v9555_v48, %v812_v49 }
 0x227   : > { %v1149_v44 = vadd.f32 %v1085_v6, %v9700_v41  ;;  %v1148_v57 = vadd.f32 %v1084_v1, %v9703_v61  ;;  %v1086_v6 = vmul.f32 %v9551_v12, %v9369_v13  ;;  %v1089_v13 = vmul.f32 %v9551_v12, %v9375_v17 }
 0x228   : > { %1288 = vrot.lane.b32.xlu0 %v1145_v63, %s13592_s12  ;;  %1286 = vrot.lane.b32.xlu1 %v1144_v52, %s13592_s12  ;;  %v815_v63 = vld [vmem:[%s9548_s21 + $0xa8] sm:$0xff]  ;;  %v814_v52 = vld [vmem:[%s9548_s21 + $0xa0] sm:$0xff] }
 0x229   : > { %v9716_v49 = vmul.f32 %v9555_v48, %v815_v63  ;;  %v9719_v4 = vmul.f32 %v9555_v48, %v814_v52 }
 0x22b   : > { %v1151_v63 = vadd.f32 %v1087_v10, %v9716_v49  ;;  %v1150_v1 = vadd.f32 %v1086_v6, %v9719_v4  ;;  %v1088_v10 = vmul.f32 %v9551_v12, %v9381_v22  ;;  %v1091_v22 = vmul.f32 %v9551_v12, %v9385_v24 }
 0x22c   : > { %1292 = vrot.lane.b32.xlu0 %v1147_v46, %s13592_s12  ;;  %1290 = vrot.lane.b32.xlu1 %v1146_v55, %s13592_s12  ;;  %v817_v46 = vld [vmem:[%s9548_s21 + $0xb8] sm:$0xff]  ;;  %v816_v55 = vld [vmem:[%s9548_s21 + $0xb0] sm:$0xff]  ;;  %v618_v24 = vcombine.high %v9539_v15, %v9539_v15 }
 0x22d   : > { %v9732_v52 = vmul.f32 %v9555_v48, %v817_v46  ;;  %v9735_v7 = vmul.f32 %v9555_v48, %v816_v55 }
 0x22f   : > { %v1153_v46 = vadd.f32 %v1089_v13, %v9732_v52  ;;  %v1152_v6 = vadd.f32 %v1088_v10, %v9735_v7  ;;  %v1090_v13 = vmul.f32 %v9551_v12, %v9388_v25 }
 0x230   : > { %1296 = vrot.lane.b32.xlu0 %v1149_v44, %s13592_s12  ;;  %1294 = vrot.lane.b32.xlu1 %v1148_v57, %s13592_s12  ;;  %v819_v44 = vld [vmem:[%s9548_s21 + $0xc8] sm:$0xff]  ;;  %v818_v57 = vld [vmem:[%s9548_s21 + $0xc0] sm:$0xff] }
 0x231   : > { %v9748_v55 = vmul.f32 %v9555_v48, %v819_v44  ;;  %v9751_v11 = vmul.f32 %v9555_v48, %v818_v57 }
 0x233   : > { %13655 = vst [vmem:[#allocation73_spill] sm:$0xff] %v9751_v11  ;;  %v1155_v10 = vadd.f32 %v1091_v22, %v9748_v55  ;;  %v1154_v44 = vadd.f32 %v1090_v13, %v9751_v11  ;;  %v1093_v22 = vmul.f32 %v9551_v12, %v9391_v26  ;;  %v1092_v13 = vmul.f32 %v9551_v12, %v9395_v28 }
 0x234   : > { %1300 = vrot.lane.b32.xlu0 %v1151_v63, %s13592_s12  ;;  %1298 = vrot.lane.b32.xlu1 %v1150_v1, %s13592_s12  ;;  %v821_v63 = vld [vmem:[%s9548_s21 + $0xd8] sm:$0xff]  ;;  %v820_v1 = vld [vmem:[%s9548_s21 + $0xd0] sm:$0xff]  ;;  %v632_v11 = vrot.slane %v618_v24, %v9154_v20  ;;  %v9804_v24 = vpop.permute.xlu1 %860 }
 0x235   : > { %v9764_v57 = vmul.f32 %v9555_v48, %v821_v63  ;;  %v9767_v17 = vmul.f32 %v9555_v48, %v820_v1 }
 0x237   : > { %v1157_v63 = vadd.f32 %v1093_v22, %v9764_v57  ;;  %v1156_v1 = vadd.f32 %v1092_v13, %v9767_v17  ;;  %v1095_v22 = vmul.f32 %v9551_v12, %v9398_v30  ;;  %v1094_v13 = vmul.f32 %v9551_v12, %v9401_v31 }
 0x238   : > { %1304 = vrot.lane.b32.xlu0 %v1153_v46, %s13592_s12  ;;  %1302 = vrot.lane.b32.xlu1 %v1152_v6, %s13592_s12  ;;  %v823_v46 = vld [vmem:[%s9548_s21 + $0xe8] sm:$0xff]  ;;  %v822_v6 = vld [vmem:[%s9548_s21 + $0xe0] sm:$0xff]  ;;  %v9809_v30 = vrot.slane %v632_v11, %v9237_v3 }
 0x239   : > { %v9782_v25 = vmul.f32 %v9555_v48, %v823_v46  ;;  %v9785_v15 = vmul.f32 %v9555_v48, %v822_v6 }
 0x23a   : > { %v1099_v3 = vmul.f32 %v9809_v30, %v9417_v50 }
 0x23b   : > { %v1159_v46 = vadd.f32 %v1095_v22, %v9782_v25  ;;  %v1158_v6 = vadd.f32 %v1094_v13, %v9785_v15  ;;  %v1097_v22 = vmul.f32 %v9551_v12, %v9407_v42 }
 0x23c   : > { %1308 = vrot.lane.b32.xlu0 %v1155_v10, %s13592_s12  ;;  %1306 = vrot.lane.b32.xlu1 %v1154_v44, %s13592_s12  ;;  %v825_v10 = vld [vmem:[%s9548_s21 + $0xf8] sm:$0xff]  ;;  %v824_v44 = vld [vmem:[%s9548_s21 + $0xf0] sm:$0xff] }
 0x23d   : > { %v9799_v28 = vmul.f32 %v9555_v48, %v825_v10  ;;  %v9802_v20 = vmul.f32 %v9555_v48, %v824_v44  ;;  %v1096_v10 = vmul.f32 %v9551_v12, %v9413_v47 }
 0x23f   : > { %v1161_v48 = vadd.f32 %v1097_v22, %v9799_v28  ;;  %v1160_v44 = vadd.f32 %v1096_v10, %v9802_v20  ;;  %v1098_v22 = vmul.f32 %v9809_v30, %v9420_v54  ;;  %v1101_v54 = vmul.f32 %v9809_v30, %v9423_v58 }
 0x240   : > { %1312 = vrot.lane.b32.xlu0 %v1157_v63, %s13592_s12  ;;  %1310 = vrot.lane.b32.xlu1 %v1156_v1, %s13592_s12  ;;  %v827_v63 = vld [vmem:[%s9548_s21 + $0x108] sm:$0xff]  ;;  %v826_v1 = vld [vmem:[%s9548_s21 + $0x100] sm:$0xff] }
 0x241   : > { %v9820_v13 = vmul.f32 %v9804_v24, %v827_v63  ;;  %v9823_v11 = vmul.f32 %v9804_v24, %v826_v1 }
 0x243   : > { %v1163_v63 = vadd.f32 %v1099_v3, %v9820_v13  ;;  %v1162_v10 = vadd.f32 %v1098_v22, %v9823_v11  ;;  %v1100_v3 = vmul.f32 %v9809_v30, %v9427_v60  ;;  %v1103_v60 = vmul.f32 %v9809_v30, %v9430_v62 }
 0x244   : > { %1316 = vrot.lane.b32.xlu0 %v1159_v46, %s13592_s12  ;;  %1314 = vrot.lane.b32.xlu1 %v1158_v6, %s13592_s12  ;;  %v829_v46 = vld [vmem:[%s9548_s21 + $0x118] sm:$0xff]  ;;  %v828_v6 = vld [vmem:[%s9548_s21 + $0x110] sm:$0xff] }
 0x245   : > { %v9836_v1 = vmul.f32 %v9804_v24, %v829_v46  ;;  %v9839_v47 = vmul.f32 %v9804_v24, %v828_v6 }
 0x247   : > { %v1165_v46 = vadd.f32 %v1101_v54, %v9836_v1  ;;  %v1164_v22 = vadd.f32 %v1100_v3, %v9839_v47  ;;  %v1102_v54 = vmul.f32 %v9809_v30, %v9433_v29  ;;  %v1105_v29 = vmul.f32 %v9809_v30, %v9439_v8 }
 0x248   : > { %1320 = vrot.lane.b32.xlu0 %v1161_v48, %s13592_s12  ;;  %1318 = vrot.lane.b32.xlu1 %v1160_v44, %s13592_s12  ;;  %v831_v48 = vld [vmem:[%s9548_s21 + $0x128] sm:$0xff]  ;;  %v830_v44 = vld [vmem:[%s9548_s21 + $0x120] sm:$0xff] }
 0x249   : > { %v9852_v6 = vmul.f32 %v9804_v24, %v831_v48  ;;  %v9855_v50 = vmul.f32 %v9804_v24, %v830_v44 }
 0x24b   : > { %v1167_v48 = vadd.f32 %v1103_v60, %v9852_v6  ;;  %v1166_v3 = vadd.f32 %v1102_v54, %v9855_v50  ;;  %v1104_v60 = vmul.f32 %v9809_v30, %v9445_v18  ;;  %v1107_v18 = vmul.f32 %v9809_v30, %v9449_v21 }
 0x24c   : > { %1324 = vrot.lane.b32.xlu0 %v1163_v63, %s13592_s12  ;;  %1322 = vrot.lane.b32.xlu1 %v1162_v10, %s13592_s12  ;;  %v833_v63 = vld [vmem:[%s9548_s21 + $0x138] sm:$0xff]  ;;  %v832_v10 = vld [vmem:[%s9548_s21 + $0x130] sm:$0xff] }
 0x24d   : > { %v9868_v44 = vmul.f32 %v9804_v24, %v833_v63  ;;  %v9871_v58 = vmul.f32 %v9804_v24, %v832_v10 }
 0x24f   : > { %v1169_v63 = vadd.f32 %v1105_v29, %v9868_v44  ;;  %v1168_v54 = vadd.f32 %v1104_v60, %v9871_v58  ;;  %v1106_v29 = vmul.f32 %v9809_v30, %v9452_v23  ;;  %v1109_v23 = vmul.f32 %v9809_v30, %v9455_v27  ;;  %v13662_v27 = vld [vmem:[#allocation53_spill] sm:$0xff] }
 0x250   : > { %1328 = vrot.lane.b32.xlu0 %v1165_v46, %s13592_s12  ;;  %1326 = vrot.lane.b32.xlu1 %v1164_v22, %s13592_s12  ;;  %v835_v46 = vld [vmem:[%s9548_s21 + $0x148] sm:$0xff]  ;;  %v834_v22 = vld [vmem:[%s9548_s21 + $0x140] sm:$0xff] }
 0x251   : > { %v9884_v10 = vmul.f32 %v9804_v24, %v835_v46  ;;  %v9887_v62 = vmul.f32 %v9804_v24, %v834_v22 }
 0x253   : > { %13656 = vst [vmem:[#allocation74_spill] sm:$0xff] %v9884_v10  ;;  %13657 = vst [vmem:[#allocation75_spill] sm:$0xff] %v9887_v62  ;;  %v1171_v46 = vadd.f32 %v1107_v18, %v9884_v10  ;;  %v1170_v60 = vadd.f32 %v1106_v29, %v9887_v62  ;;  %v1108_v18 = vmul.f32 %v9809_v30, %v9459_v33  ;;  %v13663_v62 = vld [vmem:[#allocation54_spill] sm:$0xff]  ;;  %v857_v10 = vld [vmem:[%s9548_s21 + $0x1f8] sm:$0xff] }
 0x254   : > { %1332 = vrot.lane.b32.xlu0 %v1167_v48, %s13592_s12  ;;  %1330 = vrot.lane.b32.xlu1 %v1166_v3, %s13592_s12  ;;  %v837_v48 = vld [vmem:[%s9548_s21 + $0x158] sm:$0xff]  ;;  %v836_v3 = vld [vmem:[%s9548_s21 + $0x150] sm:$0xff]  ;;  %v1111_v33 = vmul.f32 %v9809_v30, %v13662_v27 }
 0x255   : > { %v9900_v22 = vmul.f32 %v9804_v24, %v837_v48  ;;  %v9903_v8 = vmul.f32 %v9804_v24, %v836_v3  ;;  %v13666_v27 = vld [vmem:[#allocation55_spill] sm:$0xff] }
 0x257   : > { %13658 = vst [vmem:[#allocation76_spill] sm:$0xff] %v9900_v22  ;;  %13659 = vst [vmem:[#allocation77_spill] sm:$0xff] %v9903_v8  ;;  %v1173_v48 = vadd.f32 %v1109_v23, %v9900_v22  ;;  %v1172_v29 = vadd.f32 %v1108_v18, %v9903_v8  ;;  %v1110_v23 = vmul.f32 %v9809_v30, %v13663_v62  ;;  %v13667_v22 = vld [vmem:[#allocation56_spill] sm:$0xff] }
 0x258   : > { %1336 = vrot.lane.b32.xlu0 %v1169_v63, %s13592_s12  ;;  %1334 = vrot.lane.b32.xlu1 %v1168_v54, %s13592_s12  ;;  %v839_v63 = vld [vmem:[%s9548_s21 + $0x168] sm:$0xff]  ;;  %v838_v54 = vld [vmem:[%s9548_s21 + $0x160] sm:$0xff]  ;;  %v1113_v62 = vmul.f32 %v9809_v30, %v13666_v27 }
 0x259   : > { %v9916_v3 = vmul.f32 %v9804_v24, %v839_v63  ;;  %v9919_v21 = vmul.f32 %v9804_v24, %v838_v54  ;;  %v13670_v27 = vld [vmem:[#allocation57_spill] sm:$0xff] }
 0x25b   : > { %13660 = vst [vmem:[#allocation78_spill] sm:$0xff] %v9916_v3  ;;  %13661 = vst [vmem:[#allocation79_spill] sm:$0xff] %v9919_v21  ;;  %v1175_v63 = vadd.f32 %v1111_v33, %v9916_v3  ;;  %v1174_v18 = vadd.f32 %v1110_v23, %v9919_v21  ;;  %v1112_v33 = vmul.f32 %v9809_v30, %v13667_v22  ;;  %v13671_v3 = vld [vmem:[#allocation58_spill] sm:$0xff] }
 0x25c   : > { %1340 = vrot.lane.b32.xlu0 %v1171_v46, %s13592_s12  ;;  %1338 = vrot.lane.b32.xlu1 %v1170_v60, %s13592_s12  ;;  %v841_v46 = vld [vmem:[%s9548_s21 + $0x178] sm:$0xff]  ;;  %v840_v60 = vld [vmem:[%s9548_s21 + $0x170] sm:$0xff]  ;;  %v1115_v22 = vmul.f32 %v9809_v30, %v13670_v27 }
 0x25d   : > { %v9932_v54 = vmul.f32 %v9804_v24, %v841_v46  ;;  %v9935_v8 = vmul.f32 %v9804_v24, %v840_v60  ;;  %v13674_v27 = vld [vmem:[#allocation59_spill] sm:$0xff] }
 0x25f   : > { %13664 = vst [vmem:[#allocation80_spill] sm:$0xff] %v9932_v54  ;;  %13665 = vst [vmem:[#allocation81_spill] sm:$0xff] %v9935_v8  ;;  %v1177_v46 = vadd.f32 %v1113_v62, %v9932_v54  ;;  %v1176_v23 = vadd.f32 %v1112_v33, %v9935_v8  ;;  %v1114_v62 = vmul.f32 %v9809_v30, %v13671_v3  ;;  %v13675_v54 = vld [vmem:[#allocation60_spill] sm:$0xff] }
 0x260   : > { %1344 = vrot.lane.b32.xlu0 %v1173_v48, %s13592_s12  ;;  %1342 = vrot.lane.b32.xlu1 %v1172_v29, %s13592_s12  ;;  %v843_v48 = vld [vmem:[%s9548_s21 + $0x188] sm:$0xff]  ;;  %v842_v29 = vld [vmem:[%s9548_s21 + $0x180] sm:$0xff]  ;;  %v1117_v3 = vmul.f32 %v9809_v30, %v13674_v27 }
 0x261   : > { %v9948_v60 = vmul.f32 %v9804_v24, %v843_v48  ;;  %v9951_v21 = vmul.f32 %v9804_v24, %v842_v29  ;;  %v13678_v27 = vld [vmem:[#allocation62_spill] sm:$0xff] }
 0x263   : > { %13668 = vst [vmem:[#allocation82_spill] sm:$0xff] %v9948_v60  ;;  %13669 = vst [vmem:[#allocation83_spill] sm:$0xff] %v9951_v21  ;;  %v1179_v48 = vadd.f32 %v1115_v22, %v9948_v60  ;;  %v1178_v33 = vadd.f32 %v1114_v62, %v9951_v21  ;;  %v1116_v22 = vmul.f32 %v9809_v30, %v13675_v54 }
 0x264   : > { %1348 = vrot.lane.b32.xlu0 %v1175_v63, %s13592_s12  ;;  %1346 = vrot.lane.b32.xlu1 %v1174_v18, %s13592_s12  ;;  %v845_v63 = vld [vmem:[%s9548_s21 + $0x198] sm:$0xff]  ;;  %v844_v18 = vld [vmem:[%s9548_s21 + $0x190] sm:$0xff]  ;;  %v1119_v54 = vmul.f32 %v9809_v30, %v9494_v43 }
 0x265   : > { %v9964_v29 = vmul.f32 %v9804_v24, %v845_v63  ;;  %v9967_v8 = vmul.f32 %v9804_v24, %v844_v18  ;;  %v13681_v43 = vld [vmem:[#allocation63_spill] sm:$0xff] }
 0x267   : > { %13672 = vst [vmem:[#allocation84_spill] sm:$0xff] %v9964_v29  ;;  %13673 = vst [vmem:[#allocation85_spill] sm:$0xff] %v9967_v8  ;;  %v1181_v63 = vadd.f32 %v1117_v3, %v9964_v29  ;;  %v1180_v62 = vadd.f32 %v1116_v22, %v9967_v8  ;;  %v1118_v3 = vmul.f32 %v9809_v30, %v13678_v27 }
 0x268   : > { %1352 = vrot.lane.b32.xlu0 %v1177_v46, %s13592_s12  ;;  %1350 = vrot.lane.b32.xlu1 %v1176_v23, %s13592_s12  ;;  %v847_v46 = vld [vmem:[%s9548_s21 + $0x1a8] sm:$0xff]  ;;  %v846_v23 = vld [vmem:[%s9548_s21 + $0x1a0] sm:$0xff]  ;;  %v1121_v27 = vmul.f32 %v9809_v30, %v13681_v43 }
 0x269   : > { %v9980_v18 = vmul.f32 %v9804_v24, %v847_v46  ;;  %v9983_v21 = vmul.f32 %v9804_v24, %v846_v23 }
 0x26b   : > { %13676 = vst [vmem:[#allocation86_spill] sm:$0xff] %v9980_v18  ;;  %13677 = vst [vmem:[#allocation87_spill] sm:$0xff] %v9983_v21  ;;  %v1183_v46 = vadd.f32 %v1119_v54, %v9980_v18  ;;  %v1182_v22 = vadd.f32 %v1118_v3, %v9983_v21  ;;  %v1120_v54 = vmul.f32 %v9809_v30, %v9509_v38 }
 0x26c   : > { %1356 = vrot.lane.b32.xlu0 %v1179_v48, %s13592_s12  ;;  %1354 = vrot.lane.b32.xlu1 %v1178_v33, %s13592_s12  ;;  %v849_v48 = vld [vmem:[%s9548_s21 + $0x1b8] sm:$0xff]  ;;  %v848_v33 = vld [vmem:[%s9548_s21 + $0x1b0] sm:$0xff]  ;;  %v1123_v38 = vmul.f32 %v9809_v30, %v9513_v59 }
 0x26d   : > { %v9996_v23 = vmul.f32 %v9804_v24, %v849_v48  ;;  %v9999_v8 = vmul.f32 %v9804_v24, %v848_v33  ;;  %v855_v59 = vld [vmem:[%s9548_s21 + $0x1e8] sm:$0xff] }
 0x26e   : > { %v10064_v60 = vmul.f32 %v9804_v24, %v855_v59  ;;  %v13692_v59 = vld [vmem:[#allocation70_spill] sm:$0xff] }
 0x26f   : > { %13679 = vst [vmem:[#allocation88_spill] sm:$0xff] %v9996_v23  ;;  %13680 = vst [vmem:[#allocation89_spill] sm:$0xff] %v9999_v8  ;;  %v1185_v3 = vadd.f32 %v1121_v27, %v9996_v23  ;;  %v1184_v48 = vadd.f32 %v1120_v54, %v9999_v8  ;;  %v13684_v27 = vld [vmem:[#allocation66_spill] sm:$0xff]  ;;  %v939_v54 = vmul.f32 %v9551_v12, %v9560_v2  ;;  %v854_v23 = vld [vmem:[%s9548_s21 + $0x1e0] sm:$0xff] }
 0x270   : > { %1360 = vrot.lane.b32.xlu0 %v1181_v63, %s13592_s12  ;;  %1358 = vrot.lane.b32.xlu1 %v1180_v62, %s13592_s12  ;;  %v851_v63 = vld [vmem:[%s9548_s21 + $0x1c8] sm:$0xff]  ;;  %v850_v62 = vld [vmem:[%s9548_s21 + $0x1c0] sm:$0xff]  ;;  %v1122_v43 = vmul.f32 %v9809_v30, %v13684_v27  ;;  %v13685_v2 = vld [vmem:[#allocation67_spill] sm:$0xff] }
 0x271   : > { %v10012_v33 = vmul.f32 %v9804_v24, %v851_v63  ;;  %v10015_v21 = vmul.f32 %v9804_v24, %v850_v62  ;;  %v938_v63 = vmul.f32 %v9551_v12, %v9565_v5  ;;  %v1125_v27 = vmul.f32 %v9809_v30, %v13685_v2  ;;  %v13686_v5 = vld [vmem:[#allocation68_spill] sm:$0xff] }
 0x273   : > { %13682 = vst [vmem:[#allocation90_spill] sm:$0xff] %v10012_v33  ;;  %13683 = vst [vmem:[#allocation91_spill] sm:$0xff] %v10015_v21  ;;  %v1187_v62 = vadd.f32 %v1123_v38, %v10012_v33  ;;  %v1186_v8 = vadd.f32 %v1122_v43, %v10015_v21  ;;  %v1124_v38 = vmul.f32 %v9809_v30, %v13686_v5  ;;  %v10048_v43 = vld [vmem:[%s13355_s7] ss:$0 sm:$0xff]  ;;  %v13690_v5 = vld [vmem:[#allocation13_spill] sm:$0xff] }
 0x274   : > { %1364 = vrot.lane.b32.xlu0 %v1183_v46, %s13592_s12  ;;  %1362 = vrot.lane.b32.xlu1 %v1182_v22, %s13592_s12  ;;  %v853_v46 = vld [vmem:[%s9548_s21 + $0x1d8] sm:$0xff]  ;;  %v852_v22 = vld [vmem:[%s9548_s21 + $0x1d0] sm:$0xff]  ;;  %13687 = vst [vmem:[#allocation92_spill] sm:$0xff] %v10048_v43  ;;  %v1002_v21 = vadd.f32 %v938_v63, %v13690_v5  ;;  %v1126_v5 = vmul.f32 %v9809_v30, %v13692_v59 }
 0x278   : > { %1368 = vrot.lane.b32.xlu0 %v1185_v3, %s13592_s12  ;;  %1366 = vrot.lane.b32.xlu1 %v1184_v48, %s13592_s12  ;;  %v10032_v3 = vmul.f32 %v9804_v24, %v853_v46  ;;  %v10035_v48 = vmul.f32 %v9804_v24, %v852_v22  ;;  %v10053_v46 = vld [vmem:[%s13356_s8] ss:$0 sm:$0xff]  ;;  %v940_v22 = vmul.f32 %v9551_v12, %v9575_v34 }
 0x279   : > { %13688 = vst [vmem:[#allocation93_spill] sm:$0xff] %v10053_v46  ;;  %v10067_v46 = vmul.f32 %v9804_v24, %v854_v23  ;;  %v943_v23 = vmul.f32 %v9551_v12, %v9588_v0 }
 0x27a   : > { %v1189_v29 = vadd.f32 %v1125_v27, %v10032_v3  ;;  %v1188_v43 = vadd.f32 %v1124_v38, %v10035_v48  ;;  %v13691_v27 = vld [vmem:[#allocation69_spill] sm:$0xff] }
 0x27b   : > { %v1127_v63 = vmul.f32 %v9809_v30, %v13691_v27 }
 0x27c   : > { %1372 = vrot.lane.b32.xlu0 %v1187_v62, %s13592_s12  ;;  %1370 = vrot.lane.b32.xlu1 %v1186_v8, %s13592_s12  ;;  %v941_v8 = vmul.f32 %v9551_v12, %v9572_v9  ;;  %v13689_v62 = vld [vmem:[#allocation12_spill] sm:$0xff] }
 0x27d   : > { %v1003_v2 = vadd.f32 %v939_v54, %v13689_v62  ;;  %v856_v54 = vld [vmem:[%s9548_s21 + $0x1f0] sm:$0xff] }
 0x27e   : > { %v1261_v33 = vpop.permute.xlu0 %1260  ;;  %v1259_v18 = vpop.permute.xlu1 %1258  ;;  %v10091_v59 = vmul.f32 %v9804_v24, %v856_v54  ;;  %v944_v54 = vmul.f32 %v9551_v12, %v9607_v37  ;;  %v947_v37 = vmul.f32 %v9551_v12, %v9620_v14  ;;  %v948_v14 = vmul.f32 %v9551_v12, %v9639_v45 }
 0x27f   : > { %v1451_v9 = vsel %vm481_vm0, %v1003_v2, %v1261_v33  ;;  %v1450_v34 = vsel %vm481_vm0, %v1002_v21, %v1259_v18  ;;  %v942_v21 = vmul.f32 %v9551_v12, %v9591_v36  ;;  %v13693_v18 = vld [vmem:[#allocation14_spill] sm:$0xff]  ;;  %v13694_v2 = vld [vmem:[#allocation15_spill] sm:$0xff] }
 0x280   : > { %1597 = vst [vmem:[#allocation2 + $0x30] sm:$0xff] %v1451_v9  ;;  %1596 = vst [vmem:[#allocation2 + $0x28] sm:$0xff] %v1450_v34  ;;  %1376 = vrot.lane.b32.xlu0 %v1189_v29, %s13592_s12  ;;  %1374 = vrot.lane.b32.xlu1 %v1188_v43, %s13592_s12  ;;  %v1005_v33 = vadd.f32 %v941_v8, %v13693_v18  ;;  %v1004_v38 = vadd.f32 %v940_v22, %v13694_v2  ;;  %v13695_v8 = vld [vmem:[#allocation71_spill] sm:$0xff] }
 0x281   : > { %v1191_v43 = vadd.f32 %v1127_v63, %v10064_v60  ;;  %v1190_v9 = vadd.f32 %v1126_v5, %v10067_v46  ;;  %v10088_v34 = vmul.f32 %v9804_v24, %v857_v10  ;;  %v1129_v22 = vmul.f32 %v9809_v30, %v13695_v8  ;;  %v13696_v63 = vld [vmem:[#allocation72_spill] sm:$0xff] }
 0x282   : > { %v1265_v62 = vpop.permute.xlu0 %1264  ;;  %v1263_v29 = vpop.permute.xlu1 %1262  ;;  %v1128_v10 = vmul.f32 %v9809_v30, %v13696_v63  ;;  %v945_v24 = vmul.f32 %v9551_v12, %v9604_v35  ;;  %v13697_v5 = vld [vmem:[#allocation16_spill] sm:$0xff]  ;;  %v946_v35 = vmul.f32 %v9551_v12, %v9623_v40 }
 0x283   : > { %v1453_v0 = vsel %vm481_vm0, %v1005_v33, %v1265_v62  ;;  %v1452_v36 = vsel %vm481_vm0, %v1004_v38, %v1263_v29  ;;  %v1007_v18 = vadd.f32 %v943_v23, %v13697_v5  ;;  %v13698_v33 = vld [vmem:[#allocation17_spill] sm:$0xff]  ;;  %v1193_v29 = vadd.f32 %v1129_v22, %v10088_v34  ;;  %v13699_v23 = vld [vmem:[#allocation18_spill] sm:$0xff] }
 0x284   : > { %1599 = vst [vmem:[#allocation2 + $0x50] sm:$0xff] %v1453_v0  ;;  %1598 = vst [vmem:[#allocation2 + $0x48] sm:$0xff] %v1452_v36  ;;  %1380 = vrot.lane.b32.xlu0 %v1191_v43, %s13592_s12  ;;  %1378 = vrot.lane.b32.xlu1 %v1190_v9, %s13592_s12  ;;  %v1006_v2 = vadd.f32 %v942_v21, %v13698_v33  ;;  %v1192_v43 = vadd.f32 %v1128_v10, %v10091_v59  ;;  %v13700_v36 = vld [vmem:[#allocation19_spill] sm:$0xff] }
 0x285   : > { %v1009_v21 = vadd.f32 %v945_v24, %v13699_v23  ;;  %v1008_v22 = vadd.f32 %v944_v54, %v13700_v36  ;;  %v13703_v23 = vld [vmem:[#allocation22_spill] sm:$0xff] }
 0x286   : > { %v1269_v38 = vpop.permute.xlu0 %1268  ;;  %v1267_v62 = vpop.permute.xlu1 %1266 }
 0x287   : > { %v1455_v9 = vsel %vm481_vm0, %v1007_v18, %v1269_v38  ;;  %v1454_v0 = vsel %vm481_vm0, %v1006_v2, %v1267_v62  ;;  %v949_v2 = vmul.f32 %v9551_v12, %v9636_v19  ;;  %v13701_v38 = vld [vmem:[#allocation20_spill] sm:$0xff]  ;;  %v13702_v62 = vld [vmem:[#allocation21_spill] sm:$0xff]  ;;  %v950_v19 = vmul.f32 %v9551_v12, %v9655_v51 }
 0x288   : > { %1601 = vst [vmem:[#allocation2 + $0x70] sm:$0xff] %v1455_v9  ;;  %1600 = vst [vmem:[#allocation2 + $0x68] sm:$0xff] %v1454_v0  ;;  %1384 = vrot.lane.b32.xlu0 %v1193_v29, %s13592_s12  ;;  %1382 = vrot.lane.b32.xlu1 %v1192_v43, %s13592_s12  ;;  %v1011_v40 = vadd.f32 %v947_v37, %v13701_v38  ;;  %v1010_v24 = vadd.f32 %v946_v35, %v13702_v62  ;;  %s10343_s12 = scalar_lea.vmem [#allocation3], %s6738_s11 }
 0x289   : > { %v951_v0 = vmul.f32 %v9551_v12, %v9652_v16  ;;  %v1013_v45 = vadd.f32 %v949_v2, %v13703_v23  ;;  %v952_v16 = vmul.f32 %v9551_v12, %v9671_v53 }
 0x28a   : > { %v1273_v10 = vpop.permute.xlu0 %1272  ;;  %v1271_v5 = vpop.permute.xlu1 %1270 }
 0x28b   : > { %v1457_v18 = vsel %vm481_vm0, %v1009_v21, %v1273_v10  ;;  %v1456_v33 = vsel %vm481_vm0, %v1008_v22, %v1271_v5  ;;  %v13704_v21 = vld [vmem:[#allocation23_spill] sm:$0xff]  ;;  %v953_v5 = vmul.f32 %v9551_v12, %v9668_v32  ;;  %v954_v32 = vmul.f32 %v9551_v12, %v9687_v56 }
 0x28c   : > { %1603 = vst [vmem:[#allocation2 + $0x90] sm:$0xff] %v1457_v18  ;;  %1602 = vst [vmem:[#allocation2 + $0x88] sm:$0xff] %v1456_v33  ;;  %v1012_v37 = vadd.f32 %v948_v14, %v13704_v21  ;;  %v13705_v18 = vld [vmem:[#allocation24_spill] sm:$0xff]  ;;  %v13706_v33 = vld [vmem:[#allocation25_spill] sm:$0xff] }
 0x28d   : > { %v1015_v51 = vadd.f32 %v951_v0, %v13705_v18  ;;  %v1014_v2 = vadd.f32 %v950_v19, %v13706_v33  ;;  %v13709_v21 = vld [vmem:[#allocation28_spill] sm:$0xff]  ;;  %v13711_v18 = vld [vmem:[#allocation30_spill] sm:$0xff] }
 0x28e   : > { %v1277_v29 = vpop.permute.xlu0 %1276  ;;  %v1275_v54 = vpop.permute.xlu1 %1274 }
 0x28f   : > { %v1459_v43 = vsel %vm481_vm0, %v1011_v40, %v1277_v29  ;;  %v1458_v9 = vsel %vm481_vm0, %v1010_v24, %v1275_v54  ;;  %v955_v24 = vmul.f32 %v9551_v12, %v9684_v39  ;;  %v13707_v29 = vld [vmem:[#allocation26_spill] sm:$0xff]  ;;  %v13708_v54 = vld [vmem:[#allocation27_spill] sm:$0xff]  ;;  %v956_v39 = vmul.f32 %v9551_v12, %v9703_v61 }
 0x290   : > { %1605 = vst [vmem:[#allocation2 + $0xb0] sm:$0xff] %v1459_v43  ;;  %1604 = vst [vmem:[#allocation2 + $0xa8] sm:$0xff] %v1458_v9  ;;  %v1017_v53 = vadd.f32 %v953_v5, %v13707_v29  ;;  %v1016_v43 = vadd.f32 %v952_v16, %v13708_v54  ;;  %v959_v16 = vmul.f32 %v9551_v12, %v9716_v49 }
 0x291   : > { %v1019_v56 = vadd.f32 %v955_v24, %v13709_v21  ;;  %v960_v49 = vmul.f32 %v9551_v12, %v9735_v7  ;;  %v13713_v24 = vld [vmem:[#allocation32_spill] sm:$0xff] }
 0x292   : > { %v1281_v36 = vpop.permute.xlu0 %1280  ;;  %v1279_v35 = vpop.permute.xlu1 %1278 }
 0x293   : > { %v1461_v22 = vsel %vm481_vm0, %v1013_v45, %v1281_v36  ;;  %v1460_v10 = vsel %vm481_vm0, %v1012_v37, %v1279_v35  ;;  %v957_v45 = vmul.f32 %v9551_v12, %v9700_v41  ;;  %v13710_v37 = vld [vmem:[#allocation29_spill] sm:$0xff]  ;;  %v958_v41 = vmul.f32 %v9551_v12, %v9719_v4 }
 0x294   : > { %1607 = vst [vmem:[#allocation2 + $0xd0] sm:$0xff] %v1461_v22  ;;  %1606 = vst [vmem:[#allocation2 + $0xc8] sm:$0xff] %v1460_v10  ;;  %v1018_v36 = vadd.f32 %v954_v32, %v13710_v37  ;;  %v1023_v4 = vadd.f32 %v959_v16, %v13713_v24  ;;  %v13714_v32 = vld [vmem:[#allocation33_spill] sm:$0xff]  ;;  %v969_v24 = vmul.f32 %v9551_v12, %v9799_v28 }
 0x295   : > { %v1021_v61 = vadd.f32 %v957_v45, %v13711_v18  ;;  %v1022_v29 = vadd.f32 %v958_v41, %v13714_v32  ;;  %v13717_v45 = vld [vmem:[#allocation35_spill] sm:$0xff]  ;;  %v970_v28 = vmul.f32 %v9809_v30, %v9823_v11 }
 0x296   : > { %v1285_v38 = vpop.permute.xlu0 %1284  ;;  %v1283_v14 = vpop.permute.xlu1 %1282 }
 0x297   : > { %v1463_v40 = vsel %vm481_vm0, %v1015_v51, %v1285_v38  ;;  %v1462_v62 = vsel %vm481_vm0, %v1014_v2, %v1283_v14  ;;  %v13712_v51 = vld [vmem:[#allocation31_spill] sm:$0xff] }
 0x298   : > { %1609 = vst [vmem:[#allocation2 + $0xf0] sm:$0xff] %v1463_v40  ;;  %1608 = vst [vmem:[#allocation2 + $0xe8] sm:$0xff] %v1462_v62  ;;  %v1020_v33 = vadd.f32 %v956_v39, %v13712_v51  ;;  %v961_v62 = vmul.f32 %v9551_v12, %v9732_v52  ;;  %v1024_v39 = vadd.f32 %v960_v49, %v13717_v45  ;;  %v13724_v45 = vld [vmem:[#allocation42_spill] sm:$0xff] }
 0x29a   : > { %v1289_v9 = vpop.permute.xlu0 %1288  ;;  %v1287_v0 = vpop.permute.xlu1 %1286 }
 0x29b   : > { %v1465_v19 = vsel %vm481_vm0, %v1017_v53, %v1289_v9  ;;  %v1464_v23 = vsel %vm481_vm0, %v1016_v43, %v1287_v0  ;;  %v963_v0 = vmul.f32 %v9551_v12, %v9748_v55  ;;  %v964_v55 = vmul.f32 %v9551_v12, %v9767_v17 }
 0x29c   : > { %1611 = vst [vmem:[#allocation2 + $0x110] sm:$0xff] %v1465_v19  ;;  %1610 = vst [vmem:[#allocation2 + $0x108] sm:$0xff] %v1464_v23  ;;  %v13715_v19 = vld [vmem:[#allocation73_spill] sm:$0xff]  ;;  %v13716_v23 = vld [vmem:[#allocation34_spill] sm:$0xff] }
 0x29d   : > { %v962_v52 = vmul.f32 %v9551_v12, %v13715_v19  ;;  %v1025_v7 = vadd.f32 %v961_v62, %v13716_v23  ;;  %v973_v23 = vmul.f32 %v9809_v30, %v9836_v1  ;;  %v974_v1 = vmul.f32 %v9809_v30, %v9855_v50 }
 0x29e   : > { %v1293_v35 = vpop.permute.xlu0 %1292  ;;  %v1291_v22 = vpop.permute.xlu1 %1290 }
 0x29f   : > { %v1467_v10 = vsel %vm481_vm0, %v1019_v56, %v1293_v35  ;;  %v1466_v5 = vsel %vm481_vm0, %v1018_v36, %v1291_v22  ;;  %v965_v35 = vmul.f32 %v9551_v12, %v9764_v57  ;;  %v13718_v22 = vld [vmem:[#allocation36_spill] sm:$0xff]  ;;  %v966_v57 = vmul.f32 %v9551_v12, %v9785_v15 }
 0x2a0   : > { %1613 = vst [vmem:[#allocation2 + $0x130] sm:$0xff] %v1467_v10  ;;  %1612 = vst [vmem:[#allocation2 + $0x128] sm:$0xff] %v1466_v5  ;;  %v1027_v10 = vadd.f32 %v963_v0, %v13718_v22  ;;  %v13719_v5 = vld [vmem:[#allocation37_spill] sm:$0xff] }
 0x2a1   : > { %v1026_v16 = vadd.f32 %v962_v52, %v13719_v5  ;;  %v1029_v17 = vadd.f32 %v965_v35, %v9391_v26  ;;  %v1030_v26 = vadd.f32 %v966_v57, %v9401_v31  ;;  %v13725_v35 = vld [vmem:[#allocation43_spill] sm:$0xff] }
 0x2a2   : > { %v1297_v2 = vpop.permute.xlu0 %1296  ;;  %v1295_v38 = vpop.permute.xlu1 %1294 }
 0x2a3   : > { %v1469_v14 = vsel %vm481_vm0, %v1021_v61, %v1297_v2  ;;  %v1468_v40 = vsel %vm481_vm0, %v1020_v33, %v1295_v38  ;;  %v967_v33 = vmul.f32 %v9551_v12, %v9782_v25  ;;  %v13720_v2 = vld [vmem:[#allocation38_spill] sm:$0xff]  ;;  %v968_v25 = vmul.f32 %v9551_v12, %v9802_v20  ;;  %v13722_v20 = vld [vmem:[#allocation40_spill] sm:$0xff] }
 0x2a4   : > { %1615 = vst [vmem:[#allocation2 + $0x150] sm:$0xff] %v1469_v14  ;;  %1614 = vst [vmem:[#allocation2 + $0x148] sm:$0xff] %v1468_v40  ;;  %v1028_v38 = vadd.f32 %v964_v55, %v13720_v2  ;;  %v1033_v12 = vadd.f32 %v969_v24, %v9407_v42  ;;  %v1034_v42 = vadd.f32 %v970_v28, %v13724_v45  ;;  %v13726_v55 = vld [vmem:[#allocation44_spill] sm:$0xff]  ;;  %v13735_v28 = vld [vmem:[#allocation49_spill] sm:$0xff] }
 0x2a5   : > { %v13732_v24 = vld [vmem:[#allocation48_spill] sm:$0xff]  ;;  %v13739_v45 = vld [vmem:[#allocation51_spill] sm:$0xff] }
 0x2a6   : > { %v1301_v53 = vpop.permute.xlu0 %1300  ;;  %v1299_v54 = vpop.permute.xlu1 %1298 }
 0x2a7   : > { %v1471_v43 = vsel %vm481_vm0, %v1023_v4, %v1301_v53  ;;  %v1470_v9 = vsel %vm481_vm0, %v1022_v29, %v1299_v54  ;;  %v13721_v4 = vld [vmem:[#allocation39_spill] sm:$0xff] }
 0x2a8   : > { %1617 = vst [vmem:[#allocation2 + $0x170] sm:$0xff] %v1471_v43  ;;  %1616 = vst [vmem:[#allocation2 + $0x168] sm:$0xff] %v1470_v9  ;;  %v1031_v15 = vadd.f32 %v967_v33, %v13721_v4  ;;  %v971_v43 = vmul.f32 %v9809_v30, %v9820_v13  ;;  %v1032_v9 = vadd.f32 %v968_v25, %v13722_v20  ;;  %v13736_v20 = vld [vmem:[#allocation50_spill] sm:$0xff] }
 0x2a9   : > { %v972_v13 = vmul.f32 %v9809_v30, %v9839_v47  ;;  %v1037_v47 = vadd.f32 %v973_v23, %v13725_v35  ;;  %v13737_v23 = vld [vmem:[#allocation78_spill] sm:$0xff]  ;;  %v13741_v35 = vld [vmem:[#allocation80_spill] sm:$0xff] }
 0x2aa   : > { %v1305_v21 = vpop.permute.xlu0 %1304  ;;  %v1303_v56 = vpop.permute.xlu1 %1302 }
 0x2ab   : > { %v1473_v37 = vsel %vm481_vm0, %v1025_v7, %v1305_v21  ;;  %v1472_v36 = vsel %vm481_vm0, %v1024_v39, %v1303_v56  ;;  %v13723_v7 = vld [vmem:[#allocation41_spill] sm:$0xff]  ;;  %v1036_v22 = vadd.f32 %v972_v13, %v13726_v55  ;;  %v983_v13 = vmul.f32 %v9809_v30, %v13737_v23  ;;  %v13756_v23 = vld [vmem:[#allocation60_spill] sm:$0xff] }
 0x2ac   : > { %1619 = vst [vmem:[#allocation2 + $0x190] sm:$0xff] %v1473_v37  ;;  %1618 = vst [vmem:[#allocation2 + $0x188] sm:$0xff] %v1472_v36  ;;  %v1035_v11 = vadd.f32 %v971_v43, %v13723_v7  ;;  %v975_v36 = vmul.f32 %v9809_v30, %v9852_v6  ;;  %v976_v6 = vmul.f32 %v9809_v30, %v9871_v58  ;;  %v13738_v7 = vld [vmem:[#allocation79_spill] sm:$0xff]  ;;  %v13742_v55 = vld [vmem:[#allocation81_spill] sm:$0xff] }
 0x2ae   : > { %v1309_v41 = vpop.permute.xlu0 %1308  ;;  %v1307_v18 = vpop.permute.xlu1 %1306  ;;  %v1040_v25 = vadd.f32 %v976_v6, %v13732_v24  ;;  %v13749_v24 = vld [vmem:[#allocation84_spill] sm:$0xff] }
 0x2af   : > { %v1475_v61 = vsel %vm481_vm0, %v1027_v10, %v1309_v41  ;;  %v1474_v51 = vsel %vm481_vm0, %v1026_v16, %v1307_v18  ;;  %v977_v18 = vmul.f32 %v9809_v30, %v9868_v44 }
 0x2b0   : > { %1621 = vst [vmem:[#allocation2 + $0x1b0] sm:$0xff] %v1475_v61  ;;  %1620 = vst [vmem:[#allocation2 + $0x1a8] sm:$0xff] %v1474_v51  ;;  %v13727_v61 = vld [vmem:[#allocation45_spill] sm:$0xff]  ;;  %v13728_v51 = vld [vmem:[#allocation46_spill] sm:$0xff] }
 0x2b1   : > { %v1039_v50 = vadd.f32 %v975_v36, %v13727_v61  ;;  %v1038_v33 = vadd.f32 %v974_v1, %v13728_v51  ;;  %v13745_v51 = vld [vmem:[#allocation82_spill] sm:$0xff] }
 0x2b2   : > { %v1313_v14 = vpop.permute.xlu0 %1312  ;;  %v1311_v40 = vpop.permute.xlu1 %1310 }
 0x2b3   : > { %v1477_v62 = vsel %vm481_vm0, %v1029_v17, %v1313_v14  ;;  %v1476_v49 = vsel %vm481_vm0, %v1028_v38, %v1311_v40  ;;  %v13729_v14 = vld [vmem:[#allocation74_spill] sm:$0xff] }
 0x2b4   : > { %1623 = vst [vmem:[#allocation2 + $0x1d0] sm:$0xff] %v1477_v62  ;;  %1622 = vst [vmem:[#allocation2 + $0x1c8] sm:$0xff] %v1476_v49  ;;  %v979_v40 = vmul.f32 %v9809_v30, %v13729_v14  ;;  %v13730_v62 = vld [vmem:[#allocation75_spill] sm:$0xff]  ;;  %v13748_v14 = vld [vmem:[#allocation56_spill] sm:$0xff] }
 0x2b5   : > { %v978_v44 = vmul.f32 %v9809_v30, %v13730_v62  ;;  %v13731_v49 = vld [vmem:[#allocation47_spill] sm:$0xff] }
 0x2b6   : > { %v1317_v32 = vpop.permute.xlu0 %1316  ;;  %v1315_v29 = vpop.permute.xlu1 %1314  ;;  %v1041_v58 = vadd.f32 %v977_v18, %v13731_v49 }
 0x2b7   : > { %v1479_v53 = vsel %vm481_vm0, %v1031_v15, %v1317_v32  ;;  %v1478_v54 = vsel %vm481_vm0, %v1030_v26, %v1315_v29  ;;  %v13733_v29 = vld [vmem:[#allocation76_spill] sm:$0xff] }
 0x2b8   : > { %1625 = vst [vmem:[#allocation2 + $0x1f0] sm:$0xff] %v1479_v53  ;;  %1624 = vst [vmem:[#allocation2 + $0x1e8] sm:$0xff] %v1478_v54  ;;  %v981_v53 = vmul.f32 %v9809_v30, %v13733_v29  ;;  %v13734_v54 = vld [vmem:[#allocation77_spill] sm:$0xff]  ;;  %v13752_v29 = vld [vmem:[#allocation58_spill] sm:$0xff] }
 0x2b9   : > { %v980_v43 = vmul.f32 %v9809_v30, %v13734_v54 }
 0x2ba   : > { %v1321_v0 = vpop.permute.xlu0 %1320  ;;  %v1319_v31 = vpop.permute.xlu1 %1318 }
 0x2bb   : > { %v1481_v19 = vsel %vm481_vm0, %v1033_v12, %v1321_v0  ;;  %v1480_v52 = vsel %vm481_vm0, %v1032_v9, %v1319_v31  ;;  %v1043_v12 = vadd.f32 %v979_v40, %v13735_v28  ;;  %v1042_v9 = vadd.f32 %v978_v44, %v13736_v20  ;;  %v13753_v20 = vld [vmem:[#allocation86_spill] sm:$0xff] }
 0x2bc   : > { %1627 = vst [vmem:[#allocation2 + $0x210] sm:$0xff] %v1481_v19  ;;  %1626 = vst [vmem:[#allocation2 + $0x208] sm:$0xff] %v1480_v52 }
 0x2be   : > { %v1325_v39 = vpop.permute.xlu0 %1324  ;;  %v1323_v21 = vpop.permute.xlu1 %1322 }
 0x2bf   : > { %v1483_v56 = vsel %vm481_vm0, %v1035_v11, %v1325_v39  ;;  %v1482_v37 = vsel %vm481_vm0, %v1034_v42, %v1323_v21  ;;  %v982_v11 = vmul.f32 %v9809_v30, %v13738_v7  ;;  %v1045_v42 = vadd.f32 %v981_v53, %v13739_v45  ;;  %v13740_v39 = vld [vmem:[#allocation52_spill] sm:$0xff] }
 0x2c0   : > { %1629 = vst [vmem:[#allocation2 + $0x270] sm:$0xff] %v1483_v56  ;;  %1628 = vst [vmem:[#allocation2 + $0x268] sm:$0xff] %v1482_v37  ;;  %v1044_v21 = vadd.f32 %v980_v43, %v13740_v39  ;;  %v13757_v39 = vld [vmem:[#allocation88_spill] sm:$0xff] }
 0x2c2   : > { %v1329_v10 = vpop.permute.xlu0 %1328  ;;  %v1327_v5 = vpop.permute.xlu1 %1326 }
 0x2c3   : > { %v1485_v16 = vsel %vm481_vm0, %v1037_v47, %v1329_v10  ;;  %v1484_v41 = vsel %vm481_vm0, %v1036_v22, %v1327_v5  ;;  %v985_v47 = vmul.f32 %v9809_v30, %v13741_v35  ;;  %v984_v22 = vmul.f32 %v9809_v30, %v13742_v55  ;;  %v13743_v10 = vld [vmem:[#allocation53_spill] sm:$0xff]  ;;  %v13760_v35 = vld [vmem:[#allocation62_spill] sm:$0xff] }
 0x2c4   : > { %1631 = vst [vmem:[#allocation2 + $0x290] sm:$0xff] %v1485_v16  ;;  %1630 = vst [vmem:[#allocation2 + $0x288] sm:$0xff] %v1484_v41  ;;  %v1047_v5 = vadd.f32 %v983_v13, %v13743_v10  ;;  %v13744_v16 = vld [vmem:[#allocation54_spill] sm:$0xff] }
 0x2c5   : > { %v1046_v41 = vadd.f32 %v982_v11, %v13744_v16  ;;  %v1048_v40 = vadd.f32 %v984_v22, %v13748_v14  ;;  %v13761_v16 = vld [vmem:[#allocation90_spill] sm:$0xff]  ;;  %v997_v14 = vmul.f32 %v9809_v30, %v10032_v3  ;;  %v998_v3 = vmul.f32 %v9809_v30, %v10067_v46 }
 0x2c6   : > { %v1333_v57 = vpop.permute.xlu0 %1332  ;;  %v1331_v17 = vpop.permute.xlu1 %1330 }
 0x2c7   : > { %v1487_v2 = vsel %vm481_vm0, %v1039_v50, %v1333_v57  ;;  %v1486_v38 = vsel %vm481_vm0, %v1038_v33, %v1331_v17  ;;  %v987_v33 = vmul.f32 %v9809_v30, %v13745_v51  ;;  %v13746_v57 = vld [vmem:[#allocation83_spill] sm:$0xff]  ;;  %v13764_v51 = vld [vmem:[#allocation64_spill] sm:$0xff] }
 0x2c8   : > { %1633 = vst [vmem:[#allocation2 + $0x2b0] sm:$0xff] %v1487_v2  ;;  %1632 = vst [vmem:[#allocation2 + $0x2a8] sm:$0xff] %v1486_v38  ;;  %v986_v17 = vmul.f32 %v9809_v30, %v13746_v57  ;;  %v13747_v2 = vld [vmem:[#allocation55_spill] sm:$0xff] }
 0x2c9   : > { %v1049_v38 = vadd.f32 %v985_v47, %v13747_v2 }
 0x2ca   : > { %v1337_v4 = vpop.permute.xlu0 %1336  ;;  %v1335_v15 = vpop.permute.xlu1 %1334  ;;  %v1050_v53 = vadd.f32 %v986_v17, %v13752_v29  ;;  %v13768_v29 = vld [vmem:[#allocation68_spill] sm:$0xff] }
 0x2cb   : > { %v1489_v26 = vsel %vm481_vm0, %v1041_v58, %v1337_v4  ;;  %v1488_v32 = vsel %vm481_vm0, %v1040_v25, %v1335_v15  ;;  %v989_v25 = vmul.f32 %v9809_v30, %v13749_v24  ;;  %v13750_v4 = vld [vmem:[#allocation85_spill] sm:$0xff] }
 0x2cc   : > { %1635 = vst [vmem:[#allocation2 + $0x2d0] sm:$0xff] %v1489_v26  ;;  %1634 = vst [vmem:[#allocation2 + $0x2c8] sm:$0xff] %v1488_v32  ;;  %v988_v15 = vmul.f32 %v9809_v30, %v13750_v4  ;;  %v13751_v26 = vld [vmem:[#allocation57_spill] sm:$0xff] }
 0x2cd   : > { %v1051_v32 = vadd.f32 %v987_v33, %v13751_v26  ;;  %v999_v26 = vmul.f32 %v9809_v30, %v10064_v60  ;;  %v1000_v60 = vmul.f32 %v9809_v30, %v10091_v59 }
 0x2ce   : > { %v1341_v0 = vpop.permute.xlu0 %1340  ;;  %v1339_v31 = vpop.permute.xlu1 %1338  ;;  %v1052_v13 = vadd.f32 %v988_v15, %v13756_v23 }
 0x2cf   : > { %v1491_v19 = vsel %vm481_vm0, %v1043_v12, %v1341_v0  ;;  %v1490_v52 = vsel %vm481_vm0, %v1042_v9, %v1339_v31  ;;  %v991_v9 = vmul.f32 %v9809_v30, %v13753_v20  ;;  %v13754_v0 = vld [vmem:[#allocation87_spill] sm:$0xff]  ;;  %v1001_v20 = vmul.f32 %v9809_v30, %v10088_v34 }
 0x2d0   : > { %1637 = vst [vmem:[#allocation2 + $0x2f0] sm:$0xff] %v1491_v19  ;;  %1636 = vst [vmem:[#allocation2 + $0x2e8] sm:$0xff] %v1490_v52  ;;  %v990_v31 = vmul.f32 %v9809_v30, %v13754_v0  ;;  %v13755_v19 = vld [vmem:[#allocation59_spill] sm:$0xff]  ;;  %v1063_v46 = vadd.f32 %v999_v26, %v13691_v27  ;;  %v1064_v34 = vadd.f32 %v1000_v60, %v13696_v63 }
 0x2d1   : > { %v1053_v52 = vadd.f32 %v989_v25, %v13755_v19 }
 0x2d2   : > { %v1345_v56 = vpop.permute.xlu0 %1344  ;;  %v1343_v37 = vpop.permute.xlu1 %1342  ;;  %v1054_v47 = vadd.f32 %v990_v31, %v13760_v35 }
 0x2d3   : > { %v1493_v36 = vsel %vm481_vm0, %v1045_v42, %v1345_v56  ;;  %v1492_v1 = vsel %vm481_vm0, %v1044_v21, %v1343_v37  ;;  %v993_v21 = vmul.f32 %v9809_v30, %v13757_v39  ;;  %v13758_v56 = vld [vmem:[#allocation89_spill] sm:$0xff] }
 0x2d4   : > { %1639 = vst [vmem:[#allocation2 + $0x310] sm:$0xff] %v1493_v36  ;;  %1638 = vst [vmem:[#allocation2 + $0x308] sm:$0xff] %v1492_v1  ;;  %v992_v37 = vmul.f32 %v9809_v30, %v13758_v56  ;;  %v13759_v36 = vld [vmem:[#allocation61_spill] sm:$0xff] }
 0x2d5   : > { %v1055_v1 = vadd.f32 %v991_v9, %v13759_v36  ;;  %v13769_v9 = vld [vmem:[#allocation70_spill] sm:$0xff] }
 0x2d6   : > { %v1349_v18 = vpop.permute.xlu0 %1348  ;;  %v1347_v6 = vpop.permute.xlu1 %1346  ;;  %v1056_v33 = vadd.f32 %v992_v37, %v13764_v51  ;;  %v1062_v0 = vadd.f32 %v998_v3, %v13769_v9 }
 0x2d7   : > { %v1495_v61 = vsel %vm481_vm0, %v1047_v5, %v1349_v18  ;;  %v1494_v50 = vsel %vm481_vm0, %v1046_v41, %v1347_v6  ;;  %v995_v41 = vmul.f32 %v9809_v30, %v13761_v16  ;;  %v13762_v18 = vld [vmem:[#allocation91_spill] sm:$0xff] }
 0x2d8   : > { %1641 = vst [vmem:[#allocation2 + $0x330] sm:$0xff] %v1495_v61  ;;  %1640 = vst [vmem:[#allocation2 + $0x328] sm:$0xff] %v1494_v50  ;;  %v994_v6 = vmul.f32 %v9809_v30, %v13762_v18  ;;  %v13763_v61 = vld [vmem:[#allocation63_spill] sm:$0xff] }
 0x2d9   : > { %v1057_v50 = vadd.f32 %v993_v21, %v13763_v61 }
 0x2da   : > { %v1353_v62 = vpop.permute.xlu0 %1352  ;;  %v1351_v44 = vpop.permute.xlu1 %1350 }
 0x2db   : > { %v1497_v49 = vsel %vm481_vm0, %v1049_v38, %v1353_v62  ;;  %v1496_v58 = vsel %vm481_vm0, %v1048_v40, %v1351_v44  ;;  %v996_v40 = vmul.f32 %v9809_v30, %v10035_v48  ;;  %v13765_v62 = vld [vmem:[#allocation65_spill] sm:$0xff] }
 0x2dc   : > { %1643 = vst [vmem:[#allocation2 + $0x350] sm:$0xff] %v1497_v49  ;;  %1642 = vst [vmem:[#allocation2 + $0x348] sm:$0xff] %v1496_v58  ;;  %v1059_v44 = vadd.f32 %v995_v41, %v13765_v62  ;;  %v13766_v49 = vld [vmem:[#allocation66_spill] sm:$0xff] }
 0x2dd   : > { %v1058_v58 = vadd.f32 %v994_v6, %v13766_v49 }
 0x2de   : > { %v1357_v54 = vpop.permute.xlu0 %1356  ;;  %v1355_v43 = vpop.permute.xlu1 %1354 }
 0x2df   : > { %v1499_v28 = vsel %vm481_vm0, %v1051_v32, %v1357_v54  ;;  %v1498_v12 = vsel %vm481_vm0, %v1050_v53, %v1355_v43  ;;  %v13767_v32 = vld [vmem:[#allocation67_spill] sm:$0xff]  ;;  %v1060_v53 = vadd.f32 %v996_v40, %v13768_v29 }
 0x2e0   : > { %1645 = vst [vmem:[#allocation2 + $0x370] sm:$0xff] %v1499_v28  ;;  %1644 = vst [vmem:[#allocation2 + $0x368] sm:$0xff] %v1498_v12  ;;  %v1061_v48 = vadd.f32 %v997_v14, %v13767_v32 }
 0x2e2   : > { %v1361_v7 = vpop.permute.xlu0 %1360  ;;  %v1359_v11 = vpop.permute.xlu1 %1358 }
 0x2e3   : > { %v1501_v45 = vsel %vm481_vm0, %v1053_v52, %v1361_v7  ;;  %v1500_v42 = vsel %vm481_vm0, %v1052_v13, %v1359_v11  ;;  %v1065_v13 = vadd.f32 %v1001_v20, %v13695_v8 }
 0x2e4   : > { %1647 = vst [vmem:[#allocation2 + $0x390] sm:$0xff] %v1501_v45  ;;  %1646 = vst [vmem:[#allocation2 + $0x388] sm:$0xff] %v1500_v42 }
 0x2e6   : > { %v1365_v55 = vpop.permute.xlu0 %1364  ;;  %v1363_v22 = vpop.permute.xlu1 %1362 }
 0x2e7   : > { %v1503_v10 = vsel %vm481_vm0, %v1055_v1, %v1365_v55  ;;  %v1502_v5 = vsel %vm481_vm0, %v1054_v47, %v1363_v22 }
 0x2e8   : > { %1649 = vst [vmem:[#allocation2 + $0x3b0] sm:$0xff] %v1503_v10  ;;  %1648 = vst [vmem:[#allocation2 + $0x3a8] sm:$0xff] %v1502_v5 }
 0x2ea   : > { %v1369_v57 = vpop.permute.xlu0 %1368  ;;  %v1367_v17 = vpop.permute.xlu1 %1366 }
 0x2eb   : > { %v1505_v2 = vsel %vm481_vm0, %v1057_v50, %v1369_v57  ;;  %v1504_v38 = vsel %vm481_vm0, %v1056_v33, %v1367_v17 }
 0x2ec   : > { %1651 = vst [vmem:[#allocation2 + $0x3d0] sm:$0xff] %v1505_v2  ;;  %1650 = vst [vmem:[#allocation2 + $0x3c8] sm:$0xff] %v1504_v38 }
 0x2ee   : > { %v1373_v24 = vpop.permute.xlu0 %1372  ;;  %v1371_v25 = vpop.permute.xlu1 %1370 }
 0x2ef   : > { %v1507_v4 = vsel %vm481_vm0, %v1059_v44, %v1373_v24  ;;  %v1506_v15 = vsel %vm481_vm0, %v1058_v58, %v1371_v25 }
 0x2f0   : > { %1653 = vst [vmem:[#allocation2 + $0x3f0] sm:$0xff] %v1507_v4  ;;  %1652 = vst [vmem:[#allocation2 + $0x3e8] sm:$0xff] %v1506_v15 }
 0x2f2   : > { %v1377_v54 = vpop.permute.xlu0 %1376  ;;  %v1375_v43 = vpop.permute.xlu1 %1374 }
 0x2f3   : > { %v1509_v28 = vsel %vm481_vm0, %v1061_v48, %v1377_v54  ;;  %v1508_v12 = vsel %vm481_vm0, %v1060_v53, %v1375_v43 }
 0x2f4   : > { %1655 = vst [vmem:[#allocation2 + $0x410] sm:$0xff] %v1509_v28  ;;  %1654 = vst [vmem:[#allocation2 + $0x408] sm:$0xff] %v1508_v12 }
 0x2f6   : > { %v1381_v31 = vpop.permute.xlu0 %1380  ;;  %v1379_v19 = vpop.permute.xlu1 %1378 }
 0x2f7   : > { %v1511_v52 = vsel %vm481_vm0, %v1063_v46, %v1381_v31  ;;  %v1510_v23 = vsel %vm481_vm0, %v1062_v0, %v1379_v19 }
 0x2f8   : > { %1657 = vst [vmem:[#allocation2 + $0x430] sm:$0xff] %v1511_v52  ;;  %1656 = vst [vmem:[#allocation2 + $0x428] sm:$0xff] %v1510_v23 }
 0x2fa   : > { %v1385_v7 = vpop.permute.xlu0 %1384  ;;  %v1383_v11 = vpop.permute.xlu1 %1382 }
 0x2fb   : > { %v1513_v30 = vsel %vm481_vm0, %v1065_v13, %v1385_v7  ;;  %v1512_v27 = vsel %vm481_vm0, %v1064_v34, %v1383_v11 }
 0x2fc   : > { %1659 = vst [vmem:[#allocation2 + $0x450] sm:$0xff] %v1513_v30  ;;  %1658 = vst [vmem:[#allocation2 + $0x448] sm:$0xff] %v1512_v27 }
 0x2fd LB: >> { %v1778_v59 = vld [vmem:[%s13354_s6 + $0x80] sm:$0xff]  ;;  %v1779_v8 = vld [vmem:[%s13354_s6 + $0x88] sm:$0xff]  ;;  %v1780_v39 = vld [vmem:[%s13354_s6 + $0x90] sm:$0xff]  ;;  %s1696_s26 = smul.u32 576, %s8874_s18  ;;  %vm5643_vm12 = vcmask 1041409   ;;  %vm5645_vm13 = vcmask 1042434   ;;  %s12650_s2 = scalar_lea.vmem %s9254_s20, %s8874_s18 [#allocation5]  ;;  %s8874_s18 = sphi %s10345_s18, %s1695_s18  }
 0x2fe   : >> { %v2888_v63 = vld [vmem:[%s13354_s6 + $0x200] sm:$0xff]  ;;  %v8143_v45 = vpack.c.bf16 %v1779_v8, %v1778_v59  ;;  %v2889_v42 = vld [vmem:[%s13354_s6 + $0x208] sm:$0xff]  ;;  %v1781_v21 = vld [vmem:[%s13354_s6 + $0x98] sm:$0xff]  ;;  %vm5647_vm15 = vcmask 1043459   ;;  %s6944_s29 = sshll.u32 %s8874_s18, 7  ;;  %s1695_s18 = sadd.s32 1, %s8874_s18  }
 0x2ff   : >> { %v10368_v56 = vpack.c.bf16 %v2889_v42, %v2888_v63  ;;  %v8147_v37 = vpack.c.bf16 %v1781_v21, %v1780_v39  ;;  %v2890_v36 = vld [vmem:[%s13354_s6 + $0x210] sm:$0xff]  ;;  %v2891_v1 = vld [vmem:[%s13354_s6 + $0x218] sm:$0xff]  ;;  %v1782_v35 = vld [vmem:[%s13354_s6 + $0xa0] sm:$0xff]  ;;  %s10418_s1 = scalar_lea.vmem [#allocation2], %s1696_s26  ;;  %s12783_s21 = scalar_lea.vmem %s10343_s12, %s6944_s29 [#allocation3] }
 0x300   : >> { %8144 = vmatprep.subr.bf16.mxu1 %v8143_v45  ;;  %v10379_v47 = vpack.c.bf16 %v2891_v1, %v2890_v36  ;;  %v1783_v55 = vld [vmem:[%s13354_s6 + $0xa8] sm:$0xff]  ;;  %v2892_v22 = vld [vmem:[%s13354_s6 + $0x220] sm:$0xff]  ;;  %v1784_v41 = vld [vmem:[%s13354_s6 + $0xb0] sm:$0xff]  ;;  %p1692_p11 = scmp.ge.s32.totalorder %s1695_s18, 2  }
 0x301   : >> { %v2893_v10 = vld [vmem:[%s13354_s6 + $0x228] sm:$0xff]  ;;  %8272 = vmatprep.subr.bf16.mxu0 %v10368_v56  ;;  %8146 = vmatpush3.bf16.msra.mxu1 %v8143_v45  ;;  %v8151_v5 = vpack.c.bf16 %v1783_v55, %v1782_v35  ;;  %v1785_v18 = vld [vmem:[%s13354_s6 + $0xb8] sm:$0xff]  ;;  %v2894_v6 = vld [vmem:[%s13354_s6 + $0x230] sm:$0xff]  ;;  %s6957_s25 = sshll.u32 (%p1692_p11), %s8963_s17, 12  ;;  %s6578_s0 = sshll.u32 (%p1692_p11), %s10343_s12, 4  ;;  %s13272_s0 = int_to_ptr.vmem [resolvable:$true] %s6578_s0 }
 0x302   : >> { %13770 = vst [vmem:[#allocation94_spill] sm:$0xff] %v10379_v47  ;;  %8274 = vmatpush3.bf16.msra.mxu0 %v10368_v56  ;;  %8148 = vmatprep.subr.bf16.mxu1 %v8147_v37  ;;  %v10394_v16 = vpack.c.bf16 %v2893_v10, %v2892_v22  ;;  %v2895_v61 = vld [vmem:[%s13354_s6 + $0x238] sm:$0xff]  ;;  %v8155_v50 = vpack.c.bf16 %v1785_v18, %v1784_v41  ;;  %v1786_v33 = vld [vmem:[%s13354_s6 + $0xc0] sm:$0xff]  ;;  %v1787_v57 = vld [vmem:[%s13354_s6 + $0xc8] sm:$0xff]  ;;  %s13269_s30 = scalar_lea.hbm (%p1692_p11), %s13357_s9, %s6957_s25  ;;  %s6559_s11 = scalar_lea.sflag (%p1692_p11), [#allocation4], %s9233_s28 }
 0x303   : >> { %8276 = vmatprep.subr.bf16.mxu0 %v10379_v47  ;;  %v10410_v51 = vpack.c.bf16 %v2895_v61, %v2894_v6  ;;  %v1746_v17 = vld [vmem:[%s10418_s1 + $0x8] sm:$0xff]  ;;  %v2896_v2 = vld [vmem:[%s13354_s6 + $0x240] sm:$0xff]  ;;  %v8159_v40 = vpack.c.bf16 %v1787_v57, %v1786_v33  ;;  %v1788_v44 = vld [vmem:[%s13354_s6 + $0xd0] sm:$0xff]  ;;  %s8881_s18 = smov (%p1692_p11), [#allocation3]  }
 0x304   : >> { %13771 = vst [vmem:[#allocation95_spill] sm:$0xff] %v10394_v16  ;;  %v2897_v38 = vld [vmem:[%s13354_s6 + $0x248] sm:$0xff]  ;;  %7423 = vmatprep.mubr.f32.mxu1 %v1746_v17  ;;  %v1789_v49 = vld [vmem:[%s13354_s6 + $0xd8] sm:$0xff]  ;;  %v2898_v58 = vld [vmem:[%s13354_s6 + $0x250] sm:$0xff] }
 0x305   : >> { %8150 = vmatpush3.bf16.msra.mxu1 %v8147_v37  ;;  %13772 = vst [vmem:[#allocation96_spill] sm:$0xff] %v10410_v51  ;;  %v10428_v14 = vld [vmem:[%s10418_s1 + $0x28] sm:$0xff]  ;;  %v10433_v62 = vpack.c.bf16 %v2897_v38, %v2896_v2  ;;  %v2899_v24 = vld [vmem:[%s13354_s6 + $0x258] sm:$0xff]  ;;  %v8163_v25 = vpack.c.bf16 %v1789_v49, %v1788_v44  ;;  %v1790_v15 = vld [vmem:[%s13354_s6 + $0xe0] sm:$0xff] }
 0x306   : >> { %8278 = vmatpush3.bf16.msra.mxu0 %v10379_v47  ;;  %8152 = vmatprep.subr.bf16.mxu1 %v8151_v5  ;;  %v10449_v4 = vpack.c.bf16 %v2899_v24, %v2898_v58  ;;  %v1791_v26 = vld [vmem:[%s13354_s6 + $0xe8] sm:$0xff]  ;;  %v2900_v3 = vld [vmem:[%s13354_s6 + $0x260] sm:$0xff]  ;;  %v1792_v53 = vld [vmem:[%s13354_s6 + $0xf0] sm:$0xff] }
 0x307   : >> { %8280 = vmatprep.subr.bf16.mxu0 %v10394_v16  ;;  %7743 = vmatprep.mubr.f32.mxu0 %v10428_v14  ;;  %13773 = vst [vmem:[#allocation97_spill] sm:$0xff] %v10433_v62  ;;  %v2901_v32 = vld [vmem:[%s13354_s6 + $0x268] sm:$0xff]  ;;  %v8167_v48 = vpack.c.bf16 %v1791_v26, %v1790_v15  ;;  %v1793_v54 = vld [vmem:[%s13354_s6 + $0xf8] sm:$0xff]  ;;  %v2902_v43 = vld [vmem:[%s13354_s6 + $0x270] sm:$0xff] }
 0x308   : >> { %13774 = vst [vmem:[#allocation98_spill] sm:$0xff] %v10449_v4  ;;  %v10465_v29 = vpack.c.bf16 %v2901_v32, %v2900_v3  ;;  %v2903_v28 = vld [vmem:[%s13354_s6 + $0x278] sm:$0xff]  ;;  %v8171_v12 = vpack.c.bf16 %v1793_v54, %v1792_v53  ;;  %v1730_v60 = vld [vmem:[%s13354_s6] sm:$0xff]  ;;  %v1731_v46 = vld [vmem:[%s13354_s6 + $0x8] sm:$0xff] }
 0x309   : >> { %8154 = vmatpush3.bf16.msra.mxu1 %v8151_v5  ;;  %v10481_v20 = vpack.c.bf16 %v2903_v28, %v2902_v43  ;;  %v3193_v9 = vld [vmem:[%s13354_s6 + $0x280] sm:$0xff]  ;;  %v3194_v0 = vld [vmem:[%s13354_s6 + $0x288] sm:$0xff]  ;;  %v8175_v31 = vpack.c.bf16 %v1731_v46, %v1730_v60  ;;  %v3195_v52 = vld [vmem:[%s13354_s6 + $0x290] sm:$0xff] }
 0x30a   : >> { %8282 = vmatpush3.bf16.msra.mxu0 %v10394_v16  ;;  %8156 = vmatprep.subr.bf16.mxu1 %v8155_v50  ;;  %13775 = vst [vmem:[#allocation99_spill] sm:$0xff] %v10465_v29  ;;  %v8303_v19 = vpack.c.bf16 %v3194_v0, %v3193_v9  ;;  %v3196_v23 = vld [vmem:[%s13354_s6 + $0x298] sm:$0xff]  ;;  %v1747_v13 = vld [vmem:[%s10418_s1 + $0x10] sm:$0xff]  ;;  %v6784_v27 = vld [vmem:[%s10418_s1 + $0x48] sm:$0xff] }
 0x30b   : >> { %8284 = vmatprep.subr.bf16.mxu0 %v10410_v51  ;;  %13776 = vst [vmem:[#allocation100_spill] sm:$0xff] %v10481_v20  ;;  %v1732_v34 = vld [vmem:[%s13354_s6 + $0x10] sm:$0xff]  ;;  %v1733_v7 = vld [vmem:[%s13354_s6 + $0x18] sm:$0xff]  ;;  %v8307_v30 = vpack.c.bf16 %v3196_v23, %v3195_v52  ;;  %v3197_v8 = vld [vmem:[%s13354_s6 + $0x2a0] sm:$0xff] }
 0x30c   : >> { %v6783_v11 = vld [vmem:[%s10418_s1 + $0x30] sm:$0xff]  ;;  %v8179_v59 = vpack.c.bf16 %v1733_v7, %v1732_v34  ;;  %v3198_v63 = vld [vmem:[%s13354_s6 + $0x2a8] sm:$0xff]  ;;  %v1734_v45 = vld [vmem:[%s13354_s6 + $0x20] sm:$0xff] }
 0x30d   : >> { %8158 = vmatpush3.bf16.msra.mxu1 %v8155_v50  ;;  %v1735_v42 = vld [vmem:[%s13354_s6 + $0x28] sm:$0xff]  ;;  %v6785_v39 = vld [vmem:[%s10418_s1 + $0x50] sm:$0xff]  ;;  %v8311_v37 = vpack.c.bf16 %v3198_v63, %v3197_v8  ;;  %v3200_v1 = vld [vmem:[%s13354_s6 + $0x2b8] sm:$0xff] }
 0x30e   : >> { %8286 = vmatpush3.bf16.msra.mxu0 %v10410_v51  ;;  %8160 = vmatprep.subr.bf16.mxu1 %v8159_v40  ;;  %v6786_v21 = vld [vmem:[%s10418_s1 + $0x68] sm:$0xff]  ;;  %v3199_v36 = vld [vmem:[%s13354_s6 + $0x2b0] sm:$0xff]  ;;  %v8183_v35 = vpack.c.bf16 %v1735_v42, %v1734_v45  ;;  %v1737_v22 = vld [vmem:[%s13354_s6 + $0x38] sm:$0xff] }
 0x30f   : >> { %8288 = vmatprep.subr.bf16.mxu0 %v10433_v62  ;;  %v1736_v55 = vld [vmem:[%s13354_s6 + $0x30] sm:$0xff]  ;;  %v6788_v5 = vld [vmem:[%s10418_s1 + $0x88] sm:$0xff]  ;;  %v8315_v41 = vpack.c.bf16 %v3200_v1, %v3199_v36  ;;  %v3201_v18 = vld [vmem:[%s13354_s6 + $0x2c0] sm:$0xff] }
 0x310   : >> { %v6787_v10 = vld [vmem:[%s10418_s1 + $0x70] sm:$0xff]  ;;  %v3202_v6 = vld [vmem:[%s13354_s6 + $0x2c8] sm:$0xff]  ;;  %v8187_v61 = vpack.c.bf16 %v1737_v22, %v1736_v55  ;;  %v1738_v50 = vld [vmem:[%s13354_s6 + $0x40] sm:$0xff] }
 0x311   : >> { %8162 = vmatpush3.bf16.msra.mxu1 %v8159_v40  ;;  %v1739_v33 = vld [vmem:[%s13354_s6 + $0x48] sm:$0xff]  ;;  %v6789_v57 = vld [vmem:[%s10418_s1 + $0x90] sm:$0xff]  ;;  %v8319_v2 = vpack.c.bf16 %v3202_v6, %v3201_v18  ;;  %v1741_v49 = vld [vmem:[%s13354_s6 + $0x58] sm:$0xff] }
 0x312   : >> { %8290 = vmatpush3.bf16.msra.mxu0 %v10433_v62  ;;  %8164 = vmatprep.subr.bf16.mxu1 %v8163_v25  ;;  %v6790_v17 = vld [vmem:[%s10418_s1 + $0xa8] sm:$0xff]  ;;  %v3203_v38 = vld [vmem:[%s13354_s6 + $0x2d0] sm:$0xff]  ;;  %v8191_v40 = vpack.c.bf16 %v1739_v33, %v1738_v50  ;;  %v3205_v15 = vld [vmem:[%s13354_s6 + $0x2e0] sm:$0xff] }
 0x313   : >> { %8292 = vmatprep.subr.bf16.mxu0 %v10449_v4  ;;  %v1740_v44 = vld [vmem:[%s13354_s6 + $0x50] sm:$0xff]  ;;  %v10570_v24 = vld [vmem:[%s10418_s1 + $0xc8] sm:$0xff]  ;;  %v1742_v32 = vld [vmem:[%s13354_s6 + $0x60] sm:$0xff] }
 0x314   : >> { %v6791_v58 = vld [vmem:[%s10418_s1 + $0xb0] sm:$0xff]  ;;  %v3206_v26 = vld [vmem:[%s13354_s6 + $0x2e8] sm:$0xff]  ;;  %v8195_v3 = vpack.c.bf16 %v1741_v49, %v1740_v44  ;;  %v1745_v9 = vld [vmem:[%s13354_s6 + $0x78] sm:$0xff] }
 0x315   : >> { %8166 = vmatpush3.bf16.msra.mxu1 %v8163_v25  ;;  %v6793_v53 = vld [vmem:[%s10418_s1 + $0xd0] sm:$0xff]  ;;  %v6794_v54 = vld [vmem:[%s10418_s1 + $0xe8] sm:$0xff]  ;;  %v8327_v43 = vpack.c.bf16 %v3206_v26, %v3205_v15  ;;  %v3500_v52 = vld [vmem:[%s13354_s6 + $0x300] sm:$0xff] }
 0x316   : >> { %8294 = vmatpush3.bf16.msra.mxu0 %v10449_v4  ;;  %8168 = vmatprep.subr.bf16.mxu1 %v8167_v48  ;;  %v3207_v28 = vld [vmem:[%s13354_s6 + $0x2f0] sm:$0xff]  ;;  %v3501_v23 = vld [vmem:[%s13354_s6 + $0x308] sm:$0xff]  ;;  %v2276_v34 = vld [vmem:[%s13354_s6 + $0x100] sm:$0xff] }
 0x317   : >> { %8296 = vmatprep.subr.bf16.mxu0 %v10465_v29  ;;  %v1744_v46 = vld [vmem:[%s13354_s6 + $0x70] sm:$0xff]  ;;  %v2277_v7 = vld [vmem:[%s13354_s6 + $0x108] sm:$0xff]  ;;  %v3503_v8 = vld [vmem:[%s13354_s6 + $0x318] sm:$0xff] }
 0x318   : >> { %v6795_v0 = vld [vmem:[%s10418_s1 + $0xf0] sm:$0xff]  ;;  %v10629_v63 = vpack.c.bf16 %v2277_v7, %v2276_v34  ;;  %v10638_v42 = vld [vmem:[%s10418_s1 + $0x128] sm:$0xff]  ;;  %v3805_v34 = vld [vmem:[%s13354_s6 + $0x380] sm:$0xff] }
 0x319   : >> { %8170 = vmatpush3.bf16.msra.mxu1 %v8167_v48  ;;  %v1743_v48 = vld [vmem:[%s13354_s6 + $0x68] sm:$0xff]  ;;  %v10635_v45 = vld [vmem:[%s10418_s1 + $0x31] sm:$0xff]  ;;  %v2288_v4 = vld [vmem:[%s13354_s6 + $0x160] sm:$0xff] }
 0x31a   : >> { %8298 = vmatpush3.bf16.msra.mxu0 %v10465_v29  ;;  %8172 = vmatprep.subr.bf16.mxu1 %v8171_v12  ;;  %v8199_v60 = vpack.c.bf16 %v1743_v48, %v1742_v32  ;;  %v3505_v36 = vld [vmem:[%s13354_s6 + $0x328] sm:$0xff]  ;;  %v10654_v1 = vld [vmem:[%s10418_s1 + $0x130] sm:$0xff]  ;;  %v3512_v48 = vld [vmem:[%s13354_s6 + $0x360] sm:$0xff] }
 0x31b   : >> { %8300 = vmatprep.subr.bf16.mxu0 %v10481_v20  ;;  %v10661_v55 = vld [vmem:[%s10418_s1 + $0x148] sm:$0xff]  ;;  %v10676_v18 = vld [vmem:[%s10418_s1 + $0x150] sm:$0xff]  ;;  %v3808_v47 = vld [vmem:[%s13354_s6 + $0x398] sm:$0xff] }
 0x31c   : >> { %v10664_v22 = vld [vmem:[%s10418_s1 + $0x69] sm:$0xff]  ;;  %v10680_v6 = vld [vmem:[%s10418_s1 + $0x71] sm:$0xff] }
 0x31d   : >> { %8174 = vmatpush3.bf16.msra.mxu1 %v8171_v12  ;;  %v3208_v12 = vld [vmem:[%s13354_s6 + $0x2f8] sm:$0xff]  ;;  %v10686_v50 = vld [vmem:[%s10418_s1 + $0x89] sm:$0xff] }
 0x31e   : >> { %8302 = vmatpush3.bf16.msra.mxu0 %v10481_v20  ;;  %8176 = vmatprep.subr.bf16.mxu1 %v8175_v31  ;;  %v3510_v49 = vld [vmem:[%s13354_s6 + $0x350] sm:$0xff]  ;;  %v10727_v26 = vld [vmem:[%s10418_s1 + $0x1a8] sm:$0xff]  ;;  %v2287_v20 = vld [vmem:[%s13354_s6 + $0x158] sm:$0xff] }
 0x31f   : >> { %8304 = vmatprep.subr.bf16.mxu0 %v8303_v19  ;;  %v10724_v15 = vld [vmem:[%s10418_s1 + $0xb1] sm:$0xff]  ;;  %13781 = vst [vmem:[#allocation105_spill] sm:$0xff] %v10727_v26  ;;  %v3806_v7 = vld [vmem:[%s13354_s6 + $0x388] sm:$0xff] }
 0x320   : >> { %7424 = vmatmul.mubr.f32.vlgmr.msra.gmra.mrb[0].mxu1 %v1747_v13  ;;  %v8203_v13 = vpack.c.bf16 %v1745_v9, %v1744_v46  ;;  %v3514_v46 = vld [vmem:[%s13354_s6 + $0x370] sm:$0xff]  ;;  %v3515_v9 = vld [vmem:[%s13354_s6 + $0x378] sm:$0xff]  ;;  %v2584_v16 = vld [vmem:[%s13354_s6 + $0x188] sm:$0xff] }
 0x321   : >> { %7744 = vmatmul.mubr.f32.vlgmr.msra.gmra.mrb[0].mxu0 %v6783_v11  ;;  %8178 = vmatpush3.bf16.msra.mxu1 %v8175_v31  ;;  %v10602_v31 = vld [vmem:[%s10418_s1 + $0x108] sm:$0xff] }
 0x322   : >> { %8306 = vmatpush3.bf16.msra.mxu0 %v8303_v19  ;;  %7426 = vmatprep.mubr.f32.mxu1 %v10428_v14  ;;  %v3204_v14 = vld [vmem:[%s13354_s6 + $0x2d8] sm:$0xff]  ;;  %v8331_v19 = vpack.c.bf16 %v3208_v12, %v3207_v28  ;;  %v10749_v28 = vld [vmem:[%s10418_s1 + $0x1c8] sm:$0xff] }
 0x323   : >> { %7746 = vmatprep.mubr.f32.mxu0 %v6784_v27  ;;  %8308 = vmatprep.subr.bf16.mxu0 %v8307_v30  ;;  %v8323_v25 = vpack.c.bf16 %v3204_v14, %v3203_v38  ;;  %v10702_v38 = vld [vmem:[%s10418_s1 + $0x91] sm:$0xff]  ;;  %v10705_v14 = vld [vmem:[%s10418_s1 + $0x188] sm:$0xff]  ;;  %13783 = vst [vmem:[#allocation107_spill] sm:$0xff] %v10749_v28 }
 0x324   : >> { %7427 = vmatmul.mubr.f32.gmra.mrb[2].mxu1 %v6783_v11  ;;  %8180 = vmatprep.subr.bf16.mxu1 %v8179_v59  ;;  %v10618_v11 = vld [vmem:[%s10418_s1 + $0x110] sm:$0xff]  ;;  %13779 = vst [vmem:[#allocation103_spill] sm:$0xff] %v10705_v14 }
 0x325   : >> { %7747 = vmatmul.mubr.f32.gmra.mrb[2].mxu0 %v6785_v39  ;;  %7429 = vmatprep.mubr.f32.mxu1 %v6784_v27  ;;  %v8335_v27 = vpack.c.bf16 %v3501_v23, %v3500_v52  ;;  %v10752_v12 = vld [vmem:[%s10418_s1 + $0xe9] sm:$0xff] }
 0x326   : >> { %8310 = vmatpush3.bf16.msra.mxu0 %v8307_v30  ;;  %7749 = vmatprep.mubr.f32.mxu0 %v6786_v21  ;;  %v10621_v30 = vld [vmem:[%s10418_s1 + $0x29] sm:$0xff] }
 0x327   : >> { %8312 = vmatprep.subr.bf16.mxu0 %v8311_v37  ;;  %8182 = vmatpush3.bf16.msra.mxu1 %v8179_v59  ;;  %v3502_v59 = vld [vmem:[%s13354_s6 + $0x310] sm:$0xff]  ;;  %v10771_v52 = vld [vmem:[%s10418_s1 + $0x1e8] sm:$0xff] }
 0x328   : >> { %7430 = vmatmul.mubr.f32.gmra.mrb[4].mxu1 %v6785_v39  ;;  %8184 = vmatprep.subr.bf16.mxu1 %v8183_v35  ;;  %v10641_v39 = vld [vmem:[%s10418_s1 + $0x49] sm:$0xff]  ;;  %13785 = vst [vmem:[#allocation109_spill] sm:$0xff] %v10771_v52 }
 0x329   : >> { %7750 = vmatmul.mubr.f32.gmra.mrb[4].mxu0 %v6787_v10  ;;  %7432 = vmatprep.mubr.f32.mxu1 %v6786_v21  ;;  %v8339_v21 = vpack.c.bf16 %v3503_v8, %v3502_v59  ;;  %v10774_v23 = vld [vmem:[%s10418_s1 + $0x109] sm:$0xff]  ;;  %v10790_v59 = vld [vmem:[%s10418_s1 + $0x111] sm:$0xff] }
 0x32a   : >> { %8314 = vmatpush3.bf16.msra.mxu0 %v8311_v37  ;;  %7752 = vmatprep.mubr.f32.mxu0 %v6788_v5  ;;  %v3504_v37 = vld [vmem:[%s13354_s6 + $0x320] sm:$0xff]  ;;  %v10904_v29 = vld [vmem:[%s10418_s1 + $0x1c9] sm:$0xff] }
 0x32b   : >> { %8316 = vmatprep.subr.bf16.mxu0 %v8315_v41  ;;  %8186 = vmatpush3.bf16.msra.mxu1 %v8183_v35  ;;  %v10658_v35 = vld [vmem:[%s10418_s1 + $0x51] sm:$0xff]  ;;  %v1698_v8 = vld [vmem:[%s10418_s1 + $0x7] sm:$0xff] }
 0x32c   : >> { %7433 = vmatmul.mubr.f32.gmra.mrb[6].mxu1 %v6787_v10  ;;  %8188 = vmatprep.subr.bf16.mxu1 %v8187_v61  ;;  %v8343_v10 = vpack.c.bf16 %v3505_v36, %v3504_v37  ;;  %v10796_v37 = vpack.c.bf16 %v3806_v7, %v3805_v34  ;;  %v2278_v36 = vld [vmem:[%s13354_s6 + $0x110] sm:$0xff]  ;;  %v10857_v34 = vld [vmem:[%s10418_s1 + $0x67] sm:$0xff] }
 0x32d   : >> { %7753 = vmatmul.mubr.f32.gmra.mrb[6].mxu0 %v6789_v57  ;;  %7435 = vmatprep.mubr.f32.mxu1 %v6788_v5  ;;  %v3506_v5 = vld [vmem:[%s13354_s6 + $0x330] sm:$0xff]  ;;  %13789 = vst [vmem:[#allocation113_spill] sm:$0xff] %v10857_v34 }
 0x32e   : >> { %8318 = vmatpush3.bf16.msra.mxu0 %v8315_v41  ;;  %7755 = vmatprep.mubr.f32.mxu0 %v6790_v17  ;;  %v3507_v41 = vld [vmem:[%s13354_s6 + $0x338] sm:$0xff]  ;;  %v10860_v7 = vld [vmem:[%s10418_s1 + $0x189] sm:$0xff] }
 0x32f   : >> { %8320 = vmatprep.subr.bf16.mxu0 %v8319_v2  ;;  %8190 = vmatpush3.bf16.msra.mxu1 %v8187_v61  ;;  %v10683_v61 = vld [vmem:[%s10418_s1 + $0x168] sm:$0xff]  ;;  %v8347_v33 = vpack.c.bf16 %v3507_v41, %v3506_v5  ;;  %v10809_v41 = vld [vmem:[%s10418_s1 + $0x131] sm:$0xff] }
 0x330   : >> { %7436 = vmatmul.mubr.f32.gmra.mrb[8].mxu1 %v6789_v57  ;;  %8192 = vmatprep.subr.bf16.mxu1 %v8191_v40  ;;  %13777 = vst [vmem:[#allocation101_spill] sm:$0xff] %v10683_v61  ;;  %v3508_v57 = vld [vmem:[%s13354_s6 + $0x340] sm:$0xff]  ;;  %v1699_v5 = vld [vmem:[%s10418_s1 + $0xf] sm:$0xff] }
 0x331   : >> { %7756 = vmatmul.mubr.f32.gmra.mrb[8].mxu0 %v6791_v58  ;;  %7438 = vmatprep.mubr.f32.mxu1 %v6790_v17  ;;  %v3509_v17 = vld [vmem:[%s13354_s6 + $0x348] sm:$0xff] }
 0x332   : >> { %8322 = vmatpush3.bf16.msra.mxu0 %v8319_v2  ;;  %7758 = vmatprep.mubr.f32.mxu0 %v10570_v24  ;;  %v10698_v2 = vld [vmem:[%s10418_s1 + $0x170] sm:$0xff]  ;;  %v8351_v44 = vpack.c.bf16 %v3509_v17, %v3508_v57 }
 0x333   : >> { %8324 = vmatprep.subr.bf16.mxu0 %v8323_v25  ;;  %8194 = vmatpush3.bf16.msra.mxu1 %v8191_v40  ;;  %13778 = vst [vmem:[#allocation102_spill] sm:$0xff] %v10698_v2  ;;  %v10708_v40 = vld [vmem:[%s10418_s1 + $0xa9] sm:$0xff] }
 0x334   : >> { %7439 = vmatmul.mubr.f32.gmra.mrb[10].mxu1 %v6791_v58  ;;  %8196 = vmatprep.subr.bf16.mxu1 %v8195_v3  ;;  %v3511_v58 = vld [vmem:[%s13354_s6 + $0x358] sm:$0xff]  ;;  %v10815_v57 = vld [vmem:[%s10418_s1 + $0x149] sm:$0xff] }
 0x335   : >> { %7759 = vmatmul.mubr.f32.gmra.mrb[10].mxu0 %v6793_v53  ;;  %7441 = vmatprep.mubr.f32.mxu1 %v10570_v24  ;;  %v8355_v32 = vpack.c.bf16 %v3511_v58, %v3510_v49  ;;  %v2281_v49 = vld [vmem:[%s13354_s6 + $0x128] sm:$0xff] }
 0x336   : >> { %8326 = vmatpush3.bf16.msra.mxu0 %v8323_v25  ;;  %7761 = vmatprep.mubr.f32.mxu0 %v6794_v54  ;;  %v10720_v25 = vld [vmem:[%s10418_s1 + $0x190] sm:$0xff] }
 0x337   : >> { %8328 = vmatprep.subr.bf16.mxu0 %v8327_v43  ;;  %8198 = vmatpush3.bf16.msra.mxu1 %v8195_v3  ;;  %13780 = vst [vmem:[#allocation104_spill] sm:$0xff] %v10720_v25  ;;  %v10730_v3 = vld [vmem:[%s10418_s1 + $0xc9] sm:$0xff] }
 0x338   : >> { %7442 = vmatmul.mubr.f32.gmra.mrb[12].mxu1 %v6793_v53  ;;  %8200 = vmatprep.subr.bf16.mxu1 %v8199_v60  ;;  %v3513_v53 = vld [vmem:[%s13354_s6 + $0x368] sm:$0xff] }
 0x339   : >> { %7762 = vmatmul.mubr.f32.gmra.mrb[12].mxu0 %v6795_v0  ;;  %7444 = vmatprep.mubr.f32.mxu1 %v6794_v54  ;;  %v10742_v54 = vld [vmem:[%s10418_s1 + $0x1b0] sm:$0xff] }
 0x33a   : >> { %8330 = vmatpush3.bf16.msra.mxu0 %v8327_v43  ;;  %7764 = vmatprep.mubr.f32.mxu0 %v10602_v31  ;;  %13782 = vst [vmem:[#allocation106_spill] sm:$0xff] %v10742_v54  ;;  %v10746_v43 = vld [vmem:[%s10418_s1 + $0xd1] sm:$0xff]  ;;  %v6844_v51 = vld [vmem:[%s10418_s1 + $0x209] sm:$0xff] }
 0x33b   : >> { %8332 = vmatprep.subr.bf16.mxu0 %v8331_v19  ;;  %8202 = vmatpush3.bf16.msra.mxu1 %v8199_v60  ;;  %v8359_v60 = vpack.c.bf16 %v3513_v53, %v3512_v48  ;;  %v10827_v58 = vld [vmem:[%s10418_s1 + $0x2f] sm:$0xff]  ;;  %v10835_v48 = vld [vmem:[%s10418_s1 + $0x47] sm:$0xff] }
 0x33c   : >> { %7445 = vmatmul.mubr.f32.gmra.mrb[14].mxu1 %v6795_v0  ;;  %8204 = vmatprep.subr.bf16.mxu1 %v8203_v13  ;;  %v10764_v0 = vld [vmem:[%s10418_s1 + $0x1d0] sm:$0xff]  ;;  %13787 = vst [vmem:[#allocation111_spill] sm:$0xff] %v10835_v48 }
 0x33d   : >> { %7765 = vmatmul.mubr.f32.gmra.mrb[14].mxu0 %v10618_v11  ;;  %7447 = vmatprep.mubr.f32.mxu1 %v10602_v31  ;;  %13784 = vst [vmem:[#allocation108_spill] sm:$0xff] %v10764_v0  ;;  %v10838_v53 = vld [vmem:[%s10418_s1 + $0x169] sm:$0xff] }
 0x33e   : >> { %8334 = vmatpush3.bf16.msra.mxu0 %v8331_v19  ;;  %7823 = vmatprep.mubr.f32.mxu0 %v10621_v30  ;;  %v10768_v19 = vld [vmem:[%s10418_s1 + $0xf1] sm:$0xff] }
 0x33f   : >> { %8336 = vmatprep.subr.bf16.mxu0 %v8335_v27  ;;  %8206 = vmatpush3.bf16.msra.mxu1 %v8203_v13  ;;  %v8363_v13 = vpack.c.bf16 %v3515_v9, %v3514_v46  ;;  %v2283_v46 = vld [vmem:[%s13354_s6 + $0x138] sm:$0xff]  ;;  %v10850_v9 = vld [vmem:[%s10418_s1 + $0x4f] sm:$0xff] }
 0x340   : >> { %7448 = vmatmul.mubr.f32.gmra.mrb[16].mxu1 %v10618_v11  ;;  %8208 = vmatprep.subr.bf16.mxu1 %v10629_v63  ;;  %13788 = vst [vmem:[#allocation112_spill] sm:$0xff] %v10850_v9 }
 0x341   : >> { %7824 = vmatmul.mubr.f32.vlgmr.msra.gmra.mrb[0].mxu0 %v10635_v45  ;;  %7450 = vmatprep.mubr.f32.mxu1 %v10638_v42 }
 0x342   : >> { %8338 = vmatpush3.bf16.msra.mxu0 %v8335_v27  ;;  %7826 = vmatprep.mubr.f32.mxu0 %v10641_v39  ;;  %v10786_v27 = vld [vmem:[%s10418_s1 + $0x1f0] sm:$0xff] }
 0x343   : >> { %8340 = vmatprep.subr.bf16.mxu0 %v8339_v21  ;;  %13786 = vst [vmem:[#allocation110_spill] sm:$0xff] %v10786_v27 }
 0x344   : >> { %7451 = vmatmul.mubr.f32.gmra.mrb[18].mxu1 %v10654_v1 }
 0x345   : >> { %7827 = vmatmul.mubr.f32.gmra.mrb[2].mxu0 %v10658_v35  ;;  %7453 = vmatprep.mubr.f32.mxu1 %v10661_v55 }
 0x346   : >> { %7829 = vmatprep.mubr.f32.mxu0 %v10664_v22  ;;  %8342 = vmatpush3.bf16.msra.mxu0 %v8339_v21  ;;  %v10794_v21 = vld [vmem:[%s10418_s1 + $0x129] sm:$0xff] }
 0x347   : >> { %8344 = vmatprep.subr.bf16.mxu0 %v8343_v10 }
 0x348   : >> { %7454 = vmatmul.mubr.f32.gmra.mrb[20].mxu1 %v10676_v18 }
 0x349   : >> { %7830 = vmatmul.mubr.f32.gmra.mrb[4].mxu0 %v10680_v6  ;;  %7456 = vmatprep.mubr.f32.mxu1 %v10683_v61  ;;  %v3812_v61 = vld [vmem:[%s13354_s6 + $0x3b8] sm:$0xff] }
 0x34a   : >> { %7832 = vmatprep.mubr.f32.mxu0 %v10686_v50  ;;  %8346 = vmatpush3.bf16.msra.mxu0 %v8343_v10  ;;  %v2279_v10 = vld [vmem:[%s13354_s6 + $0x118] sm:$0xff] }
 0x34b   : >> { %8348 = vmatprep.subr.bf16.mxu0 %v8347_v33  ;;  %v8211_v17 = vpack.c.bf16 %v2279_v10, %v2278_v36  ;;  %v2284_v36 = vld [vmem:[%s13354_s6 + $0x140] sm:$0xff]  ;;  %v2285_v10 = vld [vmem:[%s13354_s6 + $0x148] sm:$0xff] }
 0x34c   : >> { %7457 = vmatmul.mubr.f32.gmra.mrb[22].mxu1 %v10698_v2  ;;  %v3807_v2 = vld [vmem:[%s13354_s6 + $0x390] sm:$0xff] }
 0x34d   : >> { %7833 = vmatmul.mubr.f32.gmra.mrb[6].mxu0 %v10702_v38  ;;  %7459 = vmatprep.mubr.f32.mxu1 %v10705_v14 }
 0x34e   : >> { %7835 = vmatprep.mubr.f32.mxu0 %v10708_v40  ;;  %8350 = vmatpush3.bf16.msra.mxu0 %v8347_v33  ;;  %v10812_v33 = vld [vmem:[%s10418_s1 + $0x27] sm:$0xff] }
 0x34f   : >> { %8352 = vmatprep.subr.bf16.mxu0 %v8351_v44 }
 0x350   : >> { %7460 = vmatmul.mubr.f32.gmra.mrb[24].mxu1 %v10720_v25  ;;  %v2583_v25 = vld [vmem:[%s13354_s6 + $0x180] sm:$0xff] }
 0x351   : >> { %7836 = vmatmul.mubr.f32.gmra.mrb[8].mxu0 %v10724_v15  ;;  %7462 = vmatprep.mubr.f32.mxu1 %v10727_v26  ;;  %v10964_v14 = vpack.c.bf16 %v2584_v16, %v2583_v25  ;;  %v10979_v16 = vld [vmem:[%s10418_s1 + $0x127] sm:$0xff] }
 0x352   : >> { %7838 = vmatprep.mubr.f32.mxu0 %v10730_v3  ;;  %8354 = vmatpush3.bf16.msra.mxu0 %v8351_v44  ;;  %v2280_v44 = vld [vmem:[%s13354_s6 + $0x120] sm:$0xff] }
 0x353   : >> { %8356 = vmatprep.subr.bf16.mxu0 %v8355_v32  ;;  %v3809_v25 = vld [vmem:[%s13354_s6 + $0x3a0] sm:$0xff] }
 0x354   : >> { %7463 = vmatmul.mubr.f32.gmra.mrb[26].mxu1 %v10742_v54  ;;  %v2291_v54 = vld [vmem:[%s13354_s6 + $0x178] sm:$0xff] }
 0x355   : >> { %7839 = vmatmul.mubr.f32.gmra.mrb[10].mxu0 %v10746_v43  ;;  %7465 = vmatprep.mubr.f32.mxu1 %v10749_v28  ;;  %v2290_v28 = vld [vmem:[%s13354_s6 + $0x170] sm:$0xff] }
 0x356   : >> { %7841 = vmatprep.mubr.f32.mxu0 %v10752_v12  ;;  %8358 = vmatpush3.bf16.msra.mxu0 %v8355_v32  ;;  %v10832_v32 = vld [vmem:[%s10418_s1 + $0x151] sm:$0xff]  ;;  %v8235_v26 = vpack.c.bf16 %v2291_v54, %v2290_v28  ;;  %v10962_v28 = vld [vmem:[%s10418_s1 + $0x107] sm:$0xff] }
 0x357   : >> { %8360 = vmatprep.subr.bf16.mxu0 %v8359_v60  ;;  %v6845_v54 = vld [vmem:[%s10418_s1 + $0x211] sm:$0xff]  ;;  %13799 = vst [vmem:[#allocation123_spill] sm:$0xff] %v10962_v28 }
 0x358   : >> { %7466 = vmatmul.mubr.f32.gmra.mrb[28].mxu1 %v10764_v0  ;;  %v10926_v0 = vld [vmem:[%s10418_s1 + $0x1e9] sm:$0xff] }
 0x359   : >> { %7842 = vmatmul.mubr.f32.gmra.mrb[12].mxu0 %v10768_v19  ;;  %7468 = vmatprep.mubr.f32.mxu1 %v10771_v52  ;;  %v2289_v52 = vld [vmem:[%s13354_s6 + $0x168] sm:$0xff] }
 0x35a   : >> { %7844 = vmatprep.mubr.f32.mxu0 %v10774_v23  ;;  %8362 = vmatpush3.bf16.msra.mxu0 %v8359_v60  ;;  %v8215_v60 = vpack.c.bf16 %v2281_v49, %v2280_v44  ;;  %v10879_v44 = vld [vmem:[%s10418_s1 + $0x87] sm:$0xff]  ;;  %v8231_v62 = vpack.c.bf16 %v2289_v52, %v2288_v4  ;;  %v10942_v4 = vld [vmem:[%s10418_s1 + $0x1f1] sm:$0xff] }
 0x35b   : >> { %8364 = vmatprep.subr.bf16.mxu0 %v8363_v13  ;;  %13791 = vst [vmem:[#allocation115_spill] sm:$0xff] %v10879_v44  ;;  %v10882_v49 = vld [vmem:[%s10418_s1 + $0x1a9] sm:$0xff] }
 0x35c   : >> { %7469 = vmatmul.mubr.f32.gmra.mrb[30].mxu1 %v10786_v27  ;;  %v10945_v52 = vld [vmem:[%s10418_s1 + $0xe7] sm:$0xff] }
 0x35d   : >> { %7845 = vmatmul.mubr.f32.gmra.mrb[14].mxu0 %v10790_v59  ;;  %7503 = vmatprep.mubr.f32.mxu1 %v1698_v8  ;;  %13797 = vst [vmem:[#allocation121_spill] sm:$0xff] %v10945_v52 }
 0x35e   : >> { %7847 = vmatprep.mubr.f32.mxu0 %v10794_v21  ;;  %8366 = vmatpush3.bf16.msra.mxu0 %v8363_v13  ;;  %v10854_v13 = vld [vmem:[%s10418_s1 + $0x171] sm:$0xff] }
 0x35f   : >> { %8368 = vmatprep.subr.bf16.mxu0 %v10796_v37 }
 0x360   : >> { %7504 = vmatmul.mubr.f32.vlgmr.msra.gmra.mrb[0].mxu1 %v1699_v5  ;;  %v10872_v5 = vld [vmem:[%s10418_s1 + $0x6f] sm:$0xff] }
 0x361   : >> { %7848 = vmatmul.mubr.f32.gmra.mrb[16].mxu0 %v10809_v41  ;;  %8210 = vmatpush3.bf16.msra.mxu1 %v10629_v63  ;;  %v2282_v63 = vld [vmem:[%s13354_s6 + $0x130] sm:$0xff]  ;;  %13790 = vst [vmem:[#allocation114_spill] sm:$0xff] %v10872_v5 }
 0x362   : >> { %7506 = vmatprep.mubr.f32.mxu1 %v10812_v33  ;;  %7850 = vmatprep.mubr.f32.mxu0 %v10815_v57  ;;  %v8219_v8 = vpack.c.bf16 %v2283_v46, %v2282_v63  ;;  %v8223_v63 = vpack.c.bf16 %v2285_v10, %v2284_v36  ;;  %v2286_v46 = vld [vmem:[%s13354_s6 + $0x150] sm:$0xff]  ;;  %v10901_v10 = vld [vmem:[%s10418_s1 + $0xa7] sm:$0xff] }
 0x363   : >> { %8212 = vmatprep.subr.bf16.mxu1 %v8211_v17  ;;  %v10898_v36 = vld [vmem:[%s10418_s1 + $0x1b1] sm:$0xff]  ;;  %13793 = vst [vmem:[#allocation117_spill] sm:$0xff] %v10901_v10  ;;  %v8227_v27 = vpack.c.bf16 %v2287_v20, %v2286_v46  ;;  %v10923_v46 = vld [vmem:[%s10418_s1 + $0xc7] sm:$0xff] }
 0x364   : >> { %7507 = vmatmul.mubr.f32.gmra.mrb[2].mxu1 %v10827_v58  ;;  %v10920_v20 = vld [vmem:[%s10418_s1 + $0x1d1] sm:$0xff]  ;;  %13795 = vst [vmem:[#allocation119_spill] sm:$0xff] %v10923_v46 }
 0x365   : >> { %7851 = vmatmul.mubr.f32.gmra.mrb[18].mxu0 %v10832_v32  ;;  %7509 = vmatprep.mubr.f32.mxu1 %v10835_v48 }
 0x366   : >> { %7853 = vmatprep.mubr.f32.mxu0 %v10838_v53  ;;  %8214 = vmatpush3.bf16.msra.mxu1 %v8211_v17  ;;  %v10876_v17 = vld [vmem:[%s10418_s1 + $0x191] sm:$0xff] }
 0x367   : >> { %8216 = vmatprep.subr.bf16.mxu1 %v8215_v60 }
 0x368   : >> { %7510 = vmatmul.mubr.f32.gmra.mrb[4].mxu1 %v10850_v9 }
 0x369   : >> { %7854 = vmatmul.mubr.f32.gmra.mrb[20].mxu0 %v10854_v13  ;;  %7512 = vmatprep.mubr.f32.mxu1 %v10857_v34 }
 0x36a   : >> { %7856 = vmatprep.mubr.f32.mxu0 %v10860_v7  ;;  %8218 = vmatpush3.bf16.msra.mxu1 %v8215_v60  ;;  %v10894_v60 = vld [vmem:[%s10418_s1 + $0x8f] sm:$0xff] }
 0x36b   : >> { %8220 = vmatprep.subr.bf16.mxu1 %v8219_v8  ;;  %13792 = vst [vmem:[#allocation116_spill] sm:$0xff] %v10894_v60 }
 0x36c   : >> { %7513 = vmatmul.mubr.f32.gmra.mrb[6].mxu1 %v10872_v5 }
 0x36d   : >> { %7857 = vmatmul.mubr.f32.gmra.mrb[22].mxu0 %v10876_v17  ;;  %7515 = vmatprep.mubr.f32.mxu1 %v10879_v44 }
 0x36e   : >> { %7859 = vmatprep.mubr.f32.mxu0 %v10882_v49  ;;  %8222 = vmatpush3.bf16.msra.mxu1 %v8219_v8  ;;  %v10916_v8 = vld [vmem:[%s10418_s1 + $0xaf] sm:$0xff] }
 0x36f   : >> { %8224 = vmatprep.subr.bf16.mxu1 %v8223_v63  ;;  %13794 = vst [vmem:[#allocation118_spill] sm:$0xff] %v10916_v8 }
 0x370   : >> { %7516 = vmatmul.mubr.f32.gmra.mrb[8].mxu1 %v10894_v60 }
 0x371   : >> { %7860 = vmatmul.mubr.f32.gmra.mrb[24].mxu0 %v10898_v36  ;;  %7518 = vmatprep.mubr.f32.mxu1 %v10901_v10 }
 0x372   : >> { %7862 = vmatprep.mubr.f32.mxu0 %v10904_v29  ;;  %8226 = vmatpush3.bf16.msra.mxu1 %v8223_v63  ;;  %v10938_v63 = vld [vmem:[%s10418_s1 + $0xcf] sm:$0xff] }
 0x373   : >> { %8228 = vmatprep.subr.bf16.mxu1 %v8227_v27  ;;  %13796 = vst [vmem:[#allocation120_spill] sm:$0xff] %v10938_v63 }
 0x374   : >> { %7519 = vmatmul.mubr.f32.gmra.mrb[10].mxu1 %v10916_v8 }
 0x375   : >> { %7863 = vmatmul.mubr.f32.gmra.mrb[26].mxu0 %v10920_v20  ;;  %7521 = vmatprep.mubr.f32.mxu1 %v10923_v46 }
 0x376   : >> { %7865 = vmatprep.mubr.f32.mxu0 %v10926_v0  ;;  %8230 = vmatpush3.bf16.msra.mxu1 %v8227_v27  ;;  %v10958_v27 = vld [vmem:[%s10418_s1 + $0xef] sm:$0xff] }
 0x377   : >> { %8232 = vmatprep.subr.bf16.mxu1 %v8231_v62  ;;  %13798 = vst [vmem:[#allocation122_spill] sm:$0xff] %v10958_v27 }
 0x378   : >> { %7522 = vmatmul.mubr.f32.gmra.mrb[12].mxu1 %v10938_v63 }
 0x379   : >> { %7866 = vmatmul.mubr.f32.gmra.mrb[28].mxu0 %v10942_v4  ;;  %7524 = vmatprep.mubr.f32.mxu1 %v10945_v52 }
 0x37a   : >> { %7868 = vmatprep.mubr.f32.mxu0 %v6844_v51  ;;  %8234 = vmatpush3.bf16.msra.mxu1 %v8231_v62  ;;  %v10975_v51 = vld [vmem:[%s10418_s1 + $0x10f] sm:$0xff]  ;;  %v8371_v62 = vpack.c.bf16 %v3808_v47, %v3807_v2  ;;  %v10997_v47 = vld [vmem:[%s10418_s1 + $0x147] sm:$0xff] }
 0x37b   : >> { %8236 = vmatprep.subr.bf16.mxu1 %v8235_v26  ;;  %13800 = vst [vmem:[#allocation124_spill] sm:$0xff] %v10975_v51 }
 0x37c   : >> { %7525 = vmatmul.mubr.f32.gmra.mrb[14].mxu1 %v10958_v27 }
 0x37d   : >> { %7869 = vmatmul.mubr.f32.gmra.mrb[30].mxu0 %v6845_v54  ;;  %7527 = vmatprep.mubr.f32.mxu1 %v10962_v28  ;;  %v3810_v54 = vld [vmem:[%s13354_s6 + $0x3a8] sm:$0xff] }
 0x37e   : >> { %7903 = vmatprep.mubr.f32.mxu0 %v10835_v48  ;;  %8238 = vmatpush3.bf16.msra.mxu1 %v8235_v26  ;;  %v10992_v26 = vld [vmem:[%s10418_s1 + $0x12f] sm:$0xff]  ;;  %v8375_v2 = vpack.c.bf16 %v3810_v54, %v3809_v25  ;;  %v11013_v25 = vld [vmem:[%s10418_s1 + $0x167] sm:$0xff] }
 0x37f   : >> { %8240 = vmatprep.subr.bf16.mxu1 %v10964_v14  ;;  %v2245_v48 = vld [vmem:[%s10418_s1 + $0x11] sm:$0xff] }
 0x380   : >> { %7528 = vmatmul.mubr.f32.gmra.mrb[16].mxu1 %v10975_v51 }
 0x381   : >> { %7904 = vmatmul.mubr.f32.vlgmr.msra.gmra.mrb[0].mxu0 %v10850_v9  ;;  %7530 = vmatprep.mubr.f32.mxu1 %v10979_v16  ;;  %v3811_v9 = vld [vmem:[%s13354_s6 + $0x3b0] sm:$0xff] }
 0x382   : >> { %8370 = vmatpush3.bf16.msra.mxu0 %v10796_v37  ;;  %7906 = vmatprep.mubr.f32.mxu0 %v10857_v34  ;;  %v11009_v37 = vld [vmem:[%s10418_s1 + $0x14f] sm:$0xff]  ;;  %v8379_v54 = vpack.c.bf16 %v3812_v61, %v3811_v9  ;;  %v3813_v34 = vld [vmem:[%s13354_s6 + $0x3c0] sm:$0xff] }
 0x383   : >> { %8372 = vmatprep.subr.bf16.mxu0 %v8371_v62  ;;  %v11029_v61 = vld [vmem:[%s10418_s1 + $0x187] sm:$0xff] }
 0x384   : >> { %7531 = vmatmul.mubr.f32.gmra.mrb[18].mxu1 %v10992_v26 }
 0x385   : >> { %7907 = vmatmul.mubr.f32.gmra.mrb[2].mxu0 %v10872_v5  ;;  %7533 = vmatprep.mubr.f32.mxu1 %v10997_v47  ;;  %v3814_v5 = vld [vmem:[%s13354_s6 + $0x3c8] sm:$0xff] }
 0x386   : >> { %7909 = vmatprep.mubr.f32.mxu0 %v10879_v44  ;;  %8374 = vmatpush3.bf16.msra.mxu0 %v8371_v62  ;;  %v11025_v62 = vld [vmem:[%s10418_s1 + $0x16f] sm:$0xff]  ;;  %v8383_v9 = vpack.c.bf16 %v3814_v5, %v3813_v34  ;;  %v11045_v34 = vld [vmem:[%s10418_s1 + $0x1a7] sm:$0xff] }
 0x387   : >> { %8376 = vmatprep.subr.bf16.mxu0 %v8375_v2  ;;  %v3815_v44 = vld [vmem:[%s13354_s6 + $0x3d0] sm:$0xff] }
 0x388   : >> { %7534 = vmatmul.mubr.f32.gmra.mrb[20].mxu1 %v11009_v37 }
 0x389   : >> { %7910 = vmatmul.mubr.f32.gmra.mrb[4].mxu0 %v10894_v60  ;;  %7536 = vmatprep.mubr.f32.mxu1 %v11013_v25  ;;  %v3816_v60 = vld [vmem:[%s13354_s6 + $0x3d8] sm:$0xff] }
 0x38a   : >> { %7912 = vmatprep.mubr.f32.mxu0 %v10901_v10  ;;  %8378 = vmatpush3.bf16.msra.mxu0 %v8375_v2  ;;  %v11041_v10 = vld [vmem:[%s10418_s1 + $0x18f] sm:$0xff]  ;;  %v8387_v5 = vpack.c.bf16 %v3816_v60, %v3815_v44  ;;  %v3817_v2 = vld [vmem:[%s13354_s6 + $0x3e0] sm:$0xff] }
 0x38b   : >> { %8380 = vmatprep.subr.bf16.mxu0 %v8379_v54  ;;  %v11061_v44 = vld [vmem:[%s10418_s1 + $0x1c7] sm:$0xff] }
 0x38c   : >> { %7537 = vmatmul.mubr.f32.gmra.mrb[22].mxu1 %v11025_v62 }
 0x38d   : >> { %7913 = vmatmul.mubr.f32.gmra.mrb[6].mxu0 %v10916_v8  ;;  %7539 = vmatprep.mubr.f32.mxu1 %v11029_v61  ;;  %v3818_v8 = vld [vmem:[%s13354_s6 + $0x3e8] sm:$0xff] }
 0x38e   : >> { %7915 = vmatprep.mubr.f32.mxu0 %v10923_v46  ;;  %8382 = vmatpush3.bf16.msra.mxu0 %v8379_v54  ;;  %v11057_v46 = vld [vmem:[%s10418_s1 + $0x1af] sm:$0xff]  ;;  %v8391_v60 = vpack.c.bf16 %v3818_v8, %v3817_v2  ;;  %v11077_v8 = vld [vmem:[%s10418_s1 + $0x1e7] sm:$0xff] }
 0x38f   : >> { %8384 = vmatprep.subr.bf16.mxu0 %v8383_v9  ;;  %v3819_v54 = vld [vmem:[%s13354_s6 + $0x3f0] sm:$0xff]  ;;  %v4110_v2 = vld [vmem:[%s13354_s6 + $0x400] sm:$0xff] }
 0x390   : >> { %7540 = vmatmul.mubr.f32.gmra.mrb[24].mxu1 %v11041_v10 }
 0x391   : >> { %7916 = vmatmul.mubr.f32.gmra.mrb[8].mxu0 %v10938_v63  ;;  %7542 = vmatprep.mubr.f32.mxu1 %v11045_v34  ;;  %v3820_v63 = vld [vmem:[%s13354_s6 + $0x3f8] sm:$0xff] }
 0x392   : >> { %7918 = vmatprep.mubr.f32.mxu0 %v10945_v52  ;;  %8386 = vmatpush3.bf16.msra.mxu0 %v8383_v9  ;;  %v11073_v52 = vld [vmem:[%s10418_s1 + $0x1cf] sm:$0xff]  ;;  %v8395_v9 = vpack.c.bf16 %v3820_v63, %v3819_v54 }
 0x393   : >> { %8388 = vmatprep.subr.bf16.mxu0 %v8387_v5  ;;  %v2244_v63 = vld [vmem:[%s10418_s1 + $0x9] sm:$0xff] }
 0x394   : >> { %7543 = vmatmul.mubr.f32.gmra.mrb[26].mxu1 %v11057_v46  ;;  %v2585_v54 = vld [vmem:[%s13354_s6 + $0x190] sm:$0xff] }
 0x395   : >> { %7919 = vmatmul.mubr.f32.gmra.mrb[10].mxu0 %v10958_v27  ;;  %7545 = vmatprep.mubr.f32.mxu1 %v11061_v44  ;;  %v4111_v27 = vld [vmem:[%s13354_s6 + $0x408] sm:$0xff] }
 0x396   : >> { %7921 = vmatprep.mubr.f32.mxu0 %v10962_v28  ;;  %8390 = vmatpush3.bf16.msra.mxu0 %v8387_v5  ;;  %v11089_v28 = vld [vmem:[%s10418_s1 + $0x1ef] sm:$0xff]  ;;  %v11093_v5 = vpack.c.bf16 %v4111_v27, %v4110_v2  ;;  %v2587_v27 = vld [vmem:[%s13354_s6 + $0x1a0] sm:$0xff] }
 0x397   : >> { %8392 = vmatprep.subr.bf16.mxu0 %v8391_v60  ;;  %v2588_v2 = vld [vmem:[%s13354_s6 + $0x1a8] sm:$0xff] }
 0x398   : >> { %7546 = vmatmul.mubr.f32.gmra.mrb[28].mxu1 %v11073_v52 }
 0x399   : >> { %7922 = vmatmul.mubr.f32.gmra.mrb[12].mxu0 %v10975_v51  ;;  %7548 = vmatprep.mubr.f32.mxu1 %v11077_v8  ;;  %v2586_v51 = vld [vmem:[%s13354_s6 + $0x198] sm:$0xff] }
 0x39a   : >> { %7924 = vmatprep.mubr.f32.mxu0 %v10979_v16  ;;  %8394 = vmatpush3.bf16.msra.mxu0 %v8391_v60  ;;  %v8243_v60 = vpack.c.bf16 %v2586_v51, %v2585_v54  ;;  %v8247_v51 = vpack.c.bf16 %v2588_v2, %v2587_v27  ;;  %v2596_v54 = vld [vmem:[%s13354_s6 + $0x1e8] sm:$0xff]  ;;  %v2598_v27 = vld [vmem:[%s13354_s6 + $0x1f8] sm:$0xff] }
 0x39b   : >> { %8396 = vmatprep.subr.bf16.mxu0 %v8395_v9  ;;  %v6876_v2 = vld [vmem:[%s10418_s1 + $0x227] sm:$0xff] }
 0x39c   : >> { %7549 = vmatmul.mubr.f32.gmra.mrb[30].mxu1 %v11089_v28 }
 0x39d   : >> { %7925 = vmatmul.mubr.f32.gmra.mrb[14].mxu0 %v10992_v26  ;;  %7583 = vmatprep.mubr.f32.mxu1 %v2244_v63  ;;  %v2594_v63 = vld [vmem:[%s13354_s6 + $0x1d8] sm:$0xff] }
 0x39e   : >> { %7927 = vmatprep.mubr.f32.mxu0 %v10997_v47  ;;  %8398 = vmatpush3.bf16.msra.mxu0 %v8395_v9  ;;  %v2590_v9 = vld [vmem:[%s13354_s6 + $0x1b8] sm:$0xff] }
 0x39f   : >> { %8400 = vmatprep.subr.bf16.mxu0 %v11093_v5 }
 0x3a0   : >> { %7584 = vmatmul.mubr.f32.vlgmr.msra.gmra.mrb[0].mxu1 %v2245_v48  ;;  %v2589_v48 = vld [vmem:[%s13354_s6 + $0x1b0] sm:$0xff] }
 0x3a1   : >> { %7928 = vmatmul.mubr.f32.gmra.mrb[16].mxu0 %v11009_v37  ;;  %8242 = vmatpush3.bf16.msra.mxu1 %v10964_v14  ;;  %v2592_v14 = vld [vmem:[%s13354_s6 + $0x1c8] sm:$0xff] }
 0x3a2   : >> { %7586 = vmatprep.mubr.f32.mxu1 %v10621_v30  ;;  %7930 = vmatprep.mubr.f32.mxu0 %v11013_v25  ;;  %v8251_v30 = vpack.c.bf16 %v2590_v9, %v2589_v48  ;;  %v4112_v48 = vld [vmem:[%s13354_s6 + $0x410] sm:$0xff]  ;;  %v6880_v9 = vld [vmem:[%s10418_s1 + $0x68] sm:$0xff] }
 0x3a3   : >> { %8244 = vmatprep.subr.bf16.mxu1 %v8243_v60 }
 0x3a4   : >> { %7587 = vmatmul.mubr.f32.gmra.mrb[2].mxu1 %v10635_v45  ;;  %v2591_v45 = vld [vmem:[%s13354_s6 + $0x1c0] sm:$0xff] }
 0x3a5   : >> { %7931 = vmatmul.mubr.f32.gmra.mrb[18].mxu0 %v11025_v62  ;;  %7589 = vmatprep.mubr.f32.mxu1 %v10641_v39  ;;  %v8255_v39 = vpack.c.bf16 %v2592_v14, %v2591_v45  ;;  %v4115_v45 = vld [vmem:[%s13354_s6 + $0x428] sm:$0xff] }
 0x3a6   : >> { %7933 = vmatprep.mubr.f32.mxu0 %v11029_v61  ;;  %8246 = vmatpush3.bf16.msra.mxu1 %v8243_v60  ;;  %v2597_v60 = vld [vmem:[%s13354_s6 + $0x1f0] sm:$0xff]  ;;  %v6882_v14 = vld [vmem:[%s10418_s1 + $0x88] sm:$0xff] }
 0x3a7   : >> { %8248 = vmatprep.subr.bf16.mxu1 %v8247_v51 }
 0x3a8   : >> { %7590 = vmatmul.mubr.f32.gmra.mrb[4].mxu1 %v10658_v35  ;;  %v2593_v35 = vld [vmem:[%s13354_s6 + $0x1d0] sm:$0xff] }
 0x3a9   : >> { %7934 = vmatmul.mubr.f32.gmra.mrb[20].mxu0 %v11041_v10  ;;  %7592 = vmatprep.mubr.f32.mxu1 %v10664_v22  ;;  %v8259_v22 = vpack.c.bf16 %v2594_v63, %v2593_v35  ;;  %v4117_v35 = vld [vmem:[%s13354_s6 + $0x438] sm:$0xff] }
 0x3aa   : >> { %7936 = vmatprep.mubr.f32.mxu0 %v11045_v34  ;;  %8250 = vmatpush3.bf16.msra.mxu1 %v8247_v51  ;;  %v6877_v51 = vld [vmem:[%s10418_s1 + $0x22f] sm:$0xff] }
 0x3ab   : >> { %8252 = vmatprep.subr.bf16.mxu1 %v8251_v30 }
 0x3ac   : >> { %7593 = vmatmul.mubr.f32.gmra.mrb[6].mxu1 %v10680_v6  ;;  %v2595_v6 = vld [vmem:[%s13354_s6 + $0x1e0] sm:$0xff] }
 0x3ad   : >> { %7937 = vmatmul.mubr.f32.gmra.mrb[22].mxu0 %v11057_v46  ;;  %7595 = vmatprep.mubr.f32.mxu1 %v10686_v50  ;;  %v11157_v50 = vld [vmem:[%s10418_s1 + $0x207] sm:$0xff] }
 0x3ae   : >> { %7939 = vmatprep.mubr.f32.mxu0 %v11061_v44  ;;  %8254 = vmatpush3.bf16.msra.mxu1 %v8251_v30 }
 0x3af   : >> { %8256 = vmatprep.subr.bf16.mxu1 %v8255_v39 }
 0x3b0   : >> { %7596 = vmatmul.mubr.f32.gmra.mrb[8].mxu1 %v10702_v38  ;;  %v8263_v38 = vpack.c.bf16 %v2596_v54, %v2595_v6  ;;  %v4121_v54 = vld [vmem:[%s13354_s6 + $0x458] sm:$0xff] }
 0x3b1   : >> { %7940 = vmatmul.mubr.f32.gmra.mrb[24].mxu0 %v11073_v52  ;;  %7598 = vmatprep.mubr.f32.mxu1 %v10708_v40  ;;  %v11170_v40 = vld [vmem:[%s10418_s1 + $0x20f] sm:$0xff] }
 0x3b2   : >> { %7942 = vmatprep.mubr.f32.mxu0 %v11077_v8  ;;  %8258 = vmatpush3.bf16.msra.mxu1 %v8255_v39  ;;  %v4116_v39 = vld [vmem:[%s13354_s6 + $0x430] sm:$0xff] }
 0x3b3   : >> { %8260 = vmatprep.subr.bf16.mxu1 %v8259_v22  ;;  %v8411_v63 = vpack.c.bf16 %v4117_v35, %v4116_v39  ;;  %v11294_v39 = vld [vmem:[%s10418_s1 + $0x210] sm:$0xff]  ;;  %v6908_v35 = vld [vmem:[%s10418_s1 + $0x228] sm:$0xff] }
 0x3b4   : >> { %7599 = vmatmul.mubr.f32.gmra.mrb[10].mxu1 %v10724_v15  ;;  %v8267_v15 = vpack.c.bf16 %v2598_v27, %v2597_v60  ;;  %v4123_v27 = vld [vmem:[%s13354_s6 + $0x468] sm:$0xff] }
 0x3b5   : >> { %7943 = vmatmul.mubr.f32.gmra.mrb[26].mxu0 %v11089_v28  ;;  %7601 = vmatprep.mubr.f32.mxu1 %v10730_v3  ;;  %v6878_v3 = vld [vmem:[%s10418_s1 + $0x48] sm:$0xff] }
 0x3b6   : >> { %7945 = vmatprep.mubr.f32.mxu0 %v11157_v50  ;;  %8262 = vmatpush3.bf16.msra.mxu1 %v8259_v22  ;;  %v4119_v22 = vld [vmem:[%s13354_s6 + $0x448] sm:$0xff] }
 0x3b7   : >> { %8264 = vmatprep.subr.bf16.mxu1 %v8263_v38 }
 0x3b8   : >> { %7602 = vmatmul.mubr.f32.gmra.mrb[12].mxu1 %v10746_v43  ;;  %v4113_v43 = vld [vmem:[%s13354_s6 + $0x418] sm:$0xff] }
 0x3b9   : >> { %7946 = vmatmul.mubr.f32.gmra.mrb[28].mxu0 %v11170_v40  ;;  %7604 = vmatprep.mubr.f32.mxu1 %v10752_v12  ;;  %v6879_v12 = vld [vmem:[%s10418_s1 + $0x50] sm:$0xff]  ;;  %v8403_v30 = vpack.c.bf16 %v4113_v43, %v4112_v48  ;;  %v13818_v48 = vld [vmem:[#allocation97_spill] sm:$0xff] }
 0x3ba   : >> { %7948 = vmatprep.mubr.f32.mxu0 %v6876_v2  ;;  %8266 = vmatpush3.bf16.msra.mxu1 %v8263_v38  ;;  %v6888_v38 = vld [vmem:[%s10418_s1 + $0xe8] sm:$0xff]  ;;  %v4125_v2 = vld [vmem:[%s13354_s6 + $0x478] sm:$0xff] }
 0x3bb   : >> { %8268 = vmatprep.subr.bf16.mxu1 %v8267_v15  ;;  %v13819_v43 = vld [vmem:[#allocation118_spill] sm:$0xff] }
 0x3bc   : >> { %7605 = vmatmul.mubr.f32.gmra.mrb[14].mxu1 %v10768_v19  ;;  %v4114_v19 = vld [vmem:[%s13354_s6 + $0x420] sm:$0xff] }
 0x3bd   : >> { %7949 = vmatmul.mubr.f32.gmra.mrb[30].mxu0 %v6877_v51  ;;  %7607 = vmatprep.mubr.f32.mxu1 %v10774_v23  ;;  %v6881_v23 = vld [vmem:[%s10418_s1 + $0x70] sm:$0xff]  ;;  %v13816_v51 = vld [vmem:[#allocation117_spill] sm:$0xff] }
 0x3be   : >> { %7983 = vmatprep.mubr.f32.mxu0 %v6878_v3  ;;  %8270 = vmatpush3.bf16.msra.mxu1 %v8267_v15  ;;  %v13815_v15 = vld [vmem:[#allocation106_spill] sm:$0xff]  ;;  %v13817_v3 = vld [vmem:[#allocation107_spill] sm:$0xff] }
 0x3bf   : >> { %8431 = vmatprep.subr.bf16.mxu1 %v10368_v56 }
 0x3c0   : >> { %7608 = vmatmul.mubr.f32.gmra.mrb[16].mxu1 %v10790_v59  ;;  %v8407_v59 = vpack.c.bf16 %v4115_v45, %v4114_v19  ;;  %v11286_v19 = vld [vmem:[%s10418_s1 + $0x208] sm:$0xff] }
 0x3c1   : >> { %7984 = vmatmul.mubr.f32.vlgmr.msra.gmra.mrb[0].mxu0 %v6879_v12  ;;  %7610 = vmatprep.mubr.f32.mxu1 %v10794_v21  ;;  %v6883_v21 = vld [vmem:[%s10418_s1 + $0x90] sm:$0xff]  ;;  %v13820_v12 = vld [vmem:[#allocation108_spill] sm:$0xff] }
 0x3c2   : >> { %8402 = vmatpush3.bf16.msra.mxu0 %v11093_v5  ;;  %7986 = vmatprep.mubr.f32.mxu0 %v6880_v9  ;;  %v6884_v5 = vld [vmem:[%s10418_s1 + $0xa8] sm:$0xff]  ;;  %v13821_v9 = vld [vmem:[#allocation119_spill] sm:$0xff] }
 0x3c3   : >> { %8404 = vmatprep.subr.bf16.mxu0 %v8403_v30  ;;  %v13823_v45 = vld [vmem:[#allocation98_spill] sm:$0xff] }
 0x3c4   : >> { %7611 = vmatmul.mubr.f32.gmra.mrb[18].mxu1 %v10809_v41  ;;  %v4118_v41 = vld [vmem:[%s13354_s6 + $0x440] sm:$0xff] }
 0x3c5   : >> { %7987 = vmatmul.mubr.f32.gmra.mrb[2].mxu0 %v6881_v23  ;;  %7613 = vmatprep.mubr.f32.mxu1 %v10815_v57  ;;  %v6885_v57 = vld [vmem:[%s10418_s1 + $0xb0] sm:$0xff]  ;;  %v8415_v6 = vpack.c.bf16 %v4119_v22, %v4118_v41  ;;  %v13824_v23 = vld [vmem:[#allocation120_spill] sm:$0xff] }
 0x3c6   : >> { %7989 = vmatprep.mubr.f32.mxu0 %v6882_v14  ;;  %8406 = vmatpush3.bf16.msra.mxu0 %v8403_v30  ;;  %v13822_v30 = vld [vmem:[#allocation109_spill] sm:$0xff]  ;;  %v13825_v14 = vld [vmem:[#allocation110_spill] sm:$0xff] }
 0x3c7   : >> { %8408 = vmatprep.subr.bf16.mxu0 %v8407_v59  ;;  %v6909_v41 = vld [vmem:[%s10418_s1 + $0x230] sm:$0xff] }
 0x3c8   : >> { %7614 = vmatmul.mubr.f32.gmra.mrb[20].mxu1 %v10832_v32  ;;  %v4120_v32 = vld [vmem:[%s13354_s6 + $0x450] sm:$0xff] }
 0x3c9   : >> { %7990 = vmatmul.mubr.f32.gmra.mrb[4].mxu0 %v6883_v21  ;;  %7616 = vmatprep.mubr.f32.mxu1 %v10838_v53  ;;  %v6887_v53 = vld [vmem:[%s10418_s1 + $0xd0] sm:$0xff]  ;;  %v8419_v60 = vpack.c.bf16 %v4121_v54, %v4120_v32 }
 0x3ca   : >> { %7992 = vmatprep.mubr.f32.mxu0 %v6884_v5  ;;  %8410 = vmatpush3.bf16.msra.mxu0 %v8407_v59  ;;  %v13826_v59 = vld [vmem:[#allocation121_spill] sm:$0xff]  ;;  %v13827_v21 = vld [vmem:[#allocation99_spill] sm:$0xff]  ;;  %v13828_v5 = vld [vmem:[#allocation122_spill] sm:$0xff] }
 0x3cb   : >> { %8412 = vmatprep.subr.bf16.mxu0 %v8411_v63  ;;  %v6910_v22 = vld [vmem:[%s10418_s1 + $0x49] sm:$0xff]  ;;  %v6911_v32 = vld [vmem:[%s10418_s1 + $0x51] sm:$0xff] }
 0x3cc   : >> { %7617 = vmatmul.mubr.f32.gmra.mrb[22].mxu1 %v10854_v13  ;;  %v4122_v13 = vld [vmem:[%s13354_s6 + $0x460] sm:$0xff]  ;;  %v6912_v54 = vld [vmem:[%s10418_s1 + $0x69] sm:$0xff] }
 0x3cd   : >> { %7993 = vmatmul.mubr.f32.gmra.mrb[6].mxu0 %v6885_v57  ;;  %7619 = vmatprep.mubr.f32.mxu1 %v10860_v7  ;;  %v8423_v7 = vpack.c.bf16 %v4123_v27, %v4122_v13  ;;  %v13830_v57 = vld [vmem:[#allocation100_spill] sm:$0xff]  ;;  %v6927_v13 = vld [vmem:[%s10418_s1 + $0x151] sm:$0xff] }
 0x3ce   : >> { %7995 = vmatprep.mubr.f32.mxu0 %v10570_v24  ;;  %8414 = vmatpush3.bf16.msra.mxu0 %v8411_v63  ;;  %v6889_v24 = vld [vmem:[%s10418_s1 + $0xf0] sm:$0xff] }
 0x3cf   : >> { %8416 = vmatprep.subr.bf16.mxu0 %v8415_v6  ;;  %v13829_v63 = vld [vmem:[#allocation123_spill] sm:$0xff] }
 0x3d0   : >> { %7620 = vmatmul.mubr.f32.gmra.mrb[24].mxu1 %v10876_v17  ;;  %v4124_v17 = vld [vmem:[%s13354_s6 + $0x470] sm:$0xff] }
 0x3d1   : >> { %7996 = vmatmul.mubr.f32.gmra.mrb[8].mxu0 %v6887_v53  ;;  %7622 = vmatprep.mubr.f32.mxu1 %v10882_v49  ;;  %v8427_v49 = vpack.c.bf16 %v4125_v2, %v4124_v17  ;;  %v6913_v53 = vld [vmem:[%s10418_s1 + $0x71] sm:$0xff] }
 0x3d2   : >> { %7998 = vmatprep.mubr.f32.mxu0 %v6888_v38  ;;  %8418 = vmatpush3.bf16.msra.mxu0 %v8415_v6  ;;  %v13831_v6 = vld [vmem:[#allocation124_spill] sm:$0xff]  ;;  %v6914_v38 = vld [vmem:[%s10418_s1 + $0x89] sm:$0xff]  ;;  %v6931_v2 = vld [vmem:[%s10418_s1 + $0x191] sm:$0xff] }
 0x3d3   : >> { %8420 = vmatprep.subr.bf16.mxu0 %v8419_v60  ;;  %v6801_v27 = vld [vmem:[%s10418_s1 + $0x150] sm:$0xff] }
 0x3d4   : >> { %7623 = vmatmul.mubr.f32.gmra.mrb[26].mxu1 %v10898_v36  ;;  %v13812_v36 = vld [vmem:[#allocation105_spill] sm:$0xff]  ;;  %v6803_v17 = vld [vmem:[%s10418_s1 + $0x170] sm:$0xff] }
 0x3d5   : >> { %7999 = vmatmul.mubr.f32.gmra.mrb[10].mxu0 %v6889_v24  ;;  %7625 = vmatprep.mubr.f32.mxu1 %v10904_v29  ;;  %v13801_v29 = vld [vmem:[#allocation111_spill] sm:$0xff] }
 0x3d6   : >> { %8001 = vmatprep.mubr.f32.mxu0 %v10602_v31  ;;  %8422 = vmatpush3.bf16.msra.mxu0 %v8419_v60  ;;  %v13802_v31 = vld [vmem:[#allocation101_spill] sm:$0xff]  ;;  %v6929_v24 = vld [vmem:[%s10418_s1 + $0x171] sm:$0xff] }
 0x3d7   : >> { %8424 = vmatprep.subr.bf16.mxu0 %v8423_v7  ;;  %v6916_v60 = vld [vmem:[%s10418_s1 + $0xa9] sm:$0xff] }
 0x3d8   : >> { %7626 = vmatmul.mubr.f32.gmra.mrb[28].mxu1 %v10920_v20  ;;  %v13813_v20 = vld [vmem:[#allocation96_spill] sm:$0xff] }
 0x3d9   : >> { %8002 = vmatmul.mubr.f32.gmra.mrb[12].mxu0 %v10618_v11  ;;  %7628 = vmatprep.mubr.f32.mxu1 %v10926_v0  ;;  %v13803_v11 = vld [vmem:[#allocation94_spill] sm:$0xff]  ;;  %v13806_v0 = vld [vmem:[#allocation113_spill] sm:$0xff] }
 0x3da   : >> { %8004 = vmatprep.mubr.f32.mxu0 %v10638_v42  ;;  %8426 = vmatpush3.bf16.msra.mxu0 %v8423_v7  ;;  %v13804_v42 = vld [vmem:[#allocation112_spill] sm:$0xff]  ;;  %v6930_v7 = vld [vmem:[%s10418_s1 + $0x189] sm:$0xff] }
 0x3db   : >> { %8428 = vmatprep.subr.bf16.mxu0 %v8427_v49 }
 0x3dc   : >> { %7629 = vmatmul.mubr.f32.gmra.mrb[30].mxu1 %v10942_v4  ;;  %v13814_v4 = vld [vmem:[#allocation116_spill] sm:$0xff] }
 0x3dd   : >> { %8005 = vmatmul.mubr.f32.gmra.mrb[14].mxu0 %v10654_v1  ;;  %7663 = vmatprep.mubr.f32.mxu1 %v10812_v33  ;;  %v13805_v1 = vld [vmem:[#allocation102_spill] sm:$0xff]  ;;  %v13808_v33 = vld [vmem:[#allocation95_spill] sm:$0xff] }
 0x3de   : >> { %8007 = vmatprep.mubr.f32.mxu0 %v10661_v55  ;;  %8430 = vmatpush3.bf16.msra.mxu0 %v8427_v49  ;;  %v13807_v55 = vld [vmem:[#allocation103_spill] sm:$0xff]  ;;  %v6804_v49 = vld [vmem:[%s10418_s1 + $0x188] sm:$0xff] }
 0x3e0   : >> { %7664 = vmatmul.mubr.f32.vlgmr.msra.gmra.mrb[0].mxu1 %v10827_v58  ;;  %v13811_v58 = vld [vmem:[#allocation115_spill] sm:$0xff] }
 0x3e1   : >> { %8008 = vmatmul.mubr.f32.gmra.mrb[16].mxu0 %v10676_v18  ;;  %8439 = vmatpush3.bf16.msra.mxu1 %v10368_v56  ;;  %v13809_v18 = vld [vmem:[#allocation114_spill] sm:$0xff]  ;;  %v13810_v56 = vld [vmem:[#allocation104_spill] sm:$0xff] }
 0x3e2   : >> { %7666 = vmatprep.mubr.f32.mxu1 %v13801_v29  ;;  %8010 = vmatprep.mubr.f32.mxu0 %v13802_v31  ;;  %v6932_v29 = vld [vmem:[%s10418_s1 + $0x1a9] sm:$0xff] }
 0x3e3   : >> { %8432 = vmatprep.subr.bf16.mxu1 %v13803_v11  ;;  %v6805_v31 = vld [vmem:[%s10418_s1 + $0x190] sm:$0xff] }
 0x3e4   : >> { %7667 = vmatmul.mubr.f32.gmra.mrb[2].mxu1 %v13804_v42  ;;  %v6806_v42 = vld [vmem:[%s10418_s1 + $0x1a8] sm:$0xff] }
 0x3e5   : >> { %8011 = vmatmul.mubr.f32.gmra.mrb[18].mxu0 %v13805_v1  ;;  %7669 = vmatprep.mubr.f32.mxu1 %v13806_v0  ;;  %v6934_v1 = vld [vmem:[%s10418_s1 + $0x1c9] sm:$0xff] }
 0x3e6   : >> { %8013 = vmatprep.mubr.f32.mxu0 %v13807_v55  ;;  %8440 = vmatpush3.bf16.msra.mxu1 %v13803_v11  ;;  %v6933_v11 = vld [vmem:[%s10418_s1 + $0x1b1] sm:$0xff] }
 0x3e7   : >> { %8433 = vmatprep.subr.bf16.mxu1 %v13808_v33  ;;  %v6807_v0 = vld [vmem:[%s10418_s1 + $0x1b0] sm:$0xff] }
 0x3e8   : >> { %7670 = vmatmul.mubr.f32.gmra.mrb[4].mxu1 %v13809_v18  ;;  %v6935_v55 = vld [vmem:[%s10418_s1 + $0x1d1] sm:$0xff]  ;;  %v6936_v18 = vld [vmem:[%s10418_s1 + $0x1e9] sm:$0xff] }
 0x3e9   : >> { %8014 = vmatmul.mubr.f32.gmra.mrb[20].mxu0 %v13810_v56  ;;  %7672 = vmatprep.mubr.f32.mxu1 %v13811_v58  ;;  %v6809_v56 = vld [vmem:[%s10418_s1 + $0x1d0] sm:$0xff] }
 0x3ea   : >> { %8016 = vmatprep.mubr.f32.mxu0 %v13812_v36  ;;  %8441 = vmatpush3.bf16.msra.mxu1 %v13808_v33  ;;  %v6808_v33 = vld [vmem:[%s10418_s1 + $0x1c8] sm:$0xff]  ;;  %v6937_v58 = vld [vmem:[%s10418_s1 + $0x1f1] sm:$0xff] }
 0x3eb   : >> { %8434 = vmatprep.subr.bf16.mxu1 %v13813_v20  ;;  %v6810_v36 = vld [vmem:[%s10418_s1 + $0x1e8] sm:$0xff] }
 0x3ec   : >> { %7673 = vmatmul.mubr.f32.gmra.mrb[6].mxu1 %v13814_v4  ;;  %v6811_v4 = vld [vmem:[%s10418_s1 + $0x1f0] sm:$0xff] }
 0x3ed   : >> { %8017 = vmatmul.mubr.f32.gmra.mrb[22].mxu0 %v13815_v15  ;;  %7675 = vmatprep.mubr.f32.mxu1 %v13816_v51  ;;  %v6939_v15 = vld [vmem:[%s10418_s1 + $0x211] sm:$0xff]  ;;  %v6940_v51 = vld [vmem:[%s10418_s1 + $0x229] sm:$0xff] }
 0x3ee   : >> { %8019 = vmatprep.mubr.f32.mxu0 %v13817_v3  ;;  %8442 = vmatpush3.bf16.msra.mxu1 %v13813_v20  ;;  %v6938_v20 = vld [vmem:[%s10418_s1 + $0x209] sm:$0xff]  ;;  %v6941_v3 = vld [vmem:[%s10418_s1 + $0x231] sm:$0xff] }
 0x3ef   : >> { %8435 = vmatprep.subr.bf16.mxu1 %v13818_v48 }
 0x3f0   : >> { %7676 = vmatmul.mubr.f32.gmra.mrb[8].mxu1 %v13819_v43 }
 0x3f1   : >> { %8020 = vmatmul.mubr.f32.gmra.mrb[24].mxu0 %v13820_v12  ;;  %7678 = vmatprep.mubr.f32.mxu1 %v13821_v9 }
 0x3f2   : >> { %8022 = vmatprep.mubr.f32.mxu0 %v13822_v30  ;;  %8443 = vmatpush3.bf16.msra.mxu1 %v13818_v48 }
 0x3f3   : >> { %8436 = vmatprep.subr.bf16.mxu1 %v13823_v45 }
 0x3f4   : >> { %7679 = vmatmul.mubr.f32.gmra.mrb[10].mxu1 %v13824_v23 }
 0x3f5   : >> { %8023 = vmatmul.mubr.f32.gmra.mrb[26].mxu0 %v13825_v14  ;;  %7681 = vmatprep.mubr.f32.mxu1 %v13826_v59 }
 0x3f6   : >> { %8025 = vmatprep.mubr.f32.mxu0 %v11286_v19  ;;  %8444 = vmatpush3.bf16.msra.mxu1 %v13823_v45 }
 0x3f7   : >> { %8437 = vmatprep.subr.bf16.mxu1 %v13827_v21 }
 0x3f8   : >> { %7682 = vmatmul.mubr.f32.gmra.mrb[12].mxu1 %v13828_v5 }
 0x3f9   : >> { %8026 = vmatmul.mubr.f32.gmra.mrb[28].mxu0 %v11294_v39  ;;  %7684 = vmatprep.mubr.f32.mxu1 %v13829_v63 }
 0x3fa   : >> { %8028 = vmatprep.mubr.f32.mxu0 %v6908_v35  ;;  %8445 = vmatpush3.bf16.msra.mxu1 %v13827_v21 }
 0x3fb   : >> { %8438 = vmatprep.subr.bf16.mxu1 %v13830_v57 }
 0x3fc   : >> { %7685 = vmatmul.mubr.f32.gmra.mrb[14].mxu1 %v13831_v6 }
 0x3fd   : >> { %8029 = vmatmul.mubr.f32.gmra.mrb[30].mxu0 %v6909_v41  ;;  %7687 = vmatprep.mubr.f32.mxu1 %v10979_v16  ;;  %v6915_v16 = vld [vmem:[%s10418_s1 + $0x91] sm:$0xff] }
 0x3fe   : >> { %8063 = vmatprep.mubr.f32.mxu0 %v6910_v22  ;;  %8446 = vmatpush3.bf16.msra.mxu1 %v13830_v57 }
 0x400   : >> { %7688 = vmatmul.mubr.f32.gmra.mrb[16].mxu1 %v10992_v26  ;;  %v6917_v26 = vld [vmem:[%s10418_s1 + $0xb1] sm:$0xff] }
 0x401   : >> { %8064 = vmatmul.mubr.f32.vlgmr.msra.gmra.mrb[0].mxu0 %v6911_v32  ;;  %7690 = vmatprep.mubr.f32.mxu1 %v10997_v47  ;;  %v6918_v47 = vld [vmem:[%s10418_s1 + $0xc9] sm:$0xff] }
 0x402   : >> { %8066 = vmatprep.mubr.f32.mxu0 %v6912_v54  ;;  %v13832_v54 = vld [vmem:[#allocation92_spill] sm:$0xff] }
 0x404   : >> { %7691 = vmatmul.mubr.f32.gmra.mrb[18].mxu1 %v11009_v37  ;;  %v6919_v37 = vld [vmem:[%s10418_s1 + $0xd1] sm:$0xff] }
 0x405   : >> { %8067 = vmatmul.mubr.f32.gmra.mrb[2].mxu0 %v6913_v53  ;;  %7693 = vmatprep.mubr.f32.mxu1 %v11013_v25  ;;  %v6920_v25 = vld [vmem:[%s10418_s1 + $0xe9] sm:$0xff] }
 0x406   : >> { %8069 = vmatprep.mubr.f32.mxu0 %v6914_v38 }
 0x408   : >> { %7694 = vmatmul.mubr.f32.gmra.mrb[20].mxu1 %v11025_v62  ;;  %v6921_v62 = vld [vmem:[%s10418_s1 + $0xf1] sm:$0xff] }
 0x409   : >> { %8070 = vmatmul.mubr.f32.gmra.mrb[4].mxu0 %v6915_v16  ;;  %7696 = vmatprep.mubr.f32.mxu1 %v11029_v61  ;;  %v6922_v61 = vld [vmem:[%s10418_s1 + $0x109] sm:$0xff] }
 0x40a   : >> { %8072 = vmatprep.mubr.f32.mxu0 %v6916_v60  ;;  %v13833_v60 = vld [vmem:[#allocation93_spill] sm:$0xff] }
 0x40c   : >> { %7697 = vmatmul.mubr.f32.gmra.mrb[22].mxu1 %v11041_v10  ;;  %v6923_v10 = vld [vmem:[%s10418_s1 + $0x111] sm:$0xff] }
 0x40d   : >> { %8073 = vmatmul.mubr.f32.gmra.mrb[6].mxu0 %v6917_v26  ;;  %7699 = vmatprep.mubr.f32.mxu1 %v11045_v34  ;;  %v6925_v34 = vld [vmem:[%s10418_s1 + $0x131] sm:$0xff] }
 0x40e   : >> { %8075 = vmatprep.mubr.f32.mxu0 %v6918_v47 }
 0x410   : >> { %7700 = vmatmul.mubr.f32.gmra.mrb[24].mxu1 %v11057_v46  ;;  %v6924_v46 = vld [vmem:[%s10418_s1 + $0x129] sm:$0xff] }
 0x411   : >> { %8076 = vmatmul.mubr.f32.gmra.mrb[8].mxu0 %v6919_v37  ;;  %7702 = vmatprep.mubr.f32.mxu1 %v11061_v44  ;;  %v6926_v44 = vld [vmem:[%s10418_s1 + $0x149] sm:$0xff] }
 0x412   : >> { %8078 = vmatprep.mubr.f32.mxu0 %v6920_v25 }
 0x414   : >> { %7703 = vmatmul.mubr.f32.gmra.mrb[26].mxu1 %v11073_v52  ;;  %v6798_v52 = vld [vmem:[%s10418_s1 + $0x128] sm:$0xff] }
 0x415   : >> { %8079 = vmatmul.mubr.f32.gmra.mrb[10].mxu0 %v6921_v62  ;;  %7705 = vmatprep.mubr.f32.mxu1 %v11077_v8  ;;  %v6799_v8 = vld [vmem:[%s10418_s1 + $0x130] sm:$0xff] }
 0x416   : >> { %8081 = vmatprep.mubr.f32.mxu0 %v6922_v61 }
 0x418   : >> { %7706 = vmatmul.mubr.f32.gmra.mrb[28].mxu1 %v11089_v28  ;;  %v6800_v28 = vld [vmem:[%s10418_s1 + $0x148] sm:$0xff] }
 0x419   : >> { %8082 = vmatmul.mubr.f32.gmra.mrb[12].mxu0 %v6923_v10  ;;  %7708 = vmatprep.mubr.f32.mxu1 %v11157_v50  ;;  %v6928_v50 = vld [vmem:[%s10418_s1 + $0x169] sm:$0xff]  ;;  %v8879_v10 = vmov 1983009808  }
 0x41a   : >> { %8084 = vmatprep.mubr.f32.mxu0 %v6924_v46  ;;  %v4589_v46 = vunpack.c.l.s4 %v8879_v10 }
 0x41c   : >> { %7709 = vmatmul.mubr.f32.gmra.mrb[30].mxu1 %v11170_v40  ;;  %v6802_v40 = vld [vmem:[%s10418_s1 + $0x168] sm:$0xff]  ;;  %s8880_s1 = smov 64  }
 0x41d   : >> { %8085 = vmatmul.mubr.f32.gmra.mrb[14].mxu0 %v6925_v34  ;;  %7767 = vmatprep.mubr.f32.mxu1 %v6798_v52 }
 0x41e   : >> { %8087 = vmatprep.mubr.f32.mxu0 %v6926_v44 }
 0x420   : >> { %7768 = vmatmul.mubr.f32.vlgmr.msra.gmra.mrb[16].mxu1 %v6799_v8 }
 0x421   : >> { %8088 = vmatmul.mubr.f32.gmra.mrb[16].mxu0 %v6927_v13  ;;  %7770 = vmatprep.mubr.f32.mxu1 %v6800_v28 }
 0x422   : >> { %8090 = vmatprep.mubr.f32.mxu0 %v6928_v50 }
 0x424   : >> { %7771 = vmatmul.mubr.f32.gmra.mrb[18].mxu1 %v6801_v27 }
 0x425   : >> { %8091 = vmatmul.mubr.f32.gmra.mrb[18].mxu0 %v6929_v24  ;;  %7773 = vmatprep.mubr.f32.mxu1 %v6802_v40  ;;  %v4590_v40 = vunpack.c.0.s8 %v4589_v46 }
 0x426   : >> { %8093 = vmatprep.mubr.f32.mxu0 %v6930_v7 }
 0x428   : >> { %7774 = vmatmul.mubr.f32.gmra.mrb[20].mxu1 %v6803_v17 }
 0x429   : >> { %8094 = vmatmul.mubr.f32.gmra.mrb[20].mxu0 %v6931_v2  ;;  %7776 = vmatprep.mubr.f32.mxu1 %v6804_v49 }
 0x42a   : >> { %8096 = vmatprep.mubr.f32.mxu0 %v6932_v29 }
 0x42c   : >> { %7777 = vmatmul.mubr.f32.gmra.mrb[22].mxu1 %v6805_v31 }
 0x42d   : >> { %8097 = vmatmul.mubr.f32.gmra.mrb[22].mxu0 %v6933_v11  ;;  %7779 = vmatprep.mubr.f32.mxu1 %v6806_v42  ;;  %v13834_v42 = vld [vmem:[#allocation9_spill] sm:$0xff] }
 0x42e   : >> { %8099 = vmatprep.mubr.f32.mxu0 %v6934_v1  ;;  %v11400_v1 = vsub.s32 %v4590_v40, %v13834_v42 }
 0x430   : >> { %7780 = vmatmul.mubr.f32.gmra.mrb[24].mxu1 %v6807_v0 }
 0x431   : >> { %8100 = vmatmul.mubr.f32.gmra.mrb[24].mxu0 %v6935_v55  ;;  %7782 = vmatprep.mubr.f32.mxu1 %v6808_v33 }
 0x432   : >> { %8102 = vmatprep.mubr.f32.mxu0 %v6936_v18 }
 0x434   : >> { %7783 = vmatmul.mubr.f32.gmra.mrb[26].mxu1 %v6809_v56 }
 0x435   : >> { %8103 = vmatmul.mubr.f32.gmra.mrb[26].mxu0 %v6937_v58  ;;  %7785 = vmatprep.mubr.f32.mxu1 %v6810_v36 }
 0x436   : >> { %8105 = vmatprep.mubr.f32.mxu0 %v6938_v20 }
 0x438   : >> { %7786 = vmatmul.mubr.f32.gmra.mrb[28].mxu1 %v6811_v4 }
 0x439   : >> { %8106 = vmatmul.mubr.f32.gmra.mrb[28].mxu0 %v6939_v15  ;;  %7788 = vmatprep.mubr.f32.mxu1 %v11286_v19 }
 0x43a   : >> { %8108 = vmatprep.mubr.f32.mxu0 %v6940_v51 }
 0x43c   : >> { %7789 = vmatmul.mubr.f32.gmra.mrb[30].mxu1 %v11294_v39 }
 0x43d   : >> { %8109 = vmatmul.mubr.f32.gmra.mrb[30].mxu0 %v6941_v3 }
 0x4b3   : >> { %v7665_v48 = vpop.f32.mrb[0].mxu1 }
 0x4b4   : >> { %v2665_v43 = vpop.f32.mrb[1].mxu1 }
 0x4b7   : >> { %v7668_v12 = vpop.f32.mrb[2].mxu1 }
 0x4b8   : >> { %v2675_v9 = vpop.f32.mrb[3].mxu1 }
 0x4bb   : >> { %v7671_v30 = vpop.f32.mrb[4].mxu1 }
 0x4bc   : >> { %v2685_v45 = vpop.f32.mrb[5].mxu1 }
 0x4bf   : >> { %v7674_v23 = vpop.f32.mrb[6].mxu1 }
 0x4c0   : >> { %v11371_v14 = vpop.f32.mrb[7].mxu1 }
 0x4c3   : >> { %v11373_v59 = vpop.f32.mrb[8].mxu1 }
 0x4c4   : >> { %v11375_v35 = vpop.f32.mrb[9].mxu1 }
 0x4c7   : >> { %v11377_v21 = vpop.f32.mrb[10].mxu1 }
 0x4c8   : >> { %v11379_v19 = vpop.f32.mrb[11].mxu1 }
 0x4cb   : >> { %v11381_v5 = vpop.f32.mrb[12].mxu1 }
 0x4cc   : >> { %v11383_v39 = vpop.f32.mrb[13].mxu1 }
 0x4cf   : >> { %v11385_v63 = vpop.f32.mrb[14].mxu1 }
 0x4d0   : >> { %v11387_v41 = vpop.f32.mrb[15].mxu1 }
 0x4d4   : >> { %v8065_v22 = vpop.f32.mrb[0].mxu0 }
 0x4d5   : >> { %v8447_v57 = vadd.f32 %v8065_v22, %v7665_v48  ;;  %v4192_v6 = vpop.f32.mrb[1].mxu0 }
 0x4d6   : >> { %v8448_v32 = vadd.f32 %v4192_v6, %v2665_v43 }
 0x4d7   : >> { %v4390_v53 = vmul.f32 %v8447_v57, %v13832_v54 }
 0x4d8   : >> { %v4389_v38 = vmul.f32 %v8448_v32, %v13832_v54  ;;  %v8068_v16 = vpop.f32.mrb[2].mxu0 }
 0x4d9   : >> { %v4428_v26 = vadd.f32 %v13833_v60, %v4390_v53  ;;  %v8449_v47 = vadd.f32 %v8068_v16, %v7668_v12  ;;  %v4202_v37 = vpop.f32.mrb[3].mxu0  ;;  %v13840_v53 = vld [vmem:[#allocation10_spill] sm:$0xff] }
 0x4da   : >> { %v4427_v25 = vadd.f32 %v13833_v60, %v4389_v38  ;;  %v8450_v62 = vadd.f32 %v4202_v37, %v2675_v9 }
 0x4db   : >> { %vm4460_vm2 = vcmp.gt.f32.partialorder %v4428_v26, 0.0  ;;  %v4492_v61 = vmul.f32 0.01, %v4428_v26  ;;  %v4392_v52 = vmul.f32 %v8449_v47, %v13832_v54 }
 0x4dc   : >> { %vm4459_vm3 = vcmp.gt.f32.partialorder %v4427_v25, 0.0  ;;  %v4491_v34 = vmul.f32 0.01, %v4427_v25  ;;  %v4391_v44 = vmul.f32 %v8450_v62, %v13832_v54  ;;  %v8071_v8 = vpop.f32.mrb[4].mxu0 }
 0x4dd   : >> { %v4524_v13 = vsel %vm4460_vm2, %v4428_v26, %v4492_v61  ;;  %v8451_v28 = vadd.f32 %v8071_v8, %v7671_v30  ;;  %v4212_v50 = vpop.f32.mrb[5].mxu0  ;;  %v4430_v2 = vadd.f32 %v13833_v60, %v4392_v52 }
 0x4de   : >> { %v6487_v27 = vsel %vm481_vm0, %v4524_v13, 0.0  ;;  %v4523_v24 = vsel %vm4459_vm3, %v4427_v25, %v4491_v34  ;;  %v4429_v49 = vadd.f32 %v13833_v60, %v4391_v44  ;;  %v8452_v56 = vadd.f32 %v4212_v50, %v2685_v45 }
 0x4df   : >> { %v6486_v7 = vsel %vm481_vm0, %v4523_v24, 0.0  ;;  %vm4462_vm5 = vcmp.gt.f32.partialorder %v4430_v2, 0.0  ;;  %v4494_v0 = vmul.f32 0.01, %v4430_v2  ;;  %v4394_v18 = vmul.f32 %v8451_v28, %v13832_v54 }
 0x4e0   : >> { %v6488_v17 = vadd.f32 %v6487_v27, %v6486_v7  ;;  %v8074_v29 = vpop.f32.mrb[6].mxu0  ;;  %vm4461_vm4 = vcmp.gt.f32.partialorder %v4429_v49, 0.0  ;;  %v4493_v11 = vmul.f32 0.01, %v4429_v49  ;;  %v4604_v20 = vcombine.high %v4524_v13, %v4524_v13 }
 0x4e1   : >> { %v4222_v31 = vpop.f32.mrb[7].mxu0  ;;  %v8453_v58 = vadd.f32 %v8074_v29, %v7674_v23  ;;  %v4587_v4 = vcombine.high %v4523_v24, %v4523_v24  ;;  %v11404_v15 = vrot.slane %v4523_v24, %v11400_v1  ;;  %v4393_v3 = vmul.f32 %v8452_v56, %v13832_v54 }
 0x4e2   : >> { %v4525_v33 = vsel %vm4461_vm4, %v4429_v49, %v4493_v11  ;;  %v4526_v48 = vsel %vm4462_vm5, %v4430_v2, %v4494_v0  ;;  %v4432_v9 = vadd.f32 %v13833_v60, %v4394_v18  ;;  %v11411_v45 = vrot.slane %v4524_v13, %v11400_v1  ;;  %v13841_v13 = vld [vmem:[#allocation11_spill] sm:$0xff] }
 0x4e3   : >> { %13835 = vst [vmem:[#allocation111_spill] sm:$0xff] %v11404_v15  ;;  %v6489_v51 = vsel %vm481_vm0, %v4525_v33, 0.0  ;;  %v4431_v30 = vadd.f32 %v13833_v60, %v4393_v3  ;;  %v11414_v23 = vrot.slane %v4604_v20, %v11400_v1  ;;  %v11417_v57 = vrot.slane %v4587_v4, %v11400_v1 }
 0x4e4   : >> { %v8077_v55 = vpop.f32.mrb[8].mxu0  ;;  %v6490_v12 = vadd.f32 %v6489_v51, %v6488_v17  ;;  %13836 = vst [vmem:[#allocation101_spill] sm:$0xff] %v11411_v45  ;;  %v11421_v6 = vcombine.high %v11404_v15, %v11404_v15  ;;  %v6491_v32 = vsel %vm481_vm0, %v4526_v48, 0.0  ;;  %v4496_v37 = vmul.f32 0.01, %v4432_v9 }
 0x4e5   : >> { %v4232_v36 = vpop.f32.mrb[9].mxu0  ;;  %13837 = vst [vmem:[#allocation94_spill] sm:$0xff] %v11414_v23  ;;  %13838 = vst [vmem:[#allocation112_spill] sm:$0xff] %v11417_v57  ;;  %vm4463_vm6 = vcmp.gt.f32.partialorder %v4431_v30, 0.0  ;;  %v4495_v16 = vmul.f32 0.01, %v4431_v30  ;;  %v8454_v25 = vadd.f32 %v4222_v31, %v11371_v14  ;;  %v8455_v62 = vadd.f32 %v8077_v55, %v11373_v59 }
 0x4e6   : >> { %13839 = vst [vmem:[#allocation102_spill] sm:$0xff] %v11421_v6  ;;  %v6492_v26 = vadd.f32 %v6491_v32, %v6490_v12  ;;  %v8456_v61 = vadd.f32 %v4232_v36, %v11375_v35  ;;  %vm4464_vm7 = vcmp.gt.f32.partialorder %v4432_v9, 0.0  ;;  %v4396_v34 = vmul.f32 %v8453_v58, %v13832_v54 }
 0x4e7   : >> { %v11431_v46 = vsel %vm4463_vm6, %v4431_v30, %v4495_v16  ;;  %v4638_v44 = vcombine.high %v4526_v48, %v4526_v48  ;;  %v11436_v8 = vrot.slane %v4526_v48, %v11400_v1  ;;  %v4395_v59 = vmul.f32 %v8454_v25, %v13832_v54 }
 0x4e8   : >> { %v8080_v43 = vpop.f32.mrb[10].mxu0  ;;  %v6493_v14 = vsel %vm481_vm0, %v11431_v46, 0.0  ;;  %v4621_v28 = vcombine.high %v4525_v33, %v4525_v33  ;;  %v11444_v50 = vrot.slane %v4525_v33, %v11400_v1  ;;  %v4528_v7 = vsel %vm4464_vm7, %v4432_v9, %v4496_v37 }
 0x4e9   : >> { %v4242_v22 = vpop.f32.mrb[11].mxu0  ;;  %v8457_v52 = vadd.f32 %v8080_v43, %v11377_v21  ;;  %v6494_v27 = vadd.f32 %v6493_v14, %v6492_v26  ;;  %v11450_v21 = vcombine.high %v11417_v57, %v11417_v57  ;;  %v4397_v17 = vmul.f32 %v8456_v61, %v13832_v54 }
 0x4ea   : >> { %v4434_v31 = vadd.f32 %v13833_v60, %v4396_v34  ;;  %v4433_v11 = vadd.f32 %v13833_v60, %v4395_v59  ;;  %v11466_v0 = vrot.slane %v4638_v44, %v11400_v1  ;;  %v4398_v33 = vmul.f32 %v8455_v62, %v13832_v54 }
 0x4eb   : >> { %13842 = vst [vmem:[#allocation113_spill] sm:$0xff] %v11450_v21  ;;  %v11474_v56 = vrot.slane %v4621_v28, %v11400_v1  ;;  %v11478_v58 = vcombine.high %v11444_v50, %v11444_v50  ;;  %v6495_v36 = vsel %vm481_vm0, %v4528_v7, 0.0  ;;  %v4435_v43 = vadd.f32 %v13833_v60, %v4397_v17 }
 0x4ec   : >> { %v8083_v47 = vpop.f32.mrb[12].mxu0  ;;  %13843 = vst [vmem:[#allocation103_spill] sm:$0xff] %v11466_v0  ;;  %vm4465_vm8 = vcmp.gt.f32.partialorder %v4433_v11, 0.0  ;;  %v4497_v3 = vmul.f32 0.01, %v4433_v11  ;;  %v6496_v48 = vadd.f32 %v6495_v36, %v6494_v27  ;;  %v8458_v32 = vadd.f32 %v4242_v22, %v11379_v19 }
 0x4ed   : >> { %v11429_v10 = vpop.f32.mrb[13].mxu0  ;;  %13844 = vst [vmem:[#allocation95_spill] sm:$0xff] %v11474_v56  ;;  %13845 = vst [vmem:[#allocation114_spill] sm:$0xff] %v11478_v58  ;;  %v4498_v30 = vmul.f32 0.01, %v4434_v31  ;;  %v11494_v16 = vadd.f32 %v8083_v47, %v11381_v5  ;;  %v4655_v26 = vcombine.high %v11431_v46, %v11431_v46  ;;  %vm4466_vm9 = vcmp.gt.f32.partialorder %v4434_v31, 0.0 }
 0x4ee   : >> { %v4529_v37 = vsel %vm4465_vm8, %v4433_v11, %v4497_v3  ;;  %v4436_v25 = vadd.f32 %v13833_v60, %v4398_v33  ;;  %v11503_v61 = vrot.slane %v11431_v46, %v11400_v1  ;;  %vm4467_vm10 = vcmp.gt.f32.partialorder %v4435_v43, 0.0 }
 0x4ef   : >> { %v6497_v34 = vsel %vm481_vm0, %v4529_v37, 0.0  ;;  %v4499_v19 = vmul.f32 0.01, %v4435_v43  ;;  %v11512_v47 = vcombine.high %v11474_v56, %v11474_v56  ;;  %v4672_v44 = vcombine.high %v4528_v7, %v4528_v7 }
 0x4f0   : >> { %v11446_v24 = vpop.f32.mrb[14].mxu0  ;;  %13846 = vst [vmem:[#allocation104_spill] sm:$0xff] %v11503_v61  ;;  %v6498_v14 = vadd.f32 %v6497_v34, %v6496_v48  ;;  %v4400_v59 = vmul.f32 %v8457_v52, %v13832_v54  ;;  %v4530_v11 = vsel %vm4466_vm9, %v4434_v31, %v4498_v30  ;;  %v4500_v36 = vmul.f32 0.01, %v4436_v25 }
 0x4f1   : >> { %v11455_v2 = vpop.f32.mrb[15].mxu0  ;;  %13847 = vst [vmem:[#allocation115_spill] sm:$0xff] %v11512_v47  ;;  %v11526_v3 = vsel %vm4467_vm10, %v4435_v43, %v4499_v19  ;;  %v4399_v52 = vmul.f32 %v8458_v32, %v13832_v54  ;;  %v11532_v34 = vrot.slane %v4528_v7, %v11400_v1  ;;  %v11535_v27 = vrot.slane %v4655_v26, %v11400_v1 }
 0x4f2   : >> { %v11539_v46 = vcombine.high %v11503_v61, %v11503_v61  ;;  %vm4468_vm11 = vcmp.gt.f32.partialorder %v4436_v25, 0.0  ;;  %v11546_v43 = vrot.slane %v4672_v44, %v11400_v1  ;;  %v6499_v7 = vsel %vm481_vm0, %v4530_v11, 0.0 }
 0x4f3   : >> { %v11471_v18 = vpop.f32.mrb[16].mxu1  ;;  %13848 = vst [vmem:[#allocation105_spill] sm:$0xff] %v11532_v34  ;;  %v4438_v26 = vadd.f32 %v13833_v60, %v4400_v59  ;;  %v4689_v51 = vcombine.high %v4529_v37, %v4529_v37  ;;  %v11555_v49 = vrot.slane %v4529_v37, %v11400_v1  ;;  %v6500_v40 = vadd.f32 %v6499_v7, %v6498_v14 }
 0x4f4   : >> { %v11481_v20 = vpop.f32.mrb[16].mxu0  ;;  %v11483_v4 = vpop.f32.mrb[17].mxu1  ;;  %v6501_v38 = vsel %vm481_vm0, %v11526_v3, 0.0  ;;  %v4706_v55 = vcombine.high %v4530_v11, %v4530_v11  ;;  %v4532_v32 = vsel %vm4468_vm11, %v4436_v25, %v4500_v36  ;;  %v4437_v33 = vadd.f32 %v13833_v60, %v4399_v52 }
 0x4f5   : >> { %v11488_v12 = vpop.f32.mrb[17].mxu0  ;;  %v11566_v59 = vcombine.high %v11535_v27, %v11535_v27  ;;  %v11571_v14 = vrot.slane %v4530_v11, %v11400_v1  ;;  %v6502_v7 = vadd.f32 %v6501_v38, %v6500_v40  ;;  %v4502_v42 = vmul.f32 0.01, %v4438_v26 }
 0x4f6   : >> { %v11586_v11 = vrot.slane %v4689_v51, %v11400_v1  ;;  %v11590_v38 = vcombine.high %v11555_v49, %v11555_v49  ;;  %v6503_v40 = vsel %vm481_vm0, %v4532_v32, 0.0  ;;  %vm4470_vm14 = vcmp.gt.f32.partialorder %v4438_v26, 0.0 }
 0x4f7   : >> { %v11499_v62 = vpop.f32.mrb[18].mxu1  ;;  %13852 = vst [vmem:[#allocation117_spill] sm:$0xff] %v11566_v59  ;;  %13853 = vst [vmem:[#allocation107_spill] sm:$0xff] %v11571_v14  ;;  %v4723_v25 = vcombine.high %v11526_v3, %v11526_v3  ;;  %vm4469_vm2 = vcmp.gt.f32.partialorder %v4437_v33, 0.0  ;;  %v4501_v52 = vmul.f32 0.01, %v4437_v33  ;;  %v6504_v36 = vadd.f32 %v6503_v40, %v6502_v7 }
 0x4f8   : >> { %v11506_v22 = vpop.f32.mrb[18].mxu0  ;;  %v11508_v5 = vpop.f32.mrb[19].mxu1  ;;  %13857 = vst [vmem:[#allocation119_spill] sm:$0xff] %v11586_v11  ;;  %13858 = vst [vmem:[#allocation109_spill] sm:$0xff] %v11590_v38  ;;  %vm5649_vm3 = vcmask 1044484   ;;  %v11598_v51 = vrot.slane %v4706_v55, %v11400_v1  ;;  %vm5651_vm4 = vcmask 1045509   ;;  %v4740_v55 = vcombine.high %v4532_v32, %v4532_v32 }
 0x4f9   : >> { %v11515_v28 = vpop.f32.mrb[19].mxu0  ;;  %v11617_v35 = vsel %vm4469_vm2, %v4437_v33, %v4501_v52  ;;  %vm5653_vm5 = vcmask 1046534   ;;  %vm5655_vm6 = vcmask 1047559   ;;  %v4402_v40 = vmul.f32 %v11494_v16, %v13832_v54 }
 0x4fa   : >> { %13860 = vst [vmem:[#allocation120_spill] sm:$0xff] %v11598_v51  ;;  %v5793_v16 = vrot.slane %v11450_v21, %v13841_v13 }
 0x4fb   : >> { %v11529_v48 = vpop.f32.mrb[20].mxu1 }
 0x4fc   : >> { %v11541_v31 = vpop.f32.mrb[20].mxu0  ;;  %v11543_v30 = vpop.f32.mrb[21].mxu1 }
 0x4fd   : >> { %13849 = vst [vmem:[#allocation96_spill] sm:$0xff] %v11543_v30  ;;  %v11552_v19 = vpop.f32.mrb[21].mxu0 }
 0x4fe   : >> { %13850 = vst [vmem:[#allocation116_spill] sm:$0xff] %v11552_v19  ;;  %v8460_v19 = vadd.f32 %v11429_v10, %v11383_v39  ;;  %v4440_v10 = vadd.f32 %v13833_v60, %v4402_v40  ;;  %v8461_v39 = vadd.f32 %v11446_v24, %v11385_v63  ;;  %v5805_v24 = vrot.slane %v11414_v23, %v13841_v13 }
 0x4ff   : >> { %v11562_v17 = vpop.f32.mrb[22].mxu1 }
 0x500   : >> { %13851 = vst [vmem:[#allocation106_spill] sm:$0xff] %v11562_v17  ;;  %v11573_v9 = vpop.f32.mrb[22].mxu0  ;;  %v11575_v44 = vpop.f32.mrb[23].mxu1  ;;  %v11623_v17 = vcombine.high %v11586_v11, %v11586_v11  ;;  %v4401_v21 = vmul.f32 %v8460_v19, %v13832_v54  ;;  %vm4472_vm8 = vcmp.gt.f32.partialorder %v4440_v10, 0.0 }
 0x501   : >> { %13854 = vst [vmem:[#allocation97_spill] sm:$0xff] %v11573_v9  ;;  %13855 = vst [vmem:[#allocation118_spill] sm:$0xff] %v11575_v44  ;;  %v11583_v37 = vpop.f32.mrb[23].mxu0  ;;  %v11606_v44 = vcombine.high %v11411_v45, %v11411_v45 }
 0x502   : >> { %13856 = vst [vmem:[#allocation108_spill] sm:$0xff] %v11583_v37  ;;  %13865 = vst [vmem:[#allocation123_spill] sm:$0xff] %v11623_v17 }
 0x503   : >> { %v11595_v29 = vpop.f32.mrb[24].mxu1  ;;  %13861 = vst [vmem:[#allocation110_spill] sm:$0xff] %v11606_v44 }
 0x504   : >> { %13859 = vst [vmem:[#allocation98_spill] sm:$0xff] %v11595_v29  ;;  %v11608_v9 = vpop.f32.mrb[24].mxu0  ;;  %v11610_v7 = vpop.f32.mrb[25].mxu1  ;;  %v11615_v29 = vsel %vm4470_vm14, %v4438_v26, %v4502_v42  ;;  %v6505_v42 = vsel %vm481_vm0, %v11617_v35, 0.0  ;;  %v11637_v26 = vrot.slane %v4723_v25, %v11400_v1 }
 0x505   : >> { %13862 = vst [vmem:[#allocation121_spill] sm:$0xff] %v11608_v9  ;;  %13863 = vst [vmem:[#allocation99_spill] sm:$0xff] %v11610_v7  ;;  %v11619_v37 = vpop.f32.mrb[25].mxu0  ;;  %v11626_v9 = vrot.slane %v4532_v32, %v11400_v1  ;;  %v11630_v7 = vrot.slane %v11526_v3, %v11400_v1  ;;  %v6506_v52 = vadd.f32 %v6505_v42, %v6504_v36  ;;  %v6507_v33 = vsel %vm481_vm0, %v11615_v29, 0.0 }
 0x506   : >> { %13864 = vst [vmem:[#allocation122_spill] sm:$0xff] %v11619_v37  ;;  %13868 = vst [vmem:[#allocation125_spill] sm:$0xff] %v11637_v26  ;;  %v13871_v42 = vrot.slane %v11404_v15, %v13841_v13  ;;  %v13872_v3 = vrot.slane %v11421_v6, %v13841_v13  ;;  %v11716_v63 = vrot.slane %v11615_v29, %v11400_v1 }
 0x507   : >> { %13866 = vst [vmem:[#allocation100_spill] sm:$0xff] %v11626_v9  ;;  %13867 = vst [vmem:[#allocation124_spill] sm:$0xff] %v11630_v7  ;;  %v11641_v32 = vpop.f32.mrb[26].mxu1  ;;  %v11675_v15 = vcombine.high %v11630_v7, %v11630_v7 }
 0x508   : >> { %13869 = vst [vmem:[#allocation126_spill] sm:$0xff] %v11641_v32  ;;  %v11651_v25 = vpop.f32.mrb[26].mxu0  ;;  %v11653_v36 = vpop.f32.mrb[27].mxu1  ;;  %v6290_v37 = vsel %vm5643_vm12, %v13872_v3, %v13871_v42  ;;  %v6508_v32 = vadd.f32 %v6507_v33, %v6506_v52  ;;  %v11681_v3 = vcombine.high %v11637_v26, %v11637_v26  ;;  %v5797_v52 = vrot.slane %v11411_v45, %v13841_v13 }
 0x509   : >> { %13870 = vst [vmem:[#allocation127_spill] sm:$0xff] %v11651_v25  ;;  %v11666_v30 = vpop.f32.mrb[27].mxu0  ;;  %v11669_v25 = vrot.slane %v4740_v55, %v11400_v1  ;;  %13875 = vst [vmem:[#allocation130_spill] sm:$0xff] %v11675_v15  ;;  %v11688_v55 = vcombine.high %v11414_v23, %v11414_v23  ;;  %v13879_v42 = vrot.slane %v11417_v57, %v13841_v13 }
 0x50a   : >> { %13873 = vst [vmem:[#allocation128_spill] sm:$0xff] %v11666_v30  ;;  %13876 = vst [vmem:[#allocation131_spill] sm:$0xff] %v11681_v3  ;;  %v4774_v45 = vcombine.high %v11615_v29, %v11615_v29  ;;  %v5801_v57 = vrot.slane %v11606_v44, %v13841_v13 }
 0x50b   : >> { %13874 = vst [vmem:[#allocation129_spill] sm:$0xff] %v11669_v25  ;;  %13877 = vst [vmem:[#allocation132_spill] sm:$0xff] %v11688_v55  ;;  %v11690_v33 = vpop.f32.mrb[28].mxu1  ;;  %v6291_v6 = vsel %vm5645_vm13, %v13879_v42, %v6290_v37 }
 0x50c   : >> { %13878 = vst [vmem:[#allocation133_spill] sm:$0xff] %v11690_v33  ;;  %v11701_v40 = vpop.f32.mrb[28].mxu0  ;;  %v11703_v30 = vpop.f32.mrb[29].mxu1  ;;  %v6292_v37 = vsel %vm5647_vm15, %v5793_v16, %v6291_v6  ;;  %13883 = vst [vmem:[#allocation137_spill] sm:$0xff] %v11716_v63  ;;  %v4439_v33 = vadd.f32 %v13833_v60, %v4401_v21  ;;  %v5825_v6 = vrot.slane %v11512_v47, %v13841_v13 }
 0x50d   : >> { %13880 = vst [vmem:[#allocation134_spill] sm:$0xff] %v11701_v40  ;;  %13881 = vst [vmem:[#allocation135_spill] sm:$0xff] %v11703_v30  ;;  %v11712_v42 = vpop.f32.mrb[29].mxu0  ;;  %v6293_v19 = vsel %vm5649_vm3, %v5797_v52, %v6292_v37  ;;  %v4504_v30 = vmul.f32 0.01, %v4440_v10  ;;  %v5809_v40 = vrot.slane %v11688_v55, %v13841_v13  ;;  %v11732_v52 = vcombine.high %v11436_v8, %v11436_v8 }
 0x50e   : >> { %13882 = vst [vmem:[#allocation136_spill] sm:$0xff] %v11712_v42  ;;  %v6294_v44 = vsel %vm5651_vm4, %v5801_v57, %v6293_v19  ;;  %vm4471_vm7 = vcmp.gt.f32.partialorder %v4439_v33, 0.0  ;;  %v4503_v42 = vmul.f32 0.01, %v4439_v33  ;;  %v4404_v57 = vmul.f32 %v8461_v39, %v13832_v54 }
 0x50f   : >> { %v11727_v16 = vpop.f32.mrb[30].mxu1  ;;  %v6295_v29 = vsel %vm5653_vm5, %v5805_v24, %v6294_v44  ;;  %v13885_v19 = vrot.slane %v11444_v50, %v13841_v13  ;;  %v13886_v44 = vrot.slane %v11478_v58, %v13841_v13  ;;  %v8462_v47 = vadd.f32 %v11455_v2, %v11387_v41 }
 0x510   : >> { %v11734_v21 = vpop.f32.mrb[30].mxu0  ;;  %v11736_v37 = vpop.f32.mrb[31].mxu1  ;;  %v6296_v55 = vsel %vm5655_vm6, %v5809_v40, %v6295_v29  ;;  %v11754_v39 = vsel %vm4471_vm7, %v4439_v33, %v4503_v42  ;;  %v13887_v40 = vrot.slane %v11474_v56, %v13841_v13  ;;  %v11768_v2 = vcombine.high %v11466_v0, %v11466_v0 }
 0x511   : >> { %13884 = vst [vmem:[#allocation138_spill] sm:$0xff] %v11736_v37  ;;  %v6297_v24 = vsel %vm5643_vm12, %v13886_v44, %v13885_v19  ;;  %v11749_v23 = vpop.f32.mrb[31].mxu0  ;;  %v4757_v37 = vcombine.high %v11617_v35, %v11617_v35  ;;  %6402 = vrot.lane.b32.xlu0 %v6296_v55, %s8880_s1  ;;  %v11762_v19 = vrot.slane %v11617_v35, %v11400_v1  ;;  %v6509_v41 = vsel %vm481_vm0, %v11754_v39, 0.0 }
 0x512   : >> { %v6298_v29 = vsel %vm5645_vm13, %v13887_v40, %v6297_v24  ;;  %13889 = vst [vmem:[#allocation140_spill] sm:$0xff] %v11768_v2  ;;  %v6510_v42 = vadd.f32 %v6509_v41, %v6508_v32  ;;  %v5833_v44 = vrot.slane %v11732_v52, %v13841_v13  ;;  %v13890_v35 = vrot.slane %v11436_v8, %v13841_v13 }
 0x513   : >> { %13888 = vst [vmem:[#allocation139_spill] sm:$0xff] %v11762_v19  ;;  %v6299_v55 = vsel %vm5647_vm15, %v5825_v6, %v6298_v29  ;;  %v4536_v56 = vsel %vm4472_vm8, %v4440_v10, %v4504_v30  ;;  %v4442_v58 = vadd.f32 %v13833_v60, %v4404_v57  ;;  %v4403_v6 = vmul.f32 %v8462_v47, %v13832_v54 }
 0x514   : >> { %v6300_v24 = vsel %vm5649_vm3, %v13890_v35, %v6299_v55  ;;  %v11786_v32 = vrot.slane %v4757_v37, %v11400_v1  ;;  %v5837_v41 = vrot.slane %v11466_v0, %v13841_v13  ;;  %v11792_v55 = vrot.slane %v4774_v45, %v11400_v1 }
 0x515   : >> { %v6301_v33 = vsel %vm5651_vm4, %v5833_v44, %v6300_v24  ;;  %v11798_v47 = vcombine.high %v11762_v19, %v11762_v19  ;;  %v5841_v10 = vrot.slane %v11768_v2, %v13841_v13  ;;  %v6511_v57 = vsel %vm481_vm0, %v4536_v56, 0.0 }
 0x516   : >> { %13891 = vst [vmem:[#allocation141_spill] sm:$0xff] %v11786_v32  ;;  %13892 = vst [vmem:[#allocation142_spill] sm:$0xff] %v11792_v55  ;;  %v6302_v44 = vsel %vm5653_vm5, %v5837_v41, %v6301_v33  ;;  %v11808_v45 = vcombine.high %v11532_v34, %v11532_v34  ;;  %v4506_v35 = vmul.f32 0.01, %v4442_v58  ;;  %v4441_v40 = vadd.f32 %v13833_v60, %v4403_v6 }
 0x517   : >> { %13893 = vst [vmem:[#allocation143_spill] sm:$0xff] %v11798_v47  ;;  %v6303_v24 = vsel %vm5655_vm6, %v5841_v10, %v6302_v44  ;;  %v6512_v30 = vadd.f32 %v6511_v57, %v6510_v42  ;;  %v11814_v29 = vcombine.high %v11786_v32, %v11786_v32  ;;  %vm4474_vm9 = vcmp.gt.f32.partialorder %v4442_v58, 0.0 }
 0x518   : >> { %6404 = vrot.lane.b32.xlu0 %v6303_v24, %s8880_s1  ;;  %v5857_v33 = vrot.slane %v11566_v59, %v13841_v13  ;;  %vm4473_vm10 = vcmp.gt.f32.partialorder %v4441_v40, 0.0  ;;  %v4505_v41 = vmul.f32 0.01, %v4441_v40  ;;  %v11823_v10 = vcombine.high %v11546_v43, %v11546_v43 }
 0x519   : >> { %13894 = vst [vmem:[#allocation144_spill] sm:$0xff] %v11814_v29  ;;  %v13896_v42 = vrot.slane %v11503_v61, %v13841_v13  ;;  %v13897_v6 = vrot.slane %v11539_v46, %v13841_v13  ;;  %v5861_v44 = vrot.slane %v11532_v34, %v13841_v13  ;;  %v13898_v24 = vrot.slane %v11535_v27, %v13841_v13 }
 0x51a   : >> { %13895 = vst [vmem:[#allocation145_spill] sm:$0xff] %v11823_v10  ;;  %v8463_v59 = vadd.f32 %v11481_v20, %v11471_v18  ;;  %v8464_v2 = vadd.f32 %v11488_v12, %v11483_v4  ;;  %v11842_v61 = vsel %vm4474_vm9, %v4442_v58, %v4506_v35  ;;  %v11844_v0 = vsel %vm4473_vm10, %v4441_v40, %v4505_v41 }
 0x51b   : >> { %v6304_v57 = vsel %vm5643_vm12, %v13897_v6, %v13896_v42  ;;  %v5865_v42 = vrot.slane %v11808_v45, %v13841_v13  ;;  %v5869_v18 = vrot.slane %v11546_v43, %v13841_v13  ;;  %v4808_v35 = vcombine.high %v4536_v56, %v4536_v56 }
 0x51c   : >> { %v6305_v37 = vsel %vm5645_vm13, %v13898_v24, %v6304_v57  ;;  %v6513_v57 = vsel %vm481_vm0, %v11844_v0, 0.0  ;;  %v4406_v12 = vmul.f32 %v8463_v59, %v13832_v54  ;;  %v4405_v40 = vmul.f32 %v8464_v2, %v13832_v54 }
 0x51d   : >> { %v6306_v6 = vsel %vm5647_vm15, %v5857_v33, %v6305_v37  ;;  %v6514_v58 = vadd.f32 %v6513_v57, %v6512_v30  ;;  %v4791_v37 = vcombine.high %v11754_v39, %v11754_v39  ;;  %v6515_v33 = vsel %vm481_vm0, %v11842_v61, 0.0 }
 0x51e   : >> { %v6307_v20 = vsel %vm5649_vm3, %v5861_v44, %v6306_v6  ;;  %v5873_v41 = vrot.slane %v11823_v10, %v13841_v13  ;;  %v4444_v30 = vadd.f32 %v13833_v60, %v4406_v12  ;;  %v4443_v44 = vadd.f32 %v13833_v60, %v4405_v40 }
 0x51f   : >> { %v6308_v4 = vsel %vm5651_vm4, %v5865_v42, %v6307_v20  ;;  %v6516_v42 = vadd.f32 %v6515_v33, %v6514_v58  ;;  %v11873_v6 = vrot.slane %v4536_v56, %v11400_v1  ;;  %v11877_v57 = vrot.slane %v11754_v39, %v11400_v1 }
 0x520   : >> { %v6309_v24 = vsel %vm5653_vm5, %v5869_v18, %v6308_v4  ;;  %vm4476_vm11 = vcmp.gt.f32.partialorder %v4444_v30, 0.0  ;;  %v4508_v58 = vmul.f32 0.01, %v4444_v30  ;;  %v11883_v4 = vrot.slane %v4808_v35, %v11400_v1 }
 0x521   : >> { %13899 = vst [vmem:[#allocation146_spill] sm:$0xff] %v11873_v6  ;;  %13900 = vst [vmem:[#allocation147_spill] sm:$0xff] %v11877_v57  ;;  %v6310_v20 = vsel %vm5655_vm6, %v5873_v41, %v6309_v24  ;;  %vm4475_vm14 = vcmp.gt.f32.partialorder %v4443_v44, 0.0  ;;  %v4507_v12 = vmul.f32 0.01, %v4443_v44  ;;  %v5889_v56 = vrot.slane %v11623_v17, %v13841_v13 }
 0x522   : >> { %13901 = vst [vmem:[#allocation148_spill] sm:$0xff] %v11883_v4  ;;  %6406 = vrot.lane.b32.xlu1 %v6310_v20, %s8880_s1  ;;  %v11889_v39 = vrot.slane %v4791_v37, %v11400_v1  ;;  %v11893_v40 = vcombine.high %v11571_v14, %v11571_v14  ;;  %v13904_v33 = vrot.slane %v11555_v49, %v13841_v13 }
 0x523   : >> { %v13905_v35 = vrot.slane %v11590_v38, %v13841_v13  ;;  %v8465_v24 = vadd.f32 %v11506_v22, %v11499_v62  ;;  %v11908_v37 = vcombine.high %v11877_v57, %v11877_v57  ;;  %v11910_v59 = vsel %vm4476_vm11, %v4444_v30, %v4508_v58 }
 0x524   : >> { %13902 = vst [vmem:[#allocation149_spill] sm:$0xff] %v11889_v39  ;;  %13903 = vst [vmem:[#allocation150_spill] sm:$0xff] %v11893_v40  ;;  %v11912_v34 = vsel %vm4475_vm14, %v4443_v44, %v4507_v12  ;;  %v13907_v22 = vrot.slane %v11586_v11, %v13841_v13  ;;  %v4842_v30 = vcombine.high %v11842_v61, %v11842_v61 }
 0x525   : >> { %v6311_v41 = vsel %vm5643_vm12, %v13905_v35, %v13904_v33  ;;  %13906 = vst [vmem:[#allocation151_spill] sm:$0xff] %v11908_v37  ;;  %v6517_v62 = vsel %vm481_vm0, %v11912_v34, 0.0  ;;  %v11928_v44 = vcombine.high %v11598_v51, %v11598_v51  ;;  %v11933_v18 = vcombine.high %v11889_v39, %v11889_v39 }
 0x526   : >> { %v6312_v35 = vsel %vm5645_vm13, %v13907_v22, %v6311_v41  ;;  %v6518_v58 = vadd.f32 %v6517_v62, %v6516_v42  ;;  %v11937_v20 = vrot.slane %v11842_v61, %v11400_v1  ;;  %v6519_v41 = vsel %vm481_vm0, %v11910_v59, 0.0 }
 0x527   : >> { %13908 = vst [vmem:[#allocation152_spill] sm:$0xff] %v11928_v44  ;;  %v6313_v12 = vsel %vm5647_vm15, %v5889_v56, %v6312_v35  ;;  %13909 = vst [vmem:[#allocation153_spill] sm:$0xff] %v11933_v18  ;;  %v5897_v42 = vrot.slane %v11893_v40, %v13841_v13  ;;  %v13911_v62 = vrot.slane %v11571_v14, %v13841_v13 }
 0x528   : >> { %13910 = vst [vmem:[#allocation154_spill] sm:$0xff] %v11937_v20  ;;  %v4408_v56 = vmul.f32 %v8465_v24, %v13832_v54  ;;  %v8466_v35 = vadd.f32 %v11515_v28, %v11508_v5  ;;  %v6520_v33 = vadd.f32 %v6519_v41, %v6518_v58  ;;  %v4825_v40 = vcombine.high %v11844_v0, %v11844_v0 }
 0x529   : >> { %v6314_v22 = vsel %vm5649_vm3, %v13911_v62, %v6313_v12  ;;  %v5901_v14 = vrot.slane %v11598_v51, %v13841_v13  ;;  %v5905_v24 = vrot.slane %v11928_v44, %v13841_v13  ;;  %v11968_v62 = vcombine.high %v11626_v9, %v11626_v9 }
 0x52a   : >> { %v6315_v5 = vsel %vm5651_vm4, %v5897_v42, %v6314_v22  ;;  %v4407_v28 = vmul.f32 %v8466_v35, %v13832_v54  ;;  %v4446_v41 = vadd.f32 %v13833_v60, %v4408_v56  ;;  %v5921_v2 = vrot.slane %v11681_v3, %v13841_v13  ;;  %v13920_v3 = vld [vmem:[#allocation96_spill] sm:$0xff] }
 0x52b   : >> { %v6316_v58 = vsel %vm5653_vm5, %v5901_v14, %v6315_v5  ;;  %13912 = vst [vmem:[#allocation155_spill] sm:$0xff] %v11968_v62  ;;  %v11975_v12 = vrot.slane %v4842_v30, %v11400_v1  ;;  %v11983_v56 = vrot.slane %v11844_v0, %v11400_v1  ;;  %v11986_v35 = vrot.slane %v4825_v40, %v11400_v1 }
 0x52c   : >> { %v6317_v42 = vsel %vm5655_vm6, %v5905_v24, %v6316_v58  ;;  %v4445_v22 = vadd.f32 %v13833_v60, %v4407_v28  ;;  %v13915_v30 = vrot.slane %v11630_v7, %v13841_v13  ;;  %v13916_v24 = vrot.slane %v11675_v15, %v13841_v13 }
 0x52d   : >> { %13913 = vst [vmem:[#allocation156_spill] sm:$0xff] %v11975_v12  ;;  %13914 = vst [vmem:[#allocation157_spill] sm:$0xff] %v11983_v56  ;;  %6408 = vrot.lane.b32.xlu1 %v6317_v42, %s8880_s1  ;;  %v11998_v58 = vcombine.high %v11669_v25, %v11669_v25  ;;  %v13918_v0 = vrot.slane %v11637_v26, %v13841_v13  ;;  %vm4478_vm7 = vcmp.gt.f32.partialorder %v4446_v41, 0.0  ;;  %v4510_v42 = vmul.f32 0.01, %v4446_v41  ;;  %v13921_v26 = vld [vmem:[#allocation116_spill] sm:$0xff] }
 0x52e   : >> { %v6318_v5 = vsel %vm5643_vm12, %v13916_v24, %v13915_v30  ;;  %vm4477_vm2 = vcmp.gt.f32.partialorder %v4445_v22, 0.0  ;;  %v4509_v28 = vmul.f32 0.01, %v4445_v22  ;;  %v5929_v14 = vrot.slane %v11968_v62, %v13841_v13  ;;  %v13936_v62 = vld [vmem:[#allocation118_spill] sm:$0xff] }
 0x52f   : >> { %13917 = vst [vmem:[#allocation158_spill] sm:$0xff] %v11998_v58  ;;  %v6319_v40 = vsel %vm5645_vm13, %v13918_v0, %v6318_v5  ;;  %v13919_v30 = vrot.slane %v11626_v9, %v13841_v13  ;;  %v8467_v51 = vadd.f32 %v11541_v31, %v11529_v48  ;;  %v8468_v15 = vadd.f32 %v13921_v26, %v13920_v3  ;;  %v13937_v9 = vld [vmem:[#allocation108_spill] sm:$0xff] }
 0x530   : >> { %v6320_v61 = vsel %vm5647_vm15, %v5921_v2, %v6319_v40  ;;  %v4541_v44 = vsel %vm4477_vm2, %v4445_v22, %v4509_v28  ;;  %v12017_v5 = vcombine.high %v11983_v56, %v11983_v56  ;;  %v4859_v2 = vcombine.high %v11912_v34, %v11912_v34 }
 0x531   : >> { %v6321_v24 = vsel %vm5649_vm3, %v13919_v30, %v6320_v61  ;;  %v5933_v22 = vrot.slane %v11669_v25, %v13841_v13  ;;  %v6521_v61 = vsel %vm481_vm0, %v4541_v44, 0.0  ;;  %v4410_v31 = vmul.f32 %v8467_v51, %v13832_v54 }
 0x532   : >> { %13922 = vst [vmem:[#allocation96_spill] sm:$0xff] %v12017_v5  ;;  %v6322_v48 = vsel %vm5651_vm4, %v5929_v14, %v6321_v24  ;;  %v4409_v26 = vmul.f32 %v8468_v15, %v13832_v54  ;;  %v4876_v3 = vcombine.high %v11910_v59, %v11910_v59  ;;  %v12033_v28 = vrot.slane %v11912_v34, %v11400_v1 }
 0x533   : >> { %v4542_v40 = vsel %vm4478_vm7, %v4446_v41, %v4510_v42  ;;  %v5937_v30 = vrot.slane %v11998_v58, %v13841_v13  ;;  %v6522_v0 = vadd.f32 %v6521_v61, %v6520_v33  ;;  %v6323_v25 = vsel %vm5653_vm5, %v5933_v22, %v6322_v48 }
 0x534   : >> { %13923 = vst [vmem:[#allocation116_spill] sm:$0xff] %v12033_v28  ;;  %v4448_v14 = vadd.f32 %v13833_v60, %v4410_v31  ;;  %v4447_v51 = vadd.f32 %v13833_v60, %v4409_v26  ;;  %v12043_v15 = vcombine.high %v11986_v35, %v11986_v35  ;;  %v12049_v41 = vrot.slane %v11910_v59, %v11400_v1 }
 0x535   : >> { %v12052_v42 = vrot.slane %v4859_v2, %v11400_v1  ;;  %v6523_v33 = vsel %vm481_vm0, %v4542_v40, 0.0  ;;  %v6324_v24 = vsel %vm5655_vm6, %v5937_v30, %v6323_v25  ;;  %v12058_v61 = vcombine.high %v12033_v28, %v12033_v28 }
 0x536   : >> { %13924 = vst [vmem:[#allocation159_spill] sm:$0xff] %v12043_v15  ;;  %13925 = vst [vmem:[#allocation160_spill] sm:$0xff] %v12049_v41  ;;  %vm4480_vm8 = vcmp.gt.f32.partialorder %v4448_v14, 0.0  ;;  %v4512_v22 = vmul.f32 0.01, %v4448_v14  ;;  %6410 = vrot.lane.b32.xlu0 %v6324_v24, %s8880_s1  ;;  %vm4479_vm9 = vcmp.gt.f32.partialorder %v4447_v51, 0.0  ;;  %v6524_v31 = vadd.f32 %v6523_v33, %v6522_v0 }
 0x537   : >> { %13926 = vst [vmem:[#allocation161_spill] sm:$0xff] %v12052_v42  ;;  %13927 = vst [vmem:[#allocation162_spill] sm:$0xff] %v12058_v61  ;;  %v4511_v48 = vmul.f32 0.01, %v4447_v51  ;;  %v12068_v26 = vrot.slane %v4876_v3, %v11400_v1  ;;  %v4910_v33 = vcombine.high %v4542_v40, %v4542_v40  ;;  %v12079_v59 = vrot.slane %v4542_v40, %v11400_v1 }
 0x538   : >> { %v12074_v34 = vsel %vm4480_vm8, %v4448_v14, %v4512_v22  ;;  %v4893_v2 = vcombine.high %v4541_v44, %v4541_v44  ;;  %v12085_v3 = vcombine.high %v12052_v42, %v12052_v42  ;;  %v12090_v14 = vrot.slane %v4541_v44, %v11400_v1  ;;  %v13935_v22 = vld [vmem:[#allocation97_spill] sm:$0xff] }
 0x539   : >> { %13928 = vst [vmem:[#allocation163_spill] sm:$0xff] %v12068_v26  ;;  %v12076_v0 = vsel %vm4479_vm9, %v4447_v51, %v4511_v48  ;;  %v6527_v40 = vsel %vm481_vm0, %v12074_v34, 0.0  ;;  %v12098_v48 = vcombine.high %v11716_v63, %v11716_v63  ;;  %v5953_v24 = vrot.slane %v11814_v29, %v13841_v13 }
 0x53a   : >> { %v6525_v25 = vsel %vm481_vm0, %v12076_v0, 0.0  ;;  %13929 = vst [vmem:[#allocation164_spill] sm:$0xff] %v12085_v3  ;;  %13930 = vst [vmem:[#allocation165_spill] sm:$0xff] %v12090_v14  ;;  %v13932_v30 = vrot.slane %v11762_v19, %v13841_v13  ;;  %v13933_v44 = vrot.slane %v11798_v47, %v13841_v13  ;;  %v8470_v7 = vadd.f32 %v13937_v9, %v13936_v62 }
 0x53b   : >> { %v6526_v51 = vadd.f32 %v6525_v25, %v6524_v31  ;;  %13931 = vst [vmem:[#allocation166_spill] sm:$0xff] %v12098_v48  ;;  %v13934_v25 = vld [vmem:[#allocation106_spill] sm:$0xff]  ;;  %v12114_v17 = vrot.slane %v4910_v33, %v11400_v1  ;;  %v12119_v19 = vrot.slane %v4893_v2, %v11400_v1  ;;  %v12123_v47 = vcombine.high %v11792_v55, %v11792_v55 }
 0x53c   : >> { %v6325_v31 = vsel %vm5643_vm12, %v13933_v44, %v13932_v30  ;;  %v8469_v58 = vadd.f32 %v13935_v22, %v13934_v25  ;;  %v12127_v30 = vcombine.high %v12090_v14, %v12090_v14  ;;  %v13941_v9 = vrot.slane %v11786_v32, %v13841_v13 }
 0x53d   : >> { %v6528_v10 = vadd.f32 %v6527_v40, %v6526_v51  ;;  %13938 = vst [vmem:[#allocation106_spill] sm:$0xff] %v12114_v17  ;;  %13939 = vst [vmem:[#allocation97_spill] sm:$0xff] %v12123_v47  ;;  %v4411_v51 = vmul.f32 %v8470_v7, %v13832_v54  ;;  %v5961_v22 = vrot.slane %v12098_v48, %v13841_v13  ;;  %v13948_v48 = vld [vmem:[#allocation121_spill] sm:$0xff] }
 0x53e   : >> { %13940 = vst [vmem:[#allocation118_spill] sm:$0xff] %v12127_v30  ;;  %v6326_v62 = vsel %vm5645_vm13, %v13941_v9, %v6325_v31  ;;  %v4412_v33 = vmul.f32 %v8469_v58, %v13832_v54  ;;  %v5965_v40 = vrot.slane %v11792_v55, %v13841_v13  ;;  %v13942_v25 = vrot.slane %v11716_v63, %v13841_v13  ;;  %v13947_v55 = vld [vmem:[#allocation98_spill] sm:$0xff] }
 0x53f   : >> { %v6327_v44 = vsel %vm5647_vm15, %v5953_v24, %v6326_v62  ;;  %v4449_v7 = vadd.f32 %v13833_v60, %v4411_v51  ;;  %v5985_v9 = vrot.slane %v11933_v18, %v13841_v13  ;;  %v5969_v29 = vrot.slane %v12123_v47, %v13841_v13 }
 0x540   : >> { %v6328_v31 = vsel %vm5649_vm3, %v13942_v25, %v6327_v44  ;;  %v4450_v58 = vadd.f32 %v13833_v60, %v4412_v33  ;;  %v12155_v24 = vcombine.high %v11873_v6, %v11873_v6  ;;  %v13944_v62 = vrot.slane %v11877_v57, %v13841_v13 }
 0x541   : >> { %v6329_v2 = vsel %vm5651_vm4, %v5961_v22, %v6328_v31  ;;  %v13945_v33 = vrot.slane %v11908_v37, %v13841_v13  ;;  %vm4481_vm11 = vcmp.gt.f32.partialorder %v4449_v7, 0.0  ;;  %v4513_v22 = vmul.f32 0.01, %v4449_v7 }
 0x542   : >> { %13943 = vst [vmem:[#allocation108_spill] sm:$0xff] %v12155_v24  ;;  %v6330_v44 = vsel %vm5653_vm5, %v5965_v40, %v6329_v2  ;;  %vm4482_vm10 = vcmp.gt.f32.partialorder %v4450_v58, 0.0  ;;  %v4514_v25 = vmul.f32 0.01, %v4450_v58  ;;  %v13946_v31 = vrot.slane %v11889_v39, %v13841_v13  ;;  %v13950_v40 = vld [vmem:[#allocation99_spill] sm:$0xff] }
 0x543   : >> { %v6332_v51 = vsel %vm5643_vm12, %v13945_v33, %v13944_v62  ;;  %v6331_v47 = vsel %vm5655_vm6, %v5969_v29, %v6330_v44  ;;  %v8471_v57 = vadd.f32 %v13948_v48, %v13947_v55  ;;  %v4927_v37 = vcombine.high %v12076_v0, %v12076_v0  ;;  %v13951_v62 = vld [vmem:[#allocation122_spill] sm:$0xff] }
 0x544   : >> { %v6333_v18 = vsel %vm5645_vm13, %v13946_v31, %v6332_v51  ;;  %6412 = vrot.lane.b32.xlu1 %v6331_v47, %s8880_s1  ;;  %v12177_v2 = vcombine.high %v11883_v4, %v11883_v4  ;;  %v8472_v33 = vadd.f32 %v13951_v62, %v13950_v40  ;;  %v4944_v51 = vcombine.high %v12074_v34, %v12074_v34 }
 0x545   : >> { %v6334_v29 = vsel %vm5647_vm15, %v5985_v9, %v6333_v18  ;;  %v4546_v44 = vsel %vm4482_vm10, %v4450_v58, %v4514_v25  ;;  %v4545_v31 = vsel %vm4481_vm11, %v4449_v7, %v4513_v22  ;;  %v5993_v55 = vrot.slane %v12155_v24, %v13841_v13  ;;  %v13961_v24 = vld [vmem:[#allocation127_spill] sm:$0xff] }
 0x546   : >> { %13949 = vst [vmem:[#allocation98_spill] sm:$0xff] %v12177_v2  ;;  %v12188_v47 = vrot.slane %v12074_v34, %v11400_v1  ;;  %v12192_v48 = vrot.slane %v12076_v0, %v11400_v1  ;;  %v6529_v18 = vsel %vm481_vm0, %v4545_v31, 0.0  ;;  %v13952_v9 = vrot.slane %v11873_v6, %v13841_v13 }
 0x547   : >> { %v12201_v58 = vcombine.high %v12119_v19, %v12119_v19  ;;  %v6530_v7 = vadd.f32 %v6529_v18, %v6528_v10  ;;  %v5997_v34 = vrot.slane %v11883_v4, %v13841_v13  ;;  %v12209_v22 = vrot.slane %v4927_v37, %v11400_v1 }
 0x548   : >> { %v6335_v40 = vsel %vm5649_vm3, %v13952_v9, %v6334_v29  ;;  %v6531_v62 = vsel %vm481_vm0, %v4546_v44, 0.0  ;;  %v6001_v29 = vrot.slane %v12177_v2, %v13841_v13  ;;  %v4414_v10 = vmul.f32 %v8471_v57, %v13832_v54  ;;  %v13960_v2 = vld [vmem:[#allocation126_spill] sm:$0xff] }
 0x549   : >> { %13953 = vst [vmem:[#allocation121_spill] sm:$0xff] %v12201_v58  ;;  %v6336_v25 = vsel %vm5651_vm4, %v5993_v55, %v6335_v40  ;;  %v4413_v18 = vmul.f32 %v8472_v33, %v13832_v54  ;;  %v6532_v4 = vadd.f32 %v6531_v62, %v6530_v7  ;;  %v12220_v40 = vrot.slane %v4944_v51, %v11400_v1 }
 0x54a   : >> { %v6337_v9 = vsel %vm5653_vm5, %v5997_v34, %v6336_v25  ;;  %v12226_v0 = vcombine.high %v12192_v48, %v12192_v48  ;;  %v4452_v33 = vadd.f32 %v13833_v60, %v4414_v10  ;;  %v12235_v51 = vcombine.high %v12209_v22, %v12209_v22 }
 0x54b   : >> { %13954 = vst [vmem:[#allocation99_spill] sm:$0xff] %v12220_v40  ;;  %v6338_v57 = vsel %vm5655_vm6, %v6001_v29, %v6337_v9  ;;  %v4451_v7 = vadd.f32 %v13833_v60, %v4413_v18  ;;  %v4978_v25 = vcombine.high %v4546_v44, %v4546_v44  ;;  %v4961_v62 = vcombine.high %v4545_v31, %v4545_v31 }
 0x54c   : >> { %13955 = vst [vmem:[#allocation122_spill] sm:$0xff] %v12235_v51  ;;  %6414 = vrot.lane.b32.xlu0 %v6338_v57, %s8880_s1  ;;  %v12240_v37 = vcombine.high %v11937_v20, %v11937_v20  ;;  %v12243_v34 = vrot.slane %v4546_v44, %v11400_v1  ;;  %v6017_v9 = vrot.slane %v12043_v15, %v13841_v13  ;;  %v4516_v10 = vmul.f32 0.01, %v4452_v33  ;;  %v13962_v44 = vld [vmem:[#allocation128_spill] sm:$0xff] }
 0x54d   : >> { %vm4483_vm14 = vcmp.gt.f32.partialorder %v4451_v7, 0.0  ;;  %v4515_v29 = vmul.f32 0.01, %v4451_v7  ;;  %v13958_v18 = vrot.slane %v11983_v56, %v13841_v13  ;;  %v13959_v55 = vrot.slane %v12017_v5, %v13841_v13 }
 0x54e   : >> { %13956 = vst [vmem:[#allocation167_spill] sm:$0xff] %v12240_v37  ;;  %13957 = vst [vmem:[#allocation168_spill] sm:$0xff] %v12243_v34  ;;  %v8473_v6 = vadd.f32 %v13961_v24, %v13960_v2  ;;  %v8474_v39 = vadd.f32 %v13962_v44, %v11653_v36  ;;  %v12259_v63 = vrot.slane %v4545_v31, %v11400_v1  ;;  %vm4484_vm2 = vcmp.gt.f32.partialorder %v4452_v33, 0.0 }
 0x54f   : >> { %v6339_v57 = vsel %vm5643_vm12, %v13959_v55, %v13958_v18  ;;  %v4547_v15 = vsel %vm4483_vm14, %v4451_v7, %v4515_v29  ;;  %v13963_v32 = vrot.slane %v11986_v35, %v13841_v13  ;;  %v12270_v24 = vrot.slane %v4961_v62, %v11400_v1 }
 0x550   : >> { %v12274_v36 = vcombine.high %v11975_v12, %v11975_v12  ;;  %v12277_v2 = vrot.slane %v4978_v25, %v11400_v1  ;;  %v6533_v31 = vsel %vm481_vm0, %v4547_v15, 0.0  ;;  %v4416_v7 = vmul.f32 %v8473_v6, %v13832_v54 }
 0x551   : >> { %v6340_v56 = vsel %vm5645_vm13, %v13963_v32, %v6339_v57  ;;  %v12284_v18 = vsel %vm4484_vm2, %v4452_v33, %v4516_v10  ;;  %v6534_v62 = vadd.f32 %v6533_v31, %v6532_v4  ;;  %v6025_v57 = vrot.slane %v12240_v37, %v13841_v13 }
 0x552   : >> { %13964 = vst [vmem:[#allocation126_spill] sm:$0xff] %v12274_v36  ;;  %13965 = vst [vmem:[#allocation127_spill] sm:$0xff] %v12277_v2  ;;  %v6341_v32 = vsel %vm5647_vm15, %v6017_v9, %v6340_v56  ;;  %v12290_v44 = vcombine.high %v12259_v63, %v12259_v63  ;;  %v6029_v56 = vrot.slane %v11975_v12, %v13841_v13  ;;  %v6535_v29 = vsel %vm481_vm0, %v12284_v18, 0.0 }
 0x553   : >> { %v13966_v6 = vrot.slane %v11937_v20, %v13841_v13  ;;  %v12302_v4 = vcombine.high %v12270_v24, %v12270_v24  ;;  %v6033_v9 = vrot.slane %v12274_v36, %v13841_v13  ;;  %v12309_v31 = vcombine.high %v12049_v41, %v12049_v41 }
 0x554   : >> { %v4995_v25 = vcombine.high %v4547_v15, %v4547_v15  ;;  %v4415_v36 = vmul.f32 %v8474_v39, %v13832_v54  ;;  %v5012_v12 = vcombine.high %v12284_v18, %v12284_v18  ;;  %v12326_v37 = vrot.slane %v12284_v18, %v11400_v1 }
 0x555   : >> { %v6342_v33 = vsel %vm5649_vm3, %v13966_v6, %v6341_v32  ;;  %13967 = vst [vmem:[#allocation128_spill] sm:$0xff] %v12302_v4  ;;  %13968 = vst [vmem:[#allocation169_spill] sm:$0xff] %v12309_v31  ;;  %v4454_v32 = vadd.f32 %v13833_v60, %v4416_v7  ;;  %v12316_v6 = vrot.slane %v4547_v15, %v11400_v1 }
 0x556   : >> { %v6343_v10 = vsel %vm5651_vm4, %v6025_v57, %v6342_v33  ;;  %v6536_v57 = vadd.f32 %v6535_v29, %v6534_v62  ;;  %v6049_v15 = vrot.slane %v12085_v3, %v13841_v13  ;;  %v12334_v39 = vcombine.high %v12068_v26, %v12068_v26  ;;  %v13975_v33 = vld [vmem:[#allocation135_spill] sm:$0xff]  ;;  %v13976_v3 = vld [vmem:[#allocation136_spill] sm:$0xff] }
 0x557   : >> { %v6344_v55 = vsel %vm5653_vm5, %v6029_v56, %v6343_v10  ;;  %v4518_v7 = vmul.f32 0.01, %v4454_v32  ;;  %v13970_v29 = vrot.slane %v12033_v28, %v13841_v13  ;;  %v13971_v62 = vrot.slane %v12058_v61, %v13841_v13 }
 0x558   : >> { %v6345_v5 = vsel %vm5655_vm6, %v6033_v9, %v6344_v55  ;;  %v4453_v55 = vadd.f32 %v13833_v60, %v4415_v36  ;;  %13969 = vst [vmem:[#allocation170_spill] sm:$0xff] %v12334_v39  ;;  %vm4486_vm7 = vcmp.gt.f32.partialorder %v4454_v32, 0.0  ;;  %v13973_v9 = vld [vmem:[#allocation133_spill] sm:$0xff]  ;;  %v13974_v36 = vld [vmem:[#allocation134_spill] sm:$0xff]  ;;  %v8476_v20 = vadd.f32 %v13976_v3, %v13975_v33 }
 0x559   : >> { %6416 = vrot.lane.b32.xlu1 %v6345_v5, %s8880_s1  ;;  %v6346_v18 = vsel %vm5643_vm12, %v13971_v62, %v13970_v29  ;;  %v13972_v5 = vrot.slane %v12052_v42, %v13841_v13  ;;  %v8475_v10 = vadd.f32 %v13974_v36, %v13973_v9  ;;  %v12352_v11 = vrot.slane %v4995_v25, %v11400_v1 }
 0x55a   : >> { %v12356_v61 = vcombine.high %v12316_v6, %v12316_v6  ;;  %vm4485_vm8 = vcmp.gt.f32.partialorder %v4453_v55, 0.0  ;;  %v6057_v29 = vrot.slane %v12309_v31, %v13841_v13  ;;  %v4517_v62 = vmul.f32 0.01, %v4453_v55 }
 0x55b   : >> { %v6347_v56 = vsel %vm5645_vm13, %v13972_v5, %v6346_v18  ;;  %v4418_v5 = vmul.f32 %v8475_v10, %v13832_v54  ;;  %v4417_v9 = vmul.f32 %v8476_v20, %v13832_v54  ;;  %v4550_v36 = vsel %vm4486_vm7, %v4454_v32, %v4518_v7 }
 0x55c   : >> { %v6348_v18 = vsel %vm5647_vm15, %v6049_v15, %v6347_v56  ;;  %v6061_v3 = vrot.slane %v12068_v26, %v13841_v13  ;;  %v6065_v25 = vrot.slane %v12334_v39, %v13841_v13  ;;  %v13977_v33 = vrot.slane %v12049_v41, %v13841_v13 }
 0x55d   : >> { %v4549_v31 = vsel %vm4485_vm8, %v4453_v55, %v4517_v62  ;;  %v4456_v15 = vadd.f32 %v13833_v60, %v4418_v5  ;;  %v4455_v56 = vadd.f32 %v13833_v60, %v4417_v9  ;;  %v5046_v55 = vcombine.high %v4550_v36, %v4550_v36 }
 0x55e   : >> { %v6349_v42 = vsel %vm5649_vm3, %v13977_v33, %v6348_v18  ;;  %v5029_v20 = vcombine.high %v4549_v31, %v4549_v31  ;;  %v12375_v32 = vrot.slane %v4549_v31, %v11400_v1  ;;  %v6537_v7 = vsel %vm481_vm0, %v4549_v31, 0.0 }
 0x55f   : >> { %v6350_v28 = vsel %vm5651_vm4, %v6057_v29, %v6349_v42  ;;  %v6538_v39 = vadd.f32 %v6537_v7, %v6536_v57  ;;  %vm4488_vm9 = vcmp.gt.f32.partialorder %v4456_v15, 0.0  ;;  %v4520_v18 = vmul.f32 0.01, %v4456_v15 }
 0x560   : >> { %v6351_v10 = vsel %vm5653_vm5, %v6061_v3, %v6350_v28  ;;  %v12383_v29 = vrot.slane %v4550_v36, %v11400_v1  ;;  %v6539_v62 = vsel %vm481_vm0, %v4550_v36, 0.0  ;;  %v12388_v31 = vrot.slane %v5029_v20, %v11400_v1 }
 0x561   : >> { %v6352_v26 = vsel %vm5655_vm6, %v6065_v25, %v6351_v10  ;;  %vm4487_vm10 = vcmp.gt.f32.partialorder %v4455_v56, 0.0  ;;  %v4519_v28 = vmul.f32 0.01, %v4455_v56  ;;  %v6540_v57 = vadd.f32 %v6539_v62, %v6538_v39 }
 0x562   : >> { %6418 = vrot.lane.b32.xlu0 %v6352_v26, %s8880_s1  ;;  %v12391_v5 = vrot.slane %v5012_v12, %v11400_v1  ;;  %v12397_v3 = vcombine.high %v12375_v32, %v12375_v32  ;;  %v4552_v25 = vsel %vm4488_vm9, %v4456_v15, %v4520_v18  ;;  %v12401_v26 = vcombine.high %v12352_v11, %v12352_v11 }
 0x563   : >> { %v12410_v33 = vrot.slane %v5046_v55, %v11400_v1  ;;  %v4551_v15 = vsel %vm4487_vm10, %v4455_v56, %v4519_v28  ;;  %v12416_v7 = vcombine.high %v12079_v59, %v12079_v59  ;;  %v12420_v10 = vcombine.high %v12388_v31, %v12388_v31 }
 0x564   : >> { %13978 = vst [vmem:[#allocation133_spill] sm:$0xff] %v12391_v5  ;;  %13979 = vst [vmem:[#allocation134_spill] sm:$0xff] %v12401_v26  ;;  %v5080_v62 = vcombine.high %v4552_v25, %v4552_v25  ;;  %v12425_v9 = vrot.slane %v4552_v25, %v11400_v1  ;;  %v6541_v56 = vsel %vm481_vm0, %v4551_v15, 0.0  ;;  %v6081_v28 = vrot.slane %v12201_v58, %v13841_v13 }
 0x565   : >> { %13980 = vst [vmem:[#allocation135_spill] sm:$0xff] %v12410_v33  ;;  %v13981_v20 = vrot.slane %v12090_v14, %v13841_v13  ;;  %v13982_v12 = vrot.slane %v12127_v30, %v13841_v13  ;;  %v5063_v36 = vcombine.high %v4551_v15, %v4551_v15  ;;  %v12442_v42 = vrot.slane %v4551_v15, %v11400_v1 }
 0x566   : >> { %v12446_v55 = vcombine.high %v12114_v17, %v12114_v17  ;;  %v6542_v41 = vadd.f32 %v6541_v56, %v6540_v57  ;;  %v13984_v58 = vrot.slane %v12119_v19, %v13841_v13  ;;  %v12457_v30 = vrot.slane %v5080_v62, %v11400_v1 }
 0x567   : >> { %v6353_v18 = vsel %vm5643_vm12, %v13982_v12, %v13981_v20  ;;  %v8477_v12 = vadd.f32 %v11734_v21, %v11727_v16  ;;  %v13985_v20 = vld [vmem:[#allocation138_spill] sm:$0xff]  ;;  %v6543_v38 = vsel %vm481_vm0, %v4552_v25, 0.0  ;;  %v6089_v57 = vrot.slane %v12416_v7, %v13841_v13 }
 0x568   : >> { %13983 = vst [vmem:[#allocation136_spill] sm:$0xff] %v12446_v55  ;;  %v6354_v14 = vsel %vm5645_vm13, %v13984_v58, %v6353_v18  ;;  %v8478_v39 = vadd.f32 %v11749_v23, %v13985_v20  ;;  %v6093_v58 = vrot.slane %v12114_v17, %v13841_v13  ;;  %v12470_v21 = vrot.slane %v5063_v36, %v11400_v1 }
 0x569   : >> { %v6355_v18 = vsel %vm5647_vm15, %v6081_v28, %v6354_v14  ;;  %v4420_v16 = vmul.f32 %v8477_v12, %v13832_v54  ;;  %v12474_v62 = vcombine.high %v12442_v42, %v12442_v42  ;;  %v13986_v25 = vrot.slane %v12079_v59, %v13841_v13 }
 0x56a   : >> { %v4419_v23 = vmul.f32 %v8478_v39, %v13832_v54  ;;  %v6544_v20 = vadd.f32 %v6543_v38, %v6542_v41  ;;  %v6097_v14 = vrot.slane %v12446_v55, %v13841_v13  ;;  %v12490_v54 = vcombine.high %v12188_v47, %v12188_v47 }
 0x56b   : >> { %v6356_v56 = vsel %vm5649_vm3, %v13986_v25, %v6355_v18  ;;  %v4458_v39 = vadd.f32 %v13833_v60, %v4420_v16  ;;  %v6113_v38 = vrot.slane %v12235_v51, %v13841_v13  ;;  %v12497_v18 = vcombine.high %v12470_v21, %v12470_v21 }
 0x56c   : >> { %v6357_v28 = vsel %vm5651_vm4, %v6089_v57, %v6356_v56  ;;  %v4457_v36 = vadd.f32 %v13833_v60, %v4419_v23  ;;  %13987 = vst [vmem:[#allocation138_spill] sm:$0xff] %v12490_v54  ;;  %v13989_v23 = vrot.slane %v12192_v48, %v13841_v13  ;;  %v13990_v25 = vrot.slane %v12226_v0, %v13841_v13 }
 0x56d   : >> { %v6358_v15 = vsel %vm5653_vm5, %v6093_v58, %v6357_v28  ;;  %vm4490_vm11 = vcmp.gt.f32.partialorder %v4458_v39, 0.0  ;;  %v4522_v57 = vmul.f32 0.01, %v4458_v39  ;;  %13988 = vst [vmem:[#allocation171_spill] sm:$0xff] %v12497_v18  ;;  %v12513_v28 = vcombine.high %v12220_v40, %v12220_v40 }
 0x56e   : >> { %v6359_v41 = vsel %vm5655_vm6, %v6097_v14, %v6358_v15  ;;  %vm4489_vm14 = vcmp.gt.f32.partialorder %v4457_v36, 0.0  ;;  %v4521_v58 = vmul.f32 0.01, %v4457_v36  ;;  %v6360_v15 = vsel %vm5643_vm12, %v13990_v25, %v13989_v23 }
 0x56f   : >> { %6420 = vrot.lane.b32.xlu1 %v6359_v41, %s8880_s1  ;;  %v4554_v14 = vsel %vm4490_vm11, %v4458_v39, %v4522_v57  ;;  %13991 = vst [vmem:[#allocation172_spill] sm:$0xff] %v12513_v28  ;;  %v13992_v41 = vrot.slane %v12209_v22, %v13841_v13  ;;  %v6121_v55 = vrot.slane %v12490_v54, %v13841_v13 }
 0x570   : >> { %v5114_v12 = vcombine.high %v4554_v14, %v4554_v14  ;;  %v4553_v60 = vsel %vm4489_vm14, %v4457_v36, %v4521_v58  ;;  %v12523_v23 = vcombine.high %v12243_v34, %v12243_v34  ;;  %v13994_v36 = vrot.slane %v12188_v47, %v13841_v13 }
 0x571   : >> { %v6361_v16 = vsel %vm5645_vm13, %v13992_v41, %v6360_v15  ;;  %v5097_v25 = vcombine.high %v4553_v60, %v4553_v60  ;;  %v12526_v39 = vrot.slane %v4553_v60, %v11400_v1  ;;  %v6545_v57 = vsel %vm481_vm0, %v4553_v60, 0.0 }
 0x572   : >> { %13993 = vst [vmem:[#allocation173_spill] sm:$0xff] %v12523_v23  ;;  %v6362_v56 = vsel %vm5647_vm15, %v6113_v38, %v6361_v16  ;;  %v6546_v51 = vadd.f32 %v6545_v57, %v6544_v20  ;;  %v6125_v15 = vrot.slane %v12220_v40, %v13841_v13  ;;  %v12538_v41 = vcombine.high %v12277_v2, %v12277_v2 }
 0x573   : >> { %v6363_v58 = vsel %vm5649_vm3, %v13994_v36, %v6362_v56  ;;  %v6547_v54 = vsel %vm481_vm0, %v4554_v14, 0.0  ;;  %v12542_v17 = vrot.slane %v5097_v25, %v11400_v1  ;;  %v6129_v60 = vrot.slane %v12513_v28, %v13841_v13 }
 0x574   : >> { %13995 = vst [vmem:[#allocation174_spill] sm:$0xff] %v12538_v41  ;;  %v6145_v20 = vrot.slane %v12302_v4, %v13841_v13  ;;  %v12550_v38 = vcombine.high %v12526_v39, %v12526_v39  ;;  %v6548_v16 = vadd.f32 %v6547_v54, %v6546_v51  ;;  %v6364_v56 = vsel %vm5651_vm4, %v6121_v55, %v6363_v58 }
 0x575   : >> { %v6157_v57 = vrot.slane %v12277_v2, %v13841_v13  ;;  %v12556_v36 = vrot.slane %v4554_v14, %v11400_v1  ;;  %v12559_v25 = vrot.slane %v5114_v12, %v11400_v1  ;;  %v6153_v4 = vrot.slane %v12523_v23, %v13841_v13 }
 0x576   : >> { %v6549_v40 = vrot.slane %v6548_v16, 4  ;;  %v6365_v54 = vsel %vm5653_vm5, %v6125_v15, %v6364_v56  ;;  %v6161_v51 = vrot.slane %v12538_v41, %v13841_v13  ;;  %v13998_v55 = vrot.slane %v12259_v63, %v13841_v13 }
 0x577   : >> { %13996 = vst [vmem:[#allocation175_spill] sm:$0xff] %v12556_v36  ;;  %13997 = vst [vmem:[#allocation176_spill] sm:$0xff] %v12559_v25  ;;  %v13999_v14 = vrot.slane %v12290_v44, %v13841_v13  ;;  %v12577_v12 = vcombine.high %v12542_v17, %v12542_v17  ;;  %v6366_v58 = vsel %vm5655_vm6, %v6129_v60, %v6365_v54 }
 0x578   : >> { %v14000_v15 = vrot.slane %v12270_v24, %v13841_v13  ;;  %v12586_v28 = vcombine.high %v12326_v37, %v12326_v37  ;;  %v6265_v41 = vrot.slane %v12550_v38, %v13841_v13  ;;  %v6550_v2 = vadd.f32 %v6549_v40, %v6548_v16  ;;  %6422 = vrot.lane.b32.xlu0 %v6366_v58, %s8880_s1 }
 0x579   : >> { %v6367_v1 = vsel %vm5643_vm12, %v13999_v14, %v13998_v55  ;;  %v6177_v60 = vrot.slane %v12401_v26, %v13841_v13  ;;  %v14001_v54 = vrot.slane %v12243_v34, %v13841_v13  ;;  %v14002_v40 = vrot.slane %v12316_v6, %v13841_v13 }
 0x57a   : >> { %v6368_v56 = vsel %vm5645_vm13, %v14000_v15, %v6367_v1  ;;  %v12600_v1 = vcombine.high %v12391_v5, %v12391_v5  ;;  %v6189_v15 = vrot.slane %v12391_v5, %v13841_v13  ;;  %v6551_v58 = vrot.slane %v6550_v2, 2 }
 0x57b   : >> { %v6369_v55 = vsel %vm5647_vm15, %v6145_v20, %v6368_v56  ;;  %v14003_v20 = vrot.slane %v12356_v61, %v13841_v13  ;;  %v12618_v5 = vcombine.high %v12383_v29, %v12383_v29  ;;  %v6185_v23 = vrot.slane %v12586_v28, %v13841_v13 }
 0x57c   : >> { %v6370_v14 = vsel %vm5649_vm3, %v14001_v54, %v6369_v55  ;;  %v14004_v55 = vrot.slane %v12352_v11, %v13841_v13  ;;  %v12633_v34 = vcombine.high %v12410_v33, %v12410_v33 }
 0x57d   : >> { %v6374_v16 = vsel %vm5643_vm12, %v14003_v20, %v14002_v40  ;;  %v6371_v56 = vsel %vm5651_vm4, %v6153_v4, %v6370_v14  ;;  %v6209_v4 = vrot.slane %v12420_v10, %v13841_v13  ;;  %v6552_v14 = vadd.f32 %v6551_v58, %v6550_v2 }
 0x57e   : >> { %v6375_v54 = vsel %vm5645_vm13, %v14004_v55, %v6374_v16  ;;  %v6372_v26 = vsel %vm5653_vm5, %v6157_v57, %v6371_v56  ;;  %v14005_v16 = vrot.slane %v12326_v37, %v13841_v13  ;;  %14006 = vst [vmem:[#allocation177_spill] sm:$0xff] %v12633_v34  ;;  %v6269_v57 = vrot.slane %v12542_v17, %v13841_v13 }
 0x57f   : >> { %v6376_v40 = vsel %vm5647_vm15, %v6177_v60, %v6375_v54  ;;  %v6373_v20 = vsel %vm5655_vm6, %v6161_v51, %v6372_v26  ;;  %v6193_v60 = vrot.slane %v12600_v1, %v13841_v13  ;;  %v14007_v26 = vrot.slane %v12375_v32, %v13841_v13 }
 0x580   : >> { %v6377_v55 = vsel %vm5649_vm3, %v14005_v16, %v6376_v40  ;;  %6424 = vrot.lane.b32.xlu1 %v6373_v20, %s8880_s1  ;;  %v14008_v51 = vrot.slane %v12397_v3, %v13841_v13  ;;  %v6553_v56 = vrot.slane %v6552_v14, 1  ;;  %v6217_v40 = vrot.slane %v12618_v5, %v13841_v13 }
 0x581   : >> { %v6378_v2 = vsel %vm5651_vm4, %v6185_v23, %v6377_v55  ;;  %v14009_v23 = vrot.slane %v12388_v31, %v13841_v13 }
 0x582   : >> { %v6381_v58 = vsel %vm5643_vm12, %v14008_v51, %v14007_v26  ;;  %v6379_v54 = vsel %vm5653_vm5, %v6189_v15, %v6378_v2  ;;  %v12663_v26 = vcombine.high %v12425_v9, %v12425_v9  ;;  %v6241_v51 = vrot.slane %v12497_v18, %v13841_v13 }
 0x583   : >> { %v6382_v20 = vsel %vm5645_vm13, %v14009_v23, %v6381_v58  ;;  %v6380_v16 = vsel %vm5655_vm6, %v6193_v60, %v6379_v54  ;;  %v6554_v15 = vadd.f32 %v6553_v56, %v6552_v14  ;;  %v6221_v2 = vrot.slane %v12410_v33, %v13841_v13  ;;  %v6485_v54 = vld [vmem:[%s12650_s2] sm:$0x1] }
 0x584   : >> { %v6383_v55 = vsel %vm5647_vm15, %v6209_v4, %v6382_v20  ;;  %6426 = vrot.lane.b32.xlu0 %v6380_v16, %s8880_s1  ;;  %v6225_v58 = vrot.slane %v12633_v34, %v13841_v13  ;;  %v14010_v60 = vrot.slane %v12383_v29, %v13841_v13  ;;  %v12680_v20 = vcombine.high %v12457_v30, %v12457_v30 }
 0x585   : >> { %v14011_v14 = vrot.slane %v12442_v42, %v13841_v13  ;;  %v14012_v56 = vrot.slane %v12474_v62, %v13841_v13  ;;  %v12691_v18 = vcombine.high %v12556_v36, %v12556_v36  ;;  %v12700_v34 = vcombine.high %v12559_v25, %v12559_v25 }
 0x586   : >> { %v6384_v4 = vsel %vm5649_vm3, %v14010_v60, %v6383_v55  ;;  %v6555_v55 = vmul.f32 0.00390625, %v6554_v15  ;;  %v6273_v15 = vrot.slane %v12577_v12, %v13841_v13 }
 0x587   : >> { %v6385_v23 = vsel %vm5651_vm4, %v6217_v40, %v6384_v4  ;;  %v6388_v16 = vsel %vm5643_vm12, %v14012_v56, %v14011_v14  ;;  %14013 = vst [vmem:[#allocation178_spill] sm:$0xff] %v12691_v18  ;;  %v14014_v40 = vrot.slane %v12470_v21, %v13841_v13  ;;  %14015 = vst [vmem:[#allocation179_spill] sm:$0xff] %v12700_v34 }
 0x588   : >> { %v6386_v60 = vsel %vm5653_vm5, %v6221_v2, %v6385_v23  ;;  %v6249_v14 = vrot.slane %v12663_v26, %v13841_v13  ;;  %v6277_v2 = vrot.slane %v12556_v36, %v13841_v13  ;;  %v6556_v23 = vadd.f32 %v6555_v55, %v6485_v54  ;;  %v14018_v36 = vld [vmem:[#allocation111_spill] sm:$0xff] }
 0x589   : >> { %v6389_v4 = vsel %vm5645_vm13, %v14014_v40, %v6388_v16  ;;  %v6387_v33 = vsel %vm5655_vm6, %v6225_v58, %v6386_v60  ;;  %v6253_v16 = vrot.slane %v12457_v30, %v13841_v13  ;;  %v14016_v58 = vrot.slane %v12425_v9, %v13841_v13 }
 0x58a   : >> { %v6390_v56 = vsel %vm5647_vm15, %v6241_v51, %v6389_v4  ;;  %6428 = vrot.lane.b32.xlu1 %v6387_v33, %s8880_s1  ;;  %v6257_v51 = vrot.slane %v12680_v20, %v13841_v13  ;;  %v6281_v4 = vrot.slane %v12691_v18, %v13841_v13  ;;  %v14017_v54 = vrot.slane %v12526_v39, %v13841_v13 }
 0x58b   : >> { %v6391_v60 = vsel %vm5649_vm3, %v14016_v58, %v6390_v56  ;;  %6557 = vst.msk [vmem:[%s12650_s2] sm:$0x1] %vm1685_vm1, %v6556_v23  ;;  %v6285_v56 = vrot.slane %v12559_v25, %v13841_v13  ;;  %v6289_v58 = vrot.slane %v12700_v34, %v13841_v13  ;;  %s8776_s2 = sshll.u32 (%p1692_p11), %s8881_s18, 4  ;;  %s8777_s2 = int_to_ptr.vmem [resolvable:$false] %s8776_s2 }
 0x58c   : >> { %v6392_v40 = vsel %vm5651_vm4, %v6249_v14, %v6391_v60  ;;  %v6395_v33 = vsel %vm5643_vm12, %v6265_v41, %v14017_v54  ;;  %v14019_v41 = vrot.slane %v14018_v36, %v13840_v53  ;;  %v14020_v54 = vld [vmem:[#allocation102_spill] sm:$0xff]  ;;  %s8778_s29 = scalar_lea.vmem (%p1692_p11), %s8777_s2, 8192  ;;  %p8779_p1 = scmp.lt.s32.totalorder (%p1692_p11), %s13272_s0, %s8777_s2 }
 0x58d   : >> { %v6393_v55 = vsel %vm5653_vm5, %v6253_v16, %v6392_v40  ;;  %v6396_v14 = vsel %vm5645_vm13, %v6269_v57, %v6395_v33  ;;  %v14021_v23 = vrot.slane %v14020_v54, %v13840_v53  ;;  %v14022_v40 = vld [vmem:[#allocation113_spill] sm:$0xff] }
 0x58e   : >> { %v6394_v60 = vsel %vm5655_vm6, %v6257_v51, %v6393_v55  ;;  %v6397_v18 = vsel %vm5647_vm15, %v6273_v15, %v6396_v14  ;;  %v5146_v25 = vrot.slane %v14022_v40, %v13840_v53  ;;  %v14023_v57 = vld [vmem:[#allocation101_spill] sm:$0xff]  ;;  %v14024_v15 = vld [vmem:[#allocation110_spill] sm:$0xff]  ;;  %v14025_v55 = vld [vmem:[#allocation112_spill] sm:$0xff] }
 0x58f   : >> { %v5644_v16 = vsel %vm5643_vm12, %v14021_v23, %v14019_v41  ;;  %6430 = vrot.lane.b32.xlu0 %v6394_v60, %s8880_s1  ;;  %v6398_v13 = vsel %vm5649_vm3, %v6277_v2, %v6397_v18  ;;  %v5150_v51 = vrot.slane %v14023_v57, %v13840_v53  ;;  %v5154_v33 = vrot.slane %v14024_v15, %v13840_v53  ;;  %v6403_v41 = vpop.permute.xlu0 %6402  ;;  %v14027_v23 = vld [vmem:[#allocation94_spill] sm:$0xff]  ;;  %v14028_v18 = vld [vmem:[#allocation132_spill] sm:$0xff] }
 0x590   : >> { %v14026_v36 = vrot.slane %v14025_v55, %v13840_v53  ;;  %v6399_v54 = vsel %vm5651_vm4, %v6281_v4, %v6398_v13  ;;  %v5158_v60 = vrot.slane %v14027_v23, %v13840_v53  ;;  %v5162_v2 = vrot.slane %v14028_v18, %v13840_v53  ;;  %v14030_v55 = vld [vmem:[#allocation114_spill] sm:$0xff]  ;;  %v14032_v4 = vld [vmem:[#allocation115_spill] sm:$0xff] }
 0x591   : >> { %v6400_v57 = vsel %vm5653_vm5, %v6285_v56, %v6399_v54  ;;  %v5178_v23 = vrot.slane %v14032_v4, %v13840_v53  ;;  %v14033_v56 = vld [vmem:[#allocation95_spill] sm:$0xff] }
 0x592   : >> { %v5646_v14 = vsel %vm5645_vm13, %v14026_v36, %v5644_v16  ;;  %v14029_v16 = vrot.slane %v11444_v50, %v13840_v53  ;;  %v14031_v36 = vrot.slane %v14030_v55, %v13840_v53  ;;  %v6401_v18 = vsel %vm5655_vm6, %v6289_v58, %v6400_v57  ;;  %v14036_v57 = vld [vmem:[#allocation140_spill] sm:$0xff] }
 0x593   : >> { %v5648_v40 = vsel %vm5647_vm15, %v5146_v25, %v5646_v14  ;;  %v5182_v25 = vrot.slane %v11436_v8, %v13840_v53  ;;  %6432 = vrot.lane.b32.xlu1 %v6401_v18, %s8880_s1  ;;  %v5186_v58 = vrot.slane %v11732_v52, %v13840_v53  ;;  %v14037_v55 = vld [vmem:[#allocation104_spill] sm:$0xff]  ;;  %v14041_v18 = vld [vmem:[#allocation117_spill] sm:$0xff]  ;;  %s8772_s1 = scalar_lea.vmem (%p1692_p11), %s13272_s0, 4096 }
 0x594   : >> { %v5650_v15 = vsel %vm5649_vm3, %v5150_v51, %v5648_v40  ;;  %v5657_v13 = vsel %vm5643_vm12, %v14031_v36, %v14029_v16  ;;  %v14034_v51 = vrot.slane %v14033_v56, %v13840_v53  ;;  %v14038_v36 = vrot.slane %v14037_v55, %v13840_v53  ;;  %p8773_p12 = scmp.ne.s32.totalorder (%p1692_p11), %s13272_s0, %s8772_s1  ;;  %p8780_p2 = scmp.lt.s32.totalorder (%p1692_p11), %s8778_s29, %s8772_s1 }
 0x595   : >> { %v5652_v34 = vsel %vm5651_vm4, %v5154_v33, %v5650_v15  ;;  %v14035_v33 = vld [vmem:[#allocation103_spill] sm:$0xff]  ;;  %v5194_v15 = vrot.slane %v14036_v57, %v13840_v53  ;;  %v5366_v56 = vrot.slane %v11986_v35, %v13840_v53 }
 0x596   : >> { %v5658_v50 = vsel %vm5645_vm13, %v14034_v51, %v5657_v13  ;;  %v5654_v14 = vsel %vm5653_vm5, %v5158_v60, %v5652_v34  ;;  %v5190_v54 = vrot.slane %v14035_v33, %v13840_v53  ;;  %v14039_v34 = vrot.slane %v11539_v46, %v13840_v53  ;;  %v6405_v13 = vpop.permute.xlu0 %6404  ;;  %p8774_p13 = pnand (%p1692_p11), %p8773_p12, %p8980_p5  ;;  %p8781_p3 = por (%p1692_p11), %p8780_p2, %p8779_p1 }
 0x597   : >> { %v5659_v8 = vsel %vm5647_vm15, %v5178_v23, %v5658_v50  ;;  %v5656_v40 = vsel %vm5655_vm6, %v5162_v2, %v5654_v14  ;;  %v14040_v2 = vrot.slane %v11535_v27, %v13840_v53  ;;  %v5218_v50 = vrot.slane %v11808_v45, %v13840_v53  ;;  %v14046_v45 = vld [vmem:[#allocation119_spill] sm:$0xff] }
 0x598   : >> { %v5660_v16 = vsel %vm5649_vm3, %v5182_v25, %v5659_v8  ;;  %v5664_v52 = vsel %vm5643_vm12, %v14039_v34, %v14038_v36  ;;  %v6450_v60 = vsel %vm481_vm0, %v5656_v40, %v6403_v41  ;;  %v5210_v25 = vrot.slane %v14041_v18, %v13840_v53  ;;  %v14042_v41 = vld [vmem:[#allocation105_spill] sm:$0xff]  ;;  %v14049_v34 = vld [vmem:[#allocation116_spill] sm:$0xff]  ;;  %v14052_v18 = vld [vmem:[#allocation162_spill] sm:$0xff]  ;;  %p8775_p0 = pneg (%p1692_p11), %p8774_p13 }
 0x599   : >> { %v5661_v4 = vsel %vm5651_vm4, %v5186_v58, %v5660_v16  ;;  %v5665_v23 = vsel %vm5645_vm13, %v14040_v2, %v5664_v52  ;;  %6468 = vst [vmem:[%s12783_s21] sm:$0xff] %v6450_v60  ;;  %v5214_v51 = vrot.slane %v14042_v41, %v13840_v53  ;;  %v5222_v14 = vrot.slane %v11546_v43, %v13840_v53  ;;  %v14044_v8 = vld [vmem:[#allocation109_spill] sm:$0xff]  ;;  %v14048_v43 = vld [vmem:[#allocation123_spill] sm:$0xff] }
 0x59a   : >> { %v5662_v46 = vsel %vm5653_vm5, %v5190_v54, %v5661_v4  ;;  %v5666_v58 = vsel %vm5647_vm15, %v5210_v25, %v5665_v23  ;;  %v14043_v33 = vrot.slane %v11555_v49, %v13840_v53  ;;  %v14045_v40 = vrot.slane %v14044_v8, %v13840_v53  ;;  %v14050_v52 = vld [vmem:[#allocation145_spill] sm:$0xff]  ;;  %v6407_v4 = vpop.permute.xlu1 %6406  ;;  %v14051_v2 = vld [vmem:[#allocation107_spill] sm:$0xff]  ;;  %p8782_p4 = pnand (%p1692_p11), %p8781_p3, %p8775_p0 }
 0x59b   : >> { %v5663_v27 = vsel %vm5655_vm6, %v5194_v15, %v5662_v46  ;;  %v5667_v16 = vsel %vm5649_vm3, %v5214_v51, %v5666_v58  ;;  %v14047_v15 = vrot.slane %v14046_v45, %v13840_v53  ;;  %v5242_v36 = vrot.slane %v14048_v43, %v13840_v53  ;;  %v14053_v51 = vld [vmem:[#allocation124_spill] sm:$0xff]  ;;  %v14055_v58 = vld [vmem:[#allocation130_spill] sm:$0xff]  ;;  %v14061_v43 = vld [vmem:[#allocation165_spill] sm:$0xff] }
 0x59c   : >> { %v5671_v54 = vsel %vm5643_vm12, %v14045_v40, %v14043_v33  ;;  %v6451_v57 = vsel %vm481_vm0, %v5663_v27, %v6405_v13  ;;  %v5390_v49 = vrot.slane %v14049_v34, %v13840_v53  ;;  %v5226_v60 = vrot.slane %v14050_v52, %v13840_v53  ;;  %v14091_v34 = vld [vmem:[#allocation97_spill] sm:$0xff] }
 0x59d   : >> { %v5672_v55 = vsel %vm5645_vm13, %v14047_v15, %v5671_v54  ;;  %6469 = vst [vmem:[%s12783_s21 + $0x8] sm:$0xff] %v6451_v57  ;;  %v5668_v13 = vsel %vm5651_vm4, %v5218_v50, %v5667_v16  ;;  %v5246_v23 = vrot.slane %v14051_v2, %v13840_v53  ;;  %v5394_v25 = vrot.slane %v14052_v18, %v13840_v53  ;;  %v14057_v54 = vld [vmem:[#allocation125_spill] sm:$0xff]  ;;  %v14063_v2 = vld [vmem:[#allocation118_spill] sm:$0xff] }
 0x59e   : >> { %v5669_v46 = vsel %vm5653_vm5, %v5222_v14, %v5668_v13  ;;  %v5673_v41 = vsel %vm5647_vm15, %v5242_v36, %v5672_v55  ;;  %v14054_v27 = vrot.slane %v14053_v51, %v13840_v53  ;;  %v14056_v33 = vrot.slane %v14055_v58, %v13840_v53  ;;  %v14059_v14 = vld [vmem:[#allocation131_spill] sm:$0xff]  ;;  %v14060_v15 = vld [vmem:[#allocation161_spill] sm:$0xff] }
 0x59f   : >> { %v5670_v50 = vsel %vm5655_vm6, %v5226_v60, %v5669_v46  ;;  %v5674_v40 = vsel %vm5649_vm3, %v5246_v23, %v5673_v41  ;;  %v14058_v57 = vrot.slane %v14057_v54, %v13840_v53  ;;  %v5274_v45 = vrot.slane %v14059_v14, %v13840_v53  ;;  %v14062_v60 = vld [vmem:[#allocation150_spill] sm:$0xff]  ;;  %v14069_v14 = vld [vmem:[#allocation120_spill] sm:$0xff] }
 0x5a0   : >> { %v5678_v8 = vsel %vm5643_vm12, %v14056_v33, %v14054_v27  ;;  %v5398_v55 = vrot.slane %v14060_v15, %v13840_v53  ;;  %v5422_v36 = vrot.slane %v14061_v43, %v13840_v53  ;;  %v6452_v52 = vsel %vm481_vm0, %v5670_v50, %v6407_v4  ;;  %v14064_v27 = vld [vmem:[#allocation139_spill] sm:$0xff]  ;;  %v14068_v50 = vld [vmem:[#allocation144_spill] sm:$0xff] }
 0x5a1   : >> { %v5679_v16 = vsel %vm5645_vm13, %v14058_v57, %v5678_v8  ;;  %v5250_v13 = vrot.slane %v14062_v60, %v13840_v53  ;;  %v5426_v23 = vrot.slane %v14063_v2, %v13840_v53  ;;  %v5430_v18 = vrot.slane %v12119_v19, %v13840_v53  ;;  %6470 = vst [vmem:[%s12783_s21 + $0x10] sm:$0xff] %v6452_v52  ;;  %v14066_v33 = vld [vmem:[#allocation143_spill] sm:$0xff] }
 0x5a2   : >> { %v5454_v46 = vrot.slane %v12192_v48, %v13840_v53  ;;  %v5458_v41 = vrot.slane %v12226_v0, %v13840_v53  ;;  %v5462_v51 = vrot.slane %v12209_v22, %v13840_v53  ;;  %v14065_v58 = vrot.slane %v14064_v27, %v13840_v53  ;;  %v14072_v27 = vld [vmem:[#allocation100_spill] sm:$0xff] }
 0x5a3   : >> { %v5675_v4 = vsel %vm5651_vm4, %v5250_v13, %v5674_v40  ;;  %v14067_v8 = vrot.slane %v14066_v33, %v13840_v53  ;;  %v5306_v54 = vrot.slane %v14068_v50, %v13840_v53  ;;  %v5254_v15 = vrot.slane %v14069_v14, %v13840_v53  ;;  %v14070_v40 = vld [vmem:[#allocation141_spill] sm:$0xff]  ;;  %v14085_v13 = vld [vmem:[#allocation96_spill] sm:$0xff] }
 0x5a4   : >> { %v5680_v43 = vsel %vm5647_vm15, %v5274_v45, %v5679_v16  ;;  %v14071_v52 = vrot.slane %v14070_v40, %v13840_v53  ;;  %v14073_v45 = vld [vmem:[#allocation137_spill] sm:$0xff]  ;;  %v14076_v40 = vld [vmem:[#allocation151_spill] sm:$0xff]  ;;  %v14101_v22 = vld [vmem:[#allocation172_spill] sm:$0xff] }
 0x5a5   : >> { %v5685_v19 = vsel %vm5643_vm12, %v14067_v8, %v14065_v58  ;;  %v5278_v58 = vrot.slane %v14072_v27, %v13840_v53  ;;  %v5676_v16 = vsel %vm5653_vm5, %v5254_v15, %v5675_v4  ;;  %v5310_v50 = vrot.slane %v14073_v45, %v13840_v53  ;;  %v14079_v4 = vld [vmem:[#allocation149_spill] sm:$0xff] }
 0x5a6   : >> { %v5686_v60 = vsel %vm5645_vm13, %v14071_v52, %v5685_v19  ;;  %v14074_v19 = vld [vmem:[#allocation147_spill] sm:$0xff]  ;;  %v14077_v52 = vrot.slane %v14076_v40, %v13840_v53  ;;  %v14080_v15 = vrot.slane %v14079_v4, %v13840_v53 }
 0x5a7   : >> { %v5687_v33 = vsel %vm5647_vm15, %v5306_v54, %v5686_v60  ;;  %v14075_v14 = vrot.slane %v14074_v19, %v13840_v53  ;;  %v14078_v54 = vld [vmem:[#allocation152_spill] sm:$0xff]  ;;  %v5681_v8 = vsel %vm5649_vm3, %v5278_v58, %v5680_v43  ;;  %v14081_v40 = vld [vmem:[#allocation155_spill] sm:$0xff]  ;;  %v5554_v43 = vrot.slane %v12397_v3, %v13840_v53  ;;  %v6409_v58 = vpop.permute.xlu1 %6408 }
 0x5a8   : >> { %v5258_v60 = vrot.slane %v14078_v54, %v13840_v53  ;;  %v5688_v27 = vsel %vm5649_vm3, %v5310_v50, %v5687_v33  ;;  %v5558_v33 = vrot.slane %v12388_v31, %v13840_v53 }
 0x5a9   : >> { %v5692_v2 = vsel %vm5643_vm12, %v14077_v52, %v14075_v14  ;;  %v5282_v52 = vrot.slane %v14081_v40, %v13840_v53  ;;  %v14086_v14 = vrot.slane %v14085_v13, %v13840_v53  ;;  %v5586_v13 = vrot.slane %v12474_v62, %v13840_v53 }
 0x5aa   : >> { %v5693_v45 = vsel %vm5645_vm13, %v14080_v15, %v5692_v2  ;;  %v5677_v54 = vsel %vm5655_vm6, %v5258_v60, %v5676_v16  ;;  %v14082_v2 = vld [vmem:[#allocation166_spill] sm:$0xff]  ;;  %v14083_v15 = vld [vmem:[#allocation157_spill] sm:$0xff]  ;;  %v5582_v60 = vrot.slane %v12442_v42, %v13840_v53 }
 0x5ab   : >> { %v5314_v4 = vrot.slane %v14082_v2, %v13840_v53  ;;  %v14084_v19 = vrot.slane %v14083_v15, %v13840_v53  ;;  %v6453_v50 = vsel %vm481_vm0, %v5677_v54, %v6409_v58  ;;  %v5682_v40 = vsel %vm5651_vm4, %v5282_v52, %v5681_v8  ;;  %v14092_v54 = vld [vmem:[#allocation146_spill] sm:$0xff] }
 0x5ac   : >> { %6471 = vst [vmem:[%s12783_s21 + $0x18] sm:$0xff] %v6453_v50  ;;  %v5706_v52 = vsel %vm5643_vm12, %v5394_v25, %v5390_v49  ;;  %v5322_v49 = vrot.slane %v14091_v34, %v13840_v53  ;;  %v5438_v34 = vrot.slane %v12079_v59, %v13840_v53  ;;  %v5720_v59 = vsel %vm5643_vm12, %v5458_v41, %v5454_v46  ;;  %v14099_v41 = vld [vmem:[#allocation138_spill] sm:$0xff] }
 0x5ad   : >> { %v5699_v57 = vsel %vm5643_vm12, %v14086_v14, %v14084_v19  ;;  %v14087_v19 = vld [vmem:[#allocation129_spill] sm:$0xff]  ;;  %v5689_v58 = vsel %vm5651_vm4, %v5314_v4, %v5688_v27  ;;  %v12982_v15 = vsel %vm5645_vm13, %v5398_v55, %v5706_v52  ;;  %v5713_v55 = vsel %vm5643_vm12, %v5426_v23, %v5422_v36 }
 0x5ae   : >> { %v12956_v16 = vsel %vm5645_vm13, %v5366_v56, %v5699_v57  ;;  %v5286_v14 = vrot.slane %v14087_v19, %v13840_v53  ;;  %v14088_v56 = vld [vmem:[#allocation142_spill] sm:$0xff]  ;;  %v14089_v27 = vld [vmem:[#allocation153_spill] sm:$0xff]  ;;  %v5442_v36 = vrot.slane %v12416_v7, %v13840_v53  ;;  %v14098_v7 = vld [vmem:[#allocation136_spill] sm:$0xff]  ;;  %v5721_v48 = vsel %vm5645_vm13, %v5462_v51, %v5720_v59 }
 0x5af   : >> { %v5318_v57 = vrot.slane %v14088_v56, %v13840_v53  ;;  %v5338_v4 = vrot.slane %v14089_v27, %v13840_v53  ;;  %v14090_v19 = vld [vmem:[#allocation158_spill] sm:$0xff]  ;;  %v14094_v52 = vld [vmem:[#allocation121_spill] sm:$0xff]  ;;  %v14104_v59 = vrot.slane %v12290_v44, %v13840_v53  ;;  %v5748_v31 = vsel %vm5643_vm12, %v5586_v13, %v5582_v60 }
 0x5b0   : >> { %v5683_v2 = vsel %vm5653_vm5, %v5286_v14, %v5682_v40  ;;  %v5290_v56 = vrot.slane %v14090_v19, %v13840_v53  ;;  %v5342_v40 = vrot.slane %v14092_v54, %v13840_v53  ;;  %v14093_v14 = vld [vmem:[#allocation108_spill] sm:$0xff]  ;;  %v5434_v35 = vrot.slane %v14094_v52, %v13840_v53 }
 0x5b1   : >> { %v5690_v25 = vsel %vm5653_vm5, %v5318_v57, %v5689_v58  ;;  %v14095_v19 = vld [vmem:[#allocation148_spill] sm:$0xff]  ;;  %v5714_v58 = vsel %vm5645_vm13, %v5430_v18, %v5713_v55  ;;  %v5694_v27 = vsel %vm5647_vm15, %v5338_v4, %v5693_v45  ;;  %v14097_v18 = vld [vmem:[#allocation122_spill] sm:$0xff]  ;;  %v6411_v4 = vpop.permute.xlu0 %6410  ;;  %v5474_v55 = vrot.slane %v14099_v41, %v13840_v53 }
 0x5b2   : >> { %v5684_v50 = vsel %vm5655_vm6, %v5290_v56, %v5683_v2  ;;  %v5350_v8 = vrot.slane %v14095_v19, %v13840_v53  ;;  %v13005_v57 = vsel %vm5655_vm6, %v5322_v49, %v5690_v25  ;;  %v5715_v23 = vsel %vm5647_vm15, %v5434_v35, %v5714_v58  ;;  %v14096_v2 = vld [vmem:[#allocation106_spill] sm:$0xff] }
 0x5b3   : >> { %v5446_v56 = vrot.slane %v14096_v2, %v13840_v53  ;;  %v5716_v52 = vsel %vm5649_vm3, %v5438_v34, %v5715_v23  ;;  %v5466_v45 = vrot.slane %v14097_v18, %v13840_v53  ;;  %v5450_v35 = vrot.slane %v14098_v7, %v13840_v53  ;;  %v14102_v2 = vld [vmem:[#allocation168_spill] sm:$0xff] }
 0x5b4   : >> { %v5717_v49 = vsel %vm5651_vm4, %v5442_v36, %v5716_v52  ;;  %v5470_v25 = vrot.slane %v12188_v47, %v13840_v53  ;;  %v6454_v0 = vsel %vm481_vm0, %v5684_v50, %v6411_v4  ;;  %v14100_v47 = vld [vmem:[#allocation99_spill] sm:$0xff]  ;;  %v5482_v23 = vrot.slane %v14101_v22, %v13840_v53 }
 0x5b5   : >> { %v5718_v46 = vsel %vm5653_vm5, %v5446_v56, %v5717_v49  ;;  %v5722_v34 = vsel %vm5647_vm15, %v5466_v45, %v5721_v48  ;;  %6472 = vst [vmem:[%s12783_s21 + $0x20] sm:$0xff] %v6454_v0  ;;  %v5478_v36 = vrot.slane %v14100_v47, %v13840_v53  ;;  %v5502_v56 = vrot.slane %v14102_v2, %v13840_v53  ;;  %v14105_v45 = vld [vmem:[#allocation128_spill] sm:$0xff] }
 0x5b6   : >> { %v13039_v58 = vsel %vm5655_vm6, %v5450_v35, %v5718_v46  ;;  %v5723_v51 = vsel %vm5649_vm3, %v5470_v25, %v5722_v34  ;;  %v14103_v52 = vrot.slane %v12259_v63, %v13840_v53  ;;  %v5498_v4 = vrot.slane %v14105_v45, %v13840_v53  ;;  %v14106_v35 = vld [vmem:[#allocation173_spill] sm:$0xff]  ;;  %v14107_v25 = vld [vmem:[#allocation127_spill] sm:$0xff]  ;;  %v14109_v46 = vld [vmem:[#allocation174_spill] sm:$0xff] }
 0x5b7   : >> { %v5724_v50 = vsel %vm5651_vm4, %v5474_v55, %v5723_v51  ;;  %v5506_v49 = vrot.slane %v14106_v35, %v13840_v53  ;;  %v5510_v48 = vrot.slane %v14107_v25, %v13840_v53  ;;  %v14108_v0 = vrot.slane %v12270_v24, %v13840_v53 }
 0x5b8   : >> { %v5727_v18 = vsel %vm5643_vm12, %v14104_v59, %v14103_v52  ;;  %v5725_v7 = vsel %vm5653_vm5, %v5478_v36, %v5724_v50  ;;  %v5514_v41 = vrot.slane %v14109_v46, %v13840_v53  ;;  %v14110_v34 = vrot.slane %v12316_v6, %v13840_v53  ;;  %v14113_v50 = vld [vmem:[#allocation134_spill] sm:$0xff]  ;;  %v14114_v52 = vld [vmem:[#allocation133_spill] sm:$0xff] }
 0x5b9   : >> { %v5728_v63 = vsel %vm5645_vm13, %v14108_v0, %v5727_v18  ;;  %v13068_v44 = vsel %vm5655_vm6, %v5482_v23, %v5725_v7  ;;  %v14111_v47 = vrot.slane %v12356_v61, %v13840_v53  ;;  %v5534_v22 = vrot.slane %v12326_v37, %v13840_v53 }
 0x5ba   : >> { %v5729_v55 = vsel %vm5647_vm15, %v5498_v4, %v5728_v63  ;;  %v14112_v23 = vrot.slane %v12352_v11, %v13840_v53  ;;  %v5530_v2 = vrot.slane %v14113_v50, %v13840_v53  ;;  %v5538_v61 = vrot.slane %v12586_v28, %v13840_v53 }
 0x5bb   : >> { %v5734_v36 = vsel %vm5643_vm12, %v14111_v47, %v14110_v34  ;;  %v5730_v24 = vsel %vm5649_vm3, %v5502_v56, %v5729_v55  ;;  %v5542_v59 = vrot.slane %v14114_v52, %v13840_v53  ;;  %v5546_v56 = vrot.slane %v12600_v1, %v13840_v53 }
 0x5bc   : >> { %v5735_v51 = vsel %vm5645_vm13, %v14112_v23, %v5734_v36  ;;  %v5731_v6 = vsel %vm5651_vm4, %v5506_v49, %v5730_v24  ;;  %v14115_v18 = vrot.slane %v12375_v32, %v13840_v53  ;;  %v5562_v28 = vrot.slane %v12420_v10, %v13840_v53  ;;  %v14116_v10 = vld [vmem:[#allocation135_spill] sm:$0xff] }
 0x5bd   : >> { %v5732_v37 = vsel %vm5653_vm5, %v5510_v48, %v5731_v6  ;;  %v5736_v11 = vsel %vm5647_vm15, %v5530_v2, %v5735_v51  ;;  %v5566_v7 = vrot.slane %v12383_v29, %v13840_v53  ;;  %v5574_v35 = vrot.slane %v14116_v10, %v13840_v53  ;;  %v14117_v48 = vld [vmem:[#allocation177_spill] sm:$0xff]  ;;  %v14124_v51 = vld [vmem:[#allocation175_spill] sm:$0xff] }
 0x5be   : >> { %v5741_v45 = vsel %vm5643_vm12, %v5554_v43, %v14115_v18  ;;  %v13108_v4 = vsel %vm5655_vm6, %v5514_v41, %v5732_v37  ;;  %v5737_v1 = vsel %vm5649_vm3, %v5534_v22, %v5736_v11  ;;  %v5570_v43 = vrot.slane %v12618_v5, %v13840_v53  ;;  %v14119_v41 = vld [vmem:[#allocation171_spill] sm:$0xff] }
 0x5bf   : >> { %v5742_v32 = vsel %vm5645_vm13, %v5558_v33, %v5741_v45  ;;  %v5738_v3 = vsel %vm5651_vm4, %v5538_v61, %v5737_v1  ;;  %v5578_v29 = vrot.slane %v14117_v48, %v13840_v53  ;;  %v14118_v63 = vrot.slane %v12470_v21, %v13840_v53  ;;  %v6413_v21 = vpop.permute.xlu1 %6412  ;;  %v14128_v11 = vld [vmem:[#allocation179_spill] sm:$0xff] }
 0x5c0   : >> { %v5743_v49 = vsel %vm5647_vm15, %v5562_v28, %v5742_v32  ;;  %v5739_v25 = vsel %vm5653_vm5, %v5542_v59, %v5738_v3  ;;  %v5594_v55 = vrot.slane %v14119_v41, %v13840_v53  ;;  %v5695_v42 = vsel %vm5649_vm3, %v5342_v40, %v5694_v27  ;;  %v14129_v28 = vld [vmem:[#allocation98_spill] sm:$0xff] }
 0x5c1   : >> { %v5744_v0 = vsel %vm5649_vm3, %v5566_v7, %v5743_v49  ;;  %v13135_v5 = vsel %vm5655_vm6, %v5546_v56, %v5739_v25  ;;  %v5749_v46 = vsel %vm5645_vm13, %v14118_v63, %v5748_v31  ;;  %v5598_v60 = vrot.slane %v12425_v9, %v13840_v53  ;;  %v14131_v25 = vld [vmem:[#allocation167_spill] sm:$0xff]  ;;  %v14133_v31 = vld [vmem:[#allocation156_spill] sm:$0xff]  ;;  %v14134_v41 = vld [vmem:[#allocation126_spill] sm:$0xff] }
 0x5c2   : >> { %v5745_v33 = vsel %vm5651_vm4, %v5570_v43, %v5744_v0  ;;  %v5602_v13 = vrot.slane %v12663_v26, %v13840_v53  ;;  %v5606_v47 = vrot.slane %v12457_v30, %v13840_v53  ;;  %v5750_v36 = vsel %vm5647_vm15, %v5594_v55, %v5749_v46  ;;  %v6415_v43 = vpop.permute.xlu0 %6414 }
 0x5c3   : >> { %v5746_v62 = vsel %vm5653_vm5, %v5574_v35, %v5745_v33  ;;  %v14120_v54 = vrot.slane %v12526_v39, %v13840_v53  ;;  %v14121_v40 = vrot.slane %v12550_v38, %v13840_v53  ;;  %v6455_v26 = vsel %vm481_vm0, %v13005_v57, %v6413_v21 }
 0x5c4   : >> { %v13154_v34 = vsel %vm5655_vm6, %v5578_v29, %v5746_v62  ;;  %v5751_v27 = vsel %vm5649_vm3, %v5598_v60, %v5750_v36  ;;  %v14122_v24 = vrot.slane %v12542_v17, %v13840_v53  ;;  %v5626_v22 = vrot.slane %v12577_v12, %v13840_v53  ;;  %6473 = vst [vmem:[%s12783_s21 + $0x28] sm:$0xff] %v6455_v26  ;;  %v14125_v17 = vld [vmem:[#allocation159_spill] sm:$0xff]  ;;  %v14126_v12 = vld [vmem:[#allocation178_spill] sm:$0xff]  ;;  %v14132_v29 = vld [vmem:[#allocation164_spill] sm:$0xff] }
 0x5c5   : >> { %v5755_v9 = vsel %vm5643_vm12, %v14121_v40, %v14120_v54  ;;  %v14123_v39 = vrot.slane %v14093_v14, %v13840_v53  ;;  %v5610_v23 = vrot.slane %v12680_v20, %v13840_v53  ;;  %v5752_v57 = vsel %vm5651_vm4, %v5602_v13, %v5751_v27  ;;  %v14127_v20 = vld [vmem:[#allocation176_spill] sm:$0xff]  ;;  %v14136_v36 = vld [vmem:[#allocation169_spill] sm:$0xff]  ;;  %v14137_v40 = vld [vmem:[#allocation163_spill] sm:$0xff] }
 0x5c6   : >> { %v5756_v30 = vsel %vm5645_vm13, %v14122_v24, %v5755_v9  ;;  %v5630_v50 = vrot.slane %v14124_v51, %v13840_v53  ;;  %v5370_v2 = vrot.slane %v14125_v17, %v13840_v53  ;;  %v5753_v6 = vsel %vm5653_vm5, %v5606_v47, %v5752_v57  ;;  %v14138_v27 = vld [vmem:[#allocation170_spill] sm:$0xff] }
 0x5c7   : >> { %v5696_v38 = vsel %vm5651_vm4, %v14123_v39, %v5695_v42  ;;  %v5634_v61 = vrot.slane %v14126_v12, %v13840_v53  ;;  %v5757_v14 = vsel %vm5647_vm15, %v5626_v22, %v5756_v30  ;;  %v5754_v52 = vsel %vm5655_vm6, %v5610_v23, %v5753_v6  ;;  %v14135_v42 = vld [vmem:[#allocation160_spill] sm:$0xff] }
 0x5c8   : >> { %v5638_v59 = vrot.slane %v14127_v20, %v13840_v53  ;;  %v5758_v56 = vsel %vm5649_vm3, %v5630_v50, %v5757_v14  ;;  %v5697_v37 = vsel %vm5653_vm5, %v5350_v8, %v5696_v38  ;;  %v5642_v18 = vrot.slane %v14128_v11, %v13840_v53  ;;  %v14130_v8 = vld [vmem:[#allocation154_spill] sm:$0xff] }
 0x5c9   : >> { %v5759_v45 = vsel %vm5651_vm4, %v5634_v61, %v5758_v56  ;;  %v5354_v1 = vrot.slane %v14129_v28, %v13840_v53  ;;  %v5701_v32 = vsel %vm5647_vm15, %v5370_v2, %v12956_v16  ;;  %v5374_v10 = vrot.slane %v14130_v8, %v13840_v53 }
 0x5ca   : >> { %v5760_v7 = vsel %vm5653_vm5, %v5638_v59, %v5759_v45  ;;  %v5378_v48 = vrot.slane %v14131_v25, %v13840_v53  ;;  %v5402_v16 = vrot.slane %v14132_v29, %v13840_v53  ;;  %v5382_v33 = vrot.slane %v14133_v31, %v13840_v53 }
 0x5cb   : >> { %v5761_v3 = vsel %vm5655_vm6, %v5642_v18, %v5760_v7  ;;  %v5698_v19 = vsel %vm5655_vm6, %v5354_v1, %v5697_v37  ;;  %v5702_v49 = vsel %vm5649_vm3, %v5374_v10, %v5701_v32  ;;  %v5386_v55 = vrot.slane %v14134_v41, %v13840_v53  ;;  %v6417_v60 = vpop.permute.xlu1 %6416 }
 0x5cc   : >> { %v6456_v35 = vsel %vm481_vm0, %v5698_v19, %v6415_v43  ;;  %v5703_v0 = vsel %vm5651_vm4, %v5378_v48, %v5702_v49  ;;  %v5708_v46 = vsel %vm5647_vm15, %v5402_v16, %v12982_v15  ;;  %v5406_v62 = vrot.slane %v14135_v42, %v13840_v53 }
 0x5cd   : >> { %6474 = vst [vmem:[%s12783_s21 + $0x30] sm:$0xff] %v6456_v35  ;;  %v5704_v63 = vsel %vm5653_vm5, %v5382_v33, %v5703_v0  ;;  %v5410_v54 = vrot.slane %v14136_v36, %v13840_v53  ;;  %v5414_v9 = vrot.slane %v14137_v40, %v13840_v53  ;;  %v5418_v24 = vrot.slane %v14138_v27, %v13840_v53 }
 0x5ce   : >> { %v5705_v13 = vsel %vm5655_vm6, %v5386_v55, %v5704_v63  ;;  %v5709_v21 = vsel %vm5649_vm3, %v5406_v62, %v5708_v46 }
 0x5cf   : >> { %v6457_v47 = vsel %vm481_vm0, %v5705_v13, %v6417_v60  ;;  %v5710_v15 = vsel %vm5651_vm4, %v5410_v54, %v5709_v21 }
 0x5d0   : >> { %6475 = vst [vmem:[%s12783_s21 + $0x38] sm:$0xff] %v6457_v47  ;;  %v5711_v26 = vsel %vm5653_vm5, %v5414_v9, %v5710_v15 }
 0x5d1   : >> { %v5712_v22 = vsel %vm5655_vm6, %v5418_v24, %v5711_v26 }
 0x5d4   : >> { %v6419_v30 = vpop.permute.xlu0 %6418 }
 0x5d5   : >> { %v6458_v39 = vsel %vm481_vm0, %v5712_v22, %v6419_v30 }
 0x5d6   : >> { %6476 = vst [vmem:[%s12783_s21 + $0x40] sm:$0xff] %v6458_v39 }
 0x5e1   : >> { %v6421_v38 = vpop.permute.xlu1 %6420 }
 0x5e2   : >> { %v6459_v23 = vsel %vm481_vm0, %v13039_v58, %v6421_v38 }
 0x5e3   : >> { %6477 = vst [vmem:[%s12783_s21 + $0x48] sm:$0xff] %v6459_v23 }
 0x5ea   : >> { %v6423_v57 = vpop.permute.xlu0 %6422 }
 0x5eb   : >> { %v6460_v51 = vsel %vm481_vm0, %v13068_v44, %v6423_v57 }
 0x5ec   : >> { %6478 = vst [vmem:[%s12783_s21 + $0x50] sm:$0xff] %v6460_v51 }
 0x5f2   : >> { %v6425_v50 = vpop.permute.xlu1 %6424 }
 0x5f3   : >> { %v6461_v17 = vsel %vm481_vm0, %v13108_v4, %v6425_v50 }
 0x5f4   : >> { %6479 = vst [vmem:[%s12783_s21 + $0x58] sm:$0xff] %v6461_v17 }
 0x5f6   : >> { %v6427_v2 = vpop.permute.xlu0 %6426 }
 0x5f7   : >> { %v6462_v6 = vsel %vm481_vm0, %v13135_v5, %v6427_v2 }
 0x5f8   : >> { %6480 = vst [vmem:[%s12783_s21 + $0x60] sm:$0xff] %v6462_v6 }
 0x5fc   : >> { %v6429_v12 = vpop.permute.xlu1 %6428 }
 0x5fd   : >> { %v6463_v58 = vsel %vm481_vm0, %v13154_v34, %v6429_v12 }
 0x5fe   : >> { %6481 = vst [vmem:[%s12783_s21 + $0x68] sm:$0xff] %v6463_v58 }
 0x601   : >> { %v6431_v61 = vpop.permute.xlu0 %6430  ;;  %1694 = sbr.rel (!%p1692_p11) target bundleno = 765 (0x2fd), region = 131 }
 0x602   : >> { %v6464_v44 = vsel %vm481_vm0, %v5754_v52, %v6431_v61 }
 0x603   : >> { %6482 = vst [vmem:[%s12783_s21 + $0x70] sm:$0xff] %v6464_v44 }
 0x605   : >> { %v6433_v14 = vpop.permute.xlu1 %6432 }
 0x606   : >> { %v6465_v20 = vsel %vm481_vm0, %v5761_v3, %v6433_v14 }
 0x607   : >> { %6483 = vst [vmem:[%s12783_s21 + $0x78] sm:$0xff] %v6465_v20 }
 0x608   : > { %8785 = shalt.err (!%p8782_p4)
}
 0x609   : > { %s8786_s12 = scalar_lea.hbm %s13269_s30, 4096  ;;  %s8790_s26 = scalar_lea.hbm %s13357_s9, 8192 }
 0x60a   : > { %p8787_p7 = scmp.ne.s32.totalorder %s13269_s30, %s8786_s12  ;;  %p8791_p10 = scmp.lt.u32.totalorder %s13269_s30, %s13357_s9 }
 0x60b   : > { %p8792_p11 = scmp.lt.u32.totalorder %s8790_s26, %s8786_s12  ;;  %p8794_p13 = scmp.lt.u32.totalorder %s8786_s12, %s13269_s30 }
 0x60c   : > { %p8788_p8 = pnand %p8787_p7, %p8980_p5 }
 0x60d   : > { %p8793_p12 = por %p8792_p11, %p8791_p10 }
 0x60e   : > { %p8789_p9 = pneg %p8788_p8 }
 0x60f   : > { %p8795_p0 = por %p8794_p13, %p8793_p12 }
 0x611   : > { %p8796_p1 = pnand %p8795_p0, %p8789_p9 }
 0x613   : > { %8799 = shalt.err (!%p8796_p1)
}
 0x614   : > { %s8882_s1 = smov 128   ;;  %s8883_s2 = smov 8  }
 0x615   : > { %8703 = dma.vmem_to_hbm [thread:$0]  (%p8980_p5), %s13272_s0, 4096, %s13269_s30, %s6559_s11, %s8882_s1, %s8882_s1, %s8883_s2  }
 0x616   : > { %s6958_s29 = sshll.u32 %s8963_s17, 5  ;;  %s6594_s21 = sshll.u32 %s9254_s20, 4  ;;  %s13305_s21 = int_to_ptr.vmem [resolvable:$true] %s6594_s21 }
 0x617   : > { %s13303_s26 = scalar_lea.hbm %s13358_s10, %s6958_s29  ;;  %s6564_s27 = scalar_lea.sflag [#allocation6], %s9233_s28 }
 0x618   : > { %s8800_s18 = scalar_lea.vmem %s13305_s21, 32  ;;  %s8884_s3 = smov [#allocation5]  }
 0x619   : > { %p8801_p2 = scmp.ne.s32.totalorder %s13305_s21, %s8800_s18  ;;  %s8804_s30 = sshll.u32 %s8884_s3, 4  ;;  %s8805_s30 = int_to_ptr.vmem [resolvable:$false] %s8804_s30 }
 0x61a   : > { %s8806_s17 = scalar_lea.vmem %s8805_s30, 64  ;;  %p8807_p7 = scmp.lt.s32.totalorder %s13305_s21, %s8805_s30 }
 0x61b   : > { %p8802_p3 = pnand %p8801_p2, %p8980_p5  ;;  %p8808_p8 = scmp.lt.s32.totalorder %s8806_s17, %s8800_s18 }
 0x61d   : > { %p8803_p4 = pneg %p8802_p3  ;;  %p8809_p9 = por %p8808_p8, %p8807_p7 }
 0x61f   : > { %p8810_p10 = pnand %p8809_p9, %p8803_p4 }
 0x621   : > { %8813 = shalt.err (!%p8810_p10)
}
 0x622   : > { %s8814_s20 = scalar_lea.hbm %s13303_s26, 32  ;;  %s8818_s3 = scalar_lea.hbm %s13358_s10, 64 }
 0x623   : > { %p8815_p11 = scmp.ne.s32.totalorder %s13303_s26, %s8814_s20  ;;  %p8819_p0 = scmp.lt.u32.totalorder %s13303_s26, %s13358_s10 }
 0x624   : > { %p8820_p1 = scmp.lt.u32.totalorder %s8818_s3, %s8814_s20  ;;  %p8822_p3 = scmp.lt.u32.totalorder %s8814_s20, %s13303_s26 }
 0x625   : > { %p8816_p12 = pnand %p8815_p11, %p8980_p5 }
 0x626   : > { %p8821_p2 = por %p8820_p1, %p8819_p0 }
 0x627   : > { %p8817_p13 = pneg %p8816_p12 }
 0x628   : > { %p8823_p4 = por %p8822_p3, %p8821_p2 }
 0x62a   : > { %p8824_p7 = pnand %p8823_p4, %p8817_p13 }
 0x62c   : > { %8827 = shalt.err (!%p8824_p7)
}
 0x62d   : > { %s8885_s29 = smov 16   ;;  %s8886_s25 = smov 1  }
 0x62e   : > { %8704 = dma.vmem_to_hbm [thread:$0]  (%p8980_p5), %s13305_s21, 32, %s13303_s26, %s6564_s27, %s8885_s29, %s8885_s29, %s8886_s25  }
 0x62f PF: > { %p8714_p8 = scmp.ge.s32.totalorder %s8870_s16, 2  ;;  %s6609_s12 = sand.u32 1, %s8858_s13  }
 0x630   : > { %s6610_s18 = scalar_lea.sflag [#allocation4], %s6609_s12 }
 0x631   : > { %p8708_p9 = pnand %p8714_p8, %p8984_p6 }
 0x633   : > { %8849 = dma.done.wait (!%p8708_p9), %s6610_s18, 4096  }
 0x634   : > { %8851 = vsyncadd (!%p8708_p9), %s6610_s18, 4294963200  ;;  %s6619_s30 = scalar_lea.sflag [#allocation6], %s6609_s12 }
 0x635   : > { %8853 = dma.done.wait (!%p8708_p9), %s6619_s30, 32  }
 0x636   : > { %8855 = vsyncadd (!%p8708_p9), %s6619_s30, 4294967264  ;;  %p24_p5 = scmp.ge.s32.totalorder %s8967_s19, 4   ;;  %s14139_s13 = smov %s8862_s14 }
 0x637   : > { %s14140_s14 = smov %s8866_s15  ;;  %s14141_s15 = smov %s8978_s22 }
 0x638   : > { %s14142_s16 = smov %s8967_s19  ;;  %26 = sbr.rel (!%p24_p5) target bundleno = 10 (0xa), region = 142 }
 0x63f   :  { %6624 = vsyncpa [#allocation4], 1 }
 0x640   :  { %6626 = vsyncpa [#allocation4 + $0x1], 1 }
 0x641   :  { %6627 = vsyncpa [#allocation6], 1 }
 0x642   :  { %6629 = vsyncpa [#allocation6 + $0x1], 1 }

</bundles_post_ra>
